<compile_context>
chip_gen: v6e
topology: v6e:2x2x1
jax: 0.10.0
libtpu: 0.0.40
codegen_flags: <defaults>
</compile_context>

<pallas_src>
import math

import jax
import jax.numpy as jnp
from jax import lax
from jax.experimental import pallas as pl
from jax.experimental.pallas import tpu as pltpu


MATMUL_DTYPE = jnp.bfloat16      # matmul operand dtype; accumulation is always f32


# ----------------------------------------------------------------------------- in-kernel math
def _sigmoid(x):
    # single EUP push (tanh); robust for large-|x| activations.
    return 0.5 * (jnp.tanh(0.5 * x) + 1.0)


def _swish(x):
    return x * _sigmoid(x)


def _wx(w, x):
    """weight @ activation on the MXU: bf16 operands, f32 accumulation."""
    return jnp.dot(w, x.astype(w.dtype), preferred_element_type=jnp.float32)


def _xw(x, w):
    """activation @ weight on the MXU: bf16 operands, f32 accumulation."""
    return jnp.dot(x.astype(w.dtype), w, preferred_element_type=jnp.float32)


# ----------------------------------------------------------------------------- spec helpers
def _full_block(a):
    """Full-array BlockSpec for a 2-D / 3-D operand (grid=(1,))."""
    if a.ndim == 2:
        return pl.BlockSpec(a.shape, lambda i: (0, 0))
    if a.ndim == 3:
        return pl.BlockSpec(a.shape, lambda i: (0, 0, 0))
    raise ValueError(f"unsupported rank: {a.ndim}")


# NOTE: the whole problem (M = N*H*W = 128 lanes, C <= 160 sublanes, ~0.3 MB of
# folded weights) fits comfortably in VMEM on v5e/v6e/v7x, so grid=(1,).
# TODO(synk): when N*H*W grows past 128, add a leading "parallel" grid axis that
# splits M into >=512-lane chunks (v7x has 2 TensorCores) and re-tile pool/bsel
# per chunk so per-chunk GAP stays batch-local.
_COMPILER_PARAMS = pltpu.CompilerParams(dimension_semantics=("arbitrary",))


# ----------------------------------------------------------------------------- single fused kernel
def _make_fused_kernel(block_cfgs, n_masks, inv_temp):
    """stem + all MBConv blocks + head/GAP/L2-softmax in one kernel body."""

    def kernel(*refs):
        o_ref = refs[-1]
        it = iter(refs[:-1])

        def ld():
            return next(it)[...]

        # ---- stem conv (3x3 stride-2 patches pre-extracted on host) + BN + swish
        x_p = ld()                              # (k*k, M)  f32
        sw = ld()                               # (C0, k*k) bf16 (BN scale folded)
        sb = ld()                               # (C0, 1)   f32
        x = _swish(_wx(sw, x_p) + sb)           # (C0, M)

        pool = ld()                             # (M, N) bf16  per-batch average matrix
        bsel = ld()                             # (N, M) bf16  batch broadcaster (0/1)
        mask_refs = [next(it) for _ in range(n_masks)]   # each (k*k, 1, M) f32

        # ---- MBConv blocks
        for has_expand, has_se, has_res, offs, midx in block_cfgs:
            h = x
            if has_expand:                      # 1x1 expand + BN + swish
                ew = ld()
                eb = ld()
                h = _swish(_wx(ew, x) + eb)

            dw_w_ref = next(it)                 # (k*k, C, 1) f32, BN scale folded
            dw_b = ld()                         # (C, 1)      f32
            mref = mask_refs[midx]
            m = h.shape[-1]
            # depthwise kxk (stride 1, TF-"same"): taps are lane rotations of the
            # flattened (n,h,w) axis; image-border validity comes from the shared
            # (k*k, 1, M) mask.  3 partial accumulators expose VALU ILP.
            parts = [None, None, None]
            for t, off in enumerate(offs):
                if off == 0:                    # centre tap: always valid, no roll/mask
                    contrib = h * dw_w_ref[t]
                else:
                    shifted = pltpu.roll(h, shift=(-off) % m, axis=1)
                    contrib = (shifted * mref[t]) * dw_w_ref[t]
                s = t % 3
                parts[s] = contrib if parts[s] is None else parts[s] + contrib
            acc = parts[0]
            for part in parts[1:]:
                if part is not None:
                    acc = acc + part
            y = _swish(acc + dw_b)              # (C, M)

            if has_se:                          # squeeze-excite on per-batch GAP
                srw = ld()
                srb = ld()
                sew = ld()
                seb = ld()
                sq = _xw(y, pool)                       # (C, N)  per-batch mean
                s1 = _swish(_wx(srw, sq) + srb)         # (nsq, N)
                gate = _sigmoid(_wx(sew, s1) + seb)     # (C, N)
                y = y * _xw(gate, bsel)                 # broadcast gate back over M

            prw = ld()                          # 1x1 project + BN (no activation)
            prb = ld()
            out = _wx(prw, y) + prb
            if has_res:                         # drop_connect is identity in eval mode
                out = out + x
            x = out

        # ---- tail: head 1x1 conv + BN (no act), GAP, L2-constrained softmax FC
        hw_ = ld()                              # (C_head, C_in) bf16
        hb = ld()                               # (C_head, 1)    f32
        fcw = ld()                              # (C_head, nc)   bf16
        fcb = ld()                              # (1, nc)        f32
        hfeat = _wx(hw_, x) + hb                # (C_head, M)
        # per-batch sum-pool in (N, C_head) layout (trans-B contraction); the
        # 1/HW scale cancels inside the L2 normalisation, so 0/1 bsel suffices.
        pooled = lax.dot_general(bsel, hfeat.astype(bsel.dtype),
                                 (((1,), (1,)), ((), ())),
                                 preferred_element_type=jnp.float32)   # (N, C_head)
        ss = jnp.sum(pooled * pooled, axis=1, keepdims=True)
        xn = pooled * lax.rsqrt(jnp.maximum(ss, 1e-24)) * inv_temp
        # logits emitted directly as (N, num_classes): no host-side transpose.
        o_ref[...] = jnp.dot(xn.astype(fcw.dtype), fcw,
                             preferred_element_type=jnp.float32) + fcb

    return kernel


# ----------------------------------------------------------------------------- host-side glue
def _stem_patches(x_nchw, ksize, stride):
    """TF-'same' strided 3x3 patch extraction for the grayscale stem.

    Returns (ksize*ksize, N*Ho*Wo).  The patch extraction stays as a few tiny
    XLA slice ops (Cin=1, ~2 KB); the stem matmul+BN+swish runs inside the
    fused Pallas kernel.
    """
    n, cin, h, w = x_nchw.shape
    assert cin == 1, "EfficientNetL2Softmax is a grayscale model (in_channels=1)"
    x = x_nchw[:, 0, :, :].astype(jnp.float32)
    ho = -(-h // stride)
    wo = -(-w // stride)
    ph = max((ho - 1) * stride + ksize - h, 0)
    pw = max((wo - 1) * stride + ksize - w, 0)
    xp = jnp.pad(x, ((0, 0), (ph // 2, ph - ph // 2), (pw // 2, pw - pw // 2)))
    pats = []
    for kh in range(ksize):
        for kw in range(ksize):
            pats.append(
                xp[:, kh:kh + stride * (ho - 1) + 1:stride,
                   kw:kw + stride * (wo - 1) + 1:stride].reshape(-1))
    return jnp.stack(pats, axis=0)


def fold_bn(bn, eps):
    gamma, beta, mean, var = bn
    scale = gamma / jnp.sqrt(var + eps)
    bias = beta - mean * scale
    return scale, bias


def _make_pool_bsel(nb, hw):
    """pool: (M, nb) per-batch averaging matrix; bsel: (nb, M) batch broadcaster."""
    owner = jnp.arange(nb * hw) // hw
    onehot = (owner[:, None] == jnp.arange(nb)[None, :]).astype(jnp.float32)
    pool = (onehot / float(hw)).astype(MATMUL_DTYPE)   # 1/hw is a power of 2 -> exact
    bsel = onehot.T.astype(MATMUL_DTYPE)               # 0/1 -> exact
    return pool, bsel


def _make_dw_mask(nb, h, w, k):
    """Shared tap-validity mask (k*k, 1, M) for a TF-'same' stride-1 odd-k depthwise conv."""
    m = nb * h * w
    p = jnp.arange(m)
    hh = (p // w) % h
    ww = p % w
    r = (k - 1) // 2
    masks, offs = [], []
    for kh in range(k):
        for kw in range(k):
            dh, dw_ = kh - r, kw - r
            valid = ((hh + dh >= 0) & (hh + dh < h) &
                     (ww + dw_ >= 0) & (ww + dw_ < w)).astype(jnp.float32)
            masks.append(valid)
            offs.append(dh * w + dw_)
    return jnp.stack(masks, axis=0).reshape(k * k, 1, m), tuple(offs)


def pack_model(params, batch):
    """Fold BN into weights and flatten everything into the kernel's operand order."""
    eps = GLOBAL_PARAMS["batch_norm_epsilon"]
    img = GLOBAL_PARAMS["image_size"]
    h = w = -(-img // 2)                 # spatial size after the stride-2 stem
    nb = batch

    args = []
    # stem (+bn0) folded
    ss, sb = fold_bn(params["bn0"], eps)
    args.append((params["stem_w"] * ss[None, :]).T.astype(MATMUL_DTYPE))   # (C0, k*k*Cin)
    args.append(sb.reshape(-1, 1))
    # shared pooling operands (SE GAP / broadcast and tail GAP)
    pool, bsel = _make_pool_bsel(nb, h * w)
    args += [pool, bsel]
    # one shared border mask per unique depthwise kernel size
    mask_by_k = {}
    for _, ba in params["blocks"]:
        k = ba["kernel_size"]
        if k not in mask_by_k:
            mask, offs = _make_dw_mask(nb, h, w, k)
            mask_by_k[k] = (len(mask_by_k), mask, offs)
            args.append(mask)

    cfgs = []
    for p, ba in params["blocks"]:
        assert ba["stride"] == 1  # TODO(synk): strided depthwise not needed for this config
        has_expand = ba["expand_ratio"] != 1
        if has_expand:
            s0, b0 = fold_bn(p["bn0"], eps)
            args.append((p["expand_w"] * s0[None, :]).T.astype(MATMUL_DTYPE))
            args.append(b0.reshape(-1, 1))
        s1, b1 = fold_bn(p["bn1"], eps)
        midx, _, offs = mask_by_k[ba["kernel_size"]]
        args.append((p["dw_w"] * s1[None, :])[:, :, None])     # (k*k, C, 1) f32, BN folded
        args.append(b1.reshape(-1, 1))
        has_se = ba["se_ratio"] is not None and 0 < ba["se_ratio"] <= 1
        if has_se:
            args.append(p["se_red_w"].T.astype(MATMUL_DTYPE))  # (nsq, C)
            args.append(p["se_red_b"].reshape(-1, 1))
            args.append(p["se_exp_w"].T.astype(MATMUL_DTYPE))  # (C, nsq)
            args.append(p["se_exp_b"].reshape(-1, 1))
        s2, b2 = fold_bn(p["bn2"], eps)
        args.append((p["proj_w"] * s2[None, :]).T.astype(MATMUL_DTYPE))
        args.append(b2.reshape(-1, 1))
        has_res = (ba["id_skip"] and ba["stride"] == 1
                   and ba["input_filters"] == ba["output_filters"])
        cfgs.append((has_expand, has_se, has_res, offs, midx))

    # tail: head conv + folded BN, FC in natural (C_head, num_classes) orientation
    sh, bh = fold_bn(params["bn1"], eps)
    args.append((params["head_w"] * sh[None, :]).T.astype(MATMUL_DTYPE))   # (C_head, C_in)
    args.append(bh.reshape(-1, 1))
    args.append(params["fc_w"].astype(MATMUL_DTYPE))                       # (C_head, nc)
    args.append(params["fc_b"].reshape(1, -1))                             # (1, nc)

    meta = dict(n_masks=len(mask_by_k), nb=nb,
                num_classes=int(params["fc_b"].shape[0]))
    return args, tuple(cfgs), meta


def make_forward(block_cfgs, meta, *, temp=0.05, stem_ksize=3, stem_stride=2):
    # TODO(synk): L2Softmax source not provided; implemented per the
    # L2-constrained-softmax paper: logits = Linear(L2-normalize(x) / temp).
    nb, nc = meta["nb"], meta["num_classes"]
    kernel = _make_fused_kernel(block_cfgs, meta["n_masks"], 1.0 / temp)

    def fwd(flat_args, x_nchw):
        x_p = _stem_patches(x_nchw, stem_ksize, stem_stride)   # (k*k, N*Ho*Wo)
        args = [x_p] + list(flat_args)
        return pl.pallas_call(
            kernel,
            out_shape=jax.ShapeDtypeStruct((nb, nc), jnp.float32),
            grid=(1,),
            in_specs=[_full_block(a) for a in args],
            out_specs=pl.BlockSpec((nb, nc), lambda i: (0, 0)),
            compiler_params=_COMPILER_PARAMS,
        )(*args)

    return jax.jit(fwd)


# ----------------------------------------------------------------------------- model config / init
def round_filters(filters, width_coefficient, depth_divisor, min_depth=None):
    if width_coefficient is None:
        return filters
    filters *= width_coefficient
    min_depth = min_depth or depth_divisor
    new_filters = max(min_depth,
                      int(filters + depth_divisor / 2) // depth_divisor * depth_divisor)
    if new_filters < 0.9 * filters:
        new_filters += depth_divisor
    return int(new_filters)


def round_repeats(repeats, depth_coefficient):
    if depth_coefficient is None:
        return repeats
    return int(math.ceil(depth_coefficient * repeats))


GLOBAL_PARAMS = dict(
    width_coefficient=0.125,
    depth_coefficient=None,
    depth_divisor=8,
    min_depth=None,
    batch_norm_epsilon=1e-3,
    num_classes=10,
    drop_connect_rate=0.2,   # identity in eval mode
    image_size=16,
)

BLOCKS_ARGS = [
    dict(kernel_size=3, num_repeat=1, input_filters=32, output_filters=16,
         expand_ratio=1, id_skip=True, stride=1, se_ratio=0.25),
    dict(kernel_size=3, num_repeat=2, input_filters=16, output_filters=24,
         expand_ratio=6, id_skip=True, stride=1, se_ratio=0.25),
]


def init_bn(key, c):
    k1, k2, k3, k4 = jax.random.split(key, 4)
    gamma = 1.0 + 0.1 * jax.random.normal(k1, (c,), jnp.float32)
    beta = 0.05 * jax.random.normal(k2, (c,), jnp.float32)
    mean = 0.05 * jax.random.normal(k3, (c,), jnp.float32)
    var = 1.0 + 0.1 * jax.random.uniform(k4, (c,), jnp.float32)
    return (gamma, beta, mean, var)


def init_mbconv(key, ba):
    inp = ba["input_filters"]
    oup = inp * ba["expand_ratio"]
    k = ba["kernel_size"]
    keys = jax.random.split(key, 10)
    p = {}
    if ba["expand_ratio"] != 1:
        p["expand_w"] = 0.1 * jax.random.normal(keys[0], (inp, oup), jnp.float32)
        p["bn0"] = init_bn(keys[1], oup)
    p["dw_w"] = 0.1 * jax.random.normal(keys[2], (k * k, oup), jnp.float32)
    p["bn1"] = init_bn(keys[3], oup)
    has_se = ba["se_ratio"] is not None and 0 < ba["se_ratio"] <= 1
    if has_se:
        n_sq = max(1, int(ba["input_filters"] * ba["se_ratio"]))
        p["se_red_w"] = 0.1 * jax.random.normal(keys[4], (oup, n_sq), jnp.float32)
        p["se_red_b"] = 0.01 * jax.random.normal(keys[5], (n_sq,), jnp.float32)
        p["se_exp_w"] = 0.1 * jax.random.normal(keys[6], (n_sq, oup), jnp.float32)
        p["se_exp_b"] = 0.01 * jax.random.normal(keys[7], (oup,), jnp.float32)
    p["proj_w"] = 0.1 * jax.random.normal(keys[8], (oup, ba["output_filters"]), jnp.float32)
    p["bn2"] = init_bn(keys[9], ba["output_filters"])
    return p


def build_model(key):
    gp = GLOBAL_PARAMS
    wc, dc, dd = gp["width_coefficient"], gp["depth_coefficient"], gp["depth_divisor"]

    # expand block list exactly like EfficientNetL2Softmax.__init__
    block_list = []
    for ba in BLOCKS_ARGS:
        ba = dict(ba)
        ba["input_filters"] = round_filters(ba["input_filters"], wc, dd, gp["min_depth"])
        ba["output_filters"] = round_filters(ba["output_filters"], wc, dd, gp["min_depth"])
        ba["num_repeat"] = round_repeats(ba["num_repeat"], dc)
        block_list.append(dict(ba))
        if ba["num_repeat"] > 1:
            ba["input_filters"] = ba["output_filters"]
            ba["stride"] = 1
        for _ in range(ba["num_repeat"] - 1):
            block_list.append(dict(ba))

    stem_out = round_filters(32, wc, dd, gp["min_depth"])
    head_in = block_list[-1]["output_filters"]
    head_out = round_filters(1280, wc, dd, gp["min_depth"])

    keys = jax.random.split(key, 6 + len(block_list))
    params = {
        "stem_w": 0.1 * jax.random.normal(keys[0], (9, stem_out), jnp.float32),  # (k*k*Cin, Cout)
        "bn0": init_bn(keys[1], stem_out),
        "head_w": 0.1 * jax.random.normal(keys[2], (head_in, head_out), jnp.float32),
        "bn1": init_bn(keys[3], head_out),
        "fc_w": 0.1 * jax.random.normal(keys[4], (head_out, gp["num_classes"]), jnp.float32),
        "fc_b": 0.01 * jax.random.normal(keys[5], (gp["num_classes"],), jnp.float32),
        "blocks": [(init_mbconv(keys[6 + i], ba), ba) for i, ba in enumerate(block_list)],
    }
    return params


# ----------------------------------------------------------------------------- main
if __name__ == "__main__":
    key = jax.random.PRNGKey(0)
    pkey, xkey = jax.random.split(key)
    params = build_model(pkey)
    x = jax.random.normal(xkey, (2, 1, 16, 16), jnp.float32)   # grayscale NCHW

    flat_args, block_cfgs, meta = pack_model(params, batch=x.shape[0])
    fwd = make_forward(block_cfgs, meta, temp=0.05)

    out = fwd(flat_args, x)
    out = jax.block_until_ready(out)
    assert out.shape == (x.shape[0], GLOBAL_PARAMS["num_classes"])
    assert bool(jnp.all(jnp.isfinite(out)))
    print("KERNEL_OK")
</pallas_src>

<mosaic_0001>
module attributes {stable_mosaic.version = 11 : i64} {
  func.func @kernel(%arg0: i32, %arg1: memref<9x128xf32, #tpu.memory_space<vmem>>, %arg2: memref<8x9xbf16, #tpu.memory_space<vmem>>, %arg3: memref<8x1xf32, #tpu.memory_space<vmem>>, %arg4: memref<128x2xbf16, #tpu.memory_space<vmem>>, %arg5: memref<2x128xbf16, #tpu.memory_space<vmem>>, %arg6: memref<9x1x128xf32, #tpu.memory_space<vmem>>, %arg7: memref<9x8x1xf32, #tpu.memory_space<vmem>>, %arg8: memref<8x1xf32, #tpu.memory_space<vmem>>, %arg9: memref<2x8xbf16, #tpu.memory_space<vmem>>, %arg10: memref<2x1xf32, #tpu.memory_space<vmem>>, %arg11: memref<8x2xbf16, #tpu.memory_space<vmem>>, %arg12: memref<8x1xf32, #tpu.memory_space<vmem>>, %arg13: memref<8x8xbf16, #tpu.memory_space<vmem>>, %arg14: memref<8x1xf32, #tpu.memory_space<vmem>>, %arg15: memref<48x8xbf16, #tpu.memory_space<vmem>>, %arg16: memref<48x1xf32, #tpu.memory_space<vmem>>, %arg17: memref<9x48x1xf32, #tpu.memory_space<vmem>>, %arg18: memref<48x1xf32, #tpu.memory_space<vmem>>, %arg19: memref<2x48xbf16, #tpu.memory_space<vmem>>, %arg20: memref<2x1xf32, #tpu.memory_space<vmem>>, %arg21: memref<48x2xbf16, #tpu.memory_space<vmem>>, %arg22: memref<48x1xf32, #tpu.memory_space<vmem>>, %arg23: memref<8x48xbf16, #tpu.memory_space<vmem>>, %arg24: memref<8x1xf32, #tpu.memory_space<vmem>>, %arg25: memref<48x8xbf16, #tpu.memory_space<vmem>>, %arg26: memref<48x1xf32, #tpu.memory_space<vmem>>, %arg27: memref<9x48x1xf32, #tpu.memory_space<vmem>>, %arg28: memref<48x1xf32, #tpu.memory_space<vmem>>, %arg29: memref<2x48xbf16, #tpu.memory_space<vmem>>, %arg30: memref<2x1xf32, #tpu.memory_space<vmem>>, %arg31: memref<48x2xbf16, #tpu.memory_space<vmem>>, %arg32: memref<48x1xf32, #tpu.memory_space<vmem>>, %arg33: memref<8x48xbf16, #tpu.memory_space<vmem>>, %arg34: memref<8x1xf32, #tpu.memory_space<vmem>>, %arg35: memref<160x8xbf16, #tpu.memory_space<vmem>>, %arg36: memref<160x1xf32, #tpu.memory_space<vmem>>, %arg37: memref<160x10xbf16, #tpu.memory_space<vmem>>, %arg38: memref<1x10xf32, #tpu.memory_space<vmem>>, %arg39: memref<2x10xf32, #tpu.memory_space<vmem>>) attributes {dimension_semantics = [#tpu.dimension_semantics<arbitrary>], iteration_bounds = array<i64: 1>, scalar_prefetch = 0 : i64, scratch_operands = 0 : i64, tpu.core_type = #tpu.core_type<tc>, window_params = [{pipeline_mode = #tpu.pipeline_mode<synchronous>, transform_indices = @transform_0, window_bounds = array<i64: 9, 128>}, {pipeline_mode = #tpu.pipeline_mode<synchronous>, transform_indices = @transform_1, window_bounds = array<i64: 8, 9>}, {pipeline_mode = #tpu.pipeline_mode<synchronous>, transform_indices = @transform_2, window_bounds = array<i64: 8, 1>}, {pipeline_mode = #tpu.pipeline_mode<synchronous>, transform_indices = @transform_3, window_bounds = array<i64: 128, 2>}, {pipeline_mode = #tpu.pipeline_mode<synchronous>, transform_indices = @transform_4, window_bounds = array<i64: 2, 128>}, {pipeline_mode = #tpu.pipeline_mode<synchronous>, transform_indices = @transform_5, window_bounds = array<i64: 9, 1, 128>}, {pipeline_mode = #tpu.pipeline_mode<synchronous>, transform_indices = @transform_6, window_bounds = array<i64: 9, 8, 1>}, {pipeline_mode = #tpu.pipeline_mode<synchronous>, transform_indices = @transform_7, window_bounds = array<i64: 8, 1>}, {pipeline_mode = #tpu.pipeline_mode<synchronous>, transform_indices = @transform_8, window_bounds = array<i64: 2, 8>}, {pipeline_mode = #tpu.pipeline_mode<synchronous>, transform_indices = @transform_9, window_bounds = array<i64: 2, 1>}, {pipeline_mode = #tpu.pipeline_mode<synchronous>, transform_indices = @transform_10, window_bounds = array<i64: 8, 2>}, {pipeline_mode = #tpu.pipeline_mode<synchronous>, transform_indices = @transform_11, window_bounds = array<i64: 8, 1>}, {pipeline_mode = #tpu.pipeline_mode<synchronous>, transform_indices = @transform_12, window_bounds = array<i64: 8, 8>}, {pipeline_mode = #tpu.pipeline_mode<synchronous>, transform_indices = @transform_13, window_bounds = array<i64: 8, 1>}, {pipeline_mode = #tpu.pipeline_mode<synchronous>, transform_indices = @transform_14, window_bounds = array<i64: 48, 8>}, {pipeline_mode = #tpu.pipeline_mode<synchronous>, transform_indices = @transform_15, window_bounds = array<i64: 48, 1>}, {pipeline_mode = #tpu.pipeline_mode<synchronous>, transform_indices = @transform_16, window_bounds = array<i64: 9, 48, 1>}, {pipeline_mode = #tpu.pipeline_mode<synchronous>, transform_indices = @transform_17, window_bounds = array<i64: 48, 1>}, {pipeline_mode = #tpu.pipeline_mode<synchronous>, transform_indices = @transform_18, window_bounds = array<i64: 2, 48>}, {pipeline_mode = #tpu.pipeline_mode<synchronous>, transform_indices = @transform_19, window_bounds = array<i64: 2, 1>}, {pipeline_mode = #tpu.pipeline_mode<synchronous>, transform_indices = @transform_20, window_bounds = array<i64: 48, 2>}, {pipeline_mode = #tpu.pipeline_mode<synchronous>, transform_indices = @transform_21, window_bounds = array<i64: 48, 1>}, {pipeline_mode = #tpu.pipeline_mode<synchronous>, transform_indices = @transform_22, window_bounds = array<i64: 8, 48>}, {pipeline_mode = #tpu.pipeline_mode<synchronous>, transform_indices = @transform_23, window_bounds = array<i64: 8, 1>}, {pipeline_mode = #tpu.pipeline_mode<synchronous>, transform_indices = @transform_24, window_bounds = array<i64: 48, 8>}, {pipeline_mode = #tpu.pipeline_mode<synchronous>, transform_indices = @transform_25, window_bounds = array<i64: 48, 1>}, {pipeline_mode = #tpu.pipeline_mode<synchronous>, transform_indices = @transform_26, window_bounds = array<i64: 9, 48, 1>}, {pipeline_mode = #tpu.pipeline_mode<synchronous>, transform_indices = @transform_27, window_bounds = array<i64: 48, 1>}, {pipeline_mode = #tpu.pipeline_mode<synchronous>, transform_indices = @transform_28, window_bounds = array<i64: 2, 48>}, {pipeline_mode = #tpu.pipeline_mode<synchronous>, transform_indices = @transform_29, window_bounds = array<i64: 2, 1>}, {pipeline_mode = #tpu.pipeline_mode<synchronous>, transform_indices = @transform_30, window_bounds = array<i64: 48, 2>}, {pipeline_mode = #tpu.pipeline_mode<synchronous>, transform_indices = @transform_31, window_bounds = array<i64: 48, 1>}, {pipeline_mode = #tpu.pipeline_mode<synchronous>, transform_indices = @transform_32, window_bounds = array<i64: 8, 48>}, {pipeline_mode = #tpu.pipeline_mode<synchronous>, transform_indices = @transform_33, window_bounds = array<i64: 8, 1>}, {pipeline_mode = #tpu.pipeline_mode<synchronous>, transform_indices = @transform_34, window_bounds = array<i64: 160, 8>}, {pipeline_mode = #tpu.pipeline_mode<synchronous>, transform_indices = @transform_35, window_bounds = array<i64: 160, 1>}, {pipeline_mode = #tpu.pipeline_mode<synchronous>, transform_indices = @transform_36, window_bounds = array<i64: 160, 10>}, {pipeline_mode = #tpu.pipeline_mode<synchronous>, transform_indices = @transform_37, window_bounds = array<i64: 1, 10>}, {pipeline_mode = #tpu.pipeline_mode<synchronous>, transform_indices = @transform_38, window_bounds = array<i64: 2, 10>}]} {
    %c0 = arith.constant 0 : index
    %c0_0 = arith.constant 0 : index
    %0 = vector.load %arg1[%c0, %c0_0] : memref<9x128xf32, #tpu.memory_space<vmem>>, vector<9x128xf32>
    %c0_1 = arith.constant 0 : index
    %c0_2 = arith.constant 0 : index
    %1 = vector.load %arg2[%c0_1, %c0_2] : memref<8x9xbf16, #tpu.memory_space<vmem>>, vector<8x9xbf16>
    %c0_3 = arith.constant 0 : index
    %c0_4 = arith.constant 0 : index
    %2 = vector.load %arg3[%c0_3, %c0_4] : memref<8x1xf32, #tpu.memory_space<vmem>>, vector<8x1xf32>
    %3 = arith.truncf %0 : vector<9x128xf32> to vector<9x128xbf16>
    %cst = arith.constant dense<0.000000e+00> : vector<8x128xf32>
    %4 = tpu.matmul %1, %3, %cst {dimension_numbers = #tpu.dot_dimension_numbers<[1], [0], [0], [1], [0, 0, 1, 1], [], []>} : vector<8x9xbf16>, vector<9x128xbf16>, vector<8x128xf32> -> vector<8x128xf32>
    %5 = vector.broadcast %2 : vector<8x1xf32> to vector<8x128xf32>
    %6 = arith.addf %4, %5 : vector<8x128xf32>
    %cst_5 = arith.constant 5.000000e-01 : f32
    %7 = vector.broadcast %cst_5 : f32 to vector<8x128xf32>
    %8 = arith.mulf %7, %6 : vector<8x128xf32>
    %9 = math.tanh %8 : vector<8x128xf32>
    %cst_6 = arith.constant 1.000000e+00 : f32
    %10 = vector.broadcast %cst_6 : f32 to vector<8x128xf32>
    %11 = arith.addf %9, %10 : vector<8x128xf32>
    %cst_7 = arith.constant 5.000000e-01 : f32
    %12 = vector.broadcast %cst_7 : f32 to vector<8x128xf32>
    %13 = arith.mulf %12, %11 : vector<8x128xf32>
    %14 = arith.mulf %6, %13 : vector<8x128xf32>
    %c0_8 = arith.constant 0 : index
    %c0_9 = arith.constant 0 : index
    %15 = vector.load %arg4[%c0_8, %c0_9] : memref<128x2xbf16, #tpu.memory_space<vmem>>, vector<128x2xbf16>
    %c0_10 = arith.constant 0 : index
    %c0_11 = arith.constant 0 : index
    %16 = vector.load %arg5[%c0_10, %c0_11] : memref<2x128xbf16, #tpu.memory_space<vmem>>, vector<2x128xbf16>
    %c0_12 = arith.constant 0 : index
    %c0_13 = arith.constant 0 : index
    %17 = vector.load %arg8[%c0_12, %c0_13] : memref<8x1xf32, #tpu.memory_space<vmem>>, vector<8x1xf32>
    %c9_i32 = arith.constant 9 : i32
    %18 = tpu.dynamic_rotate %14 by %c9_i32 dim 1 : vector<8x128xf32>, i32 -> vector<8x128xf32>
    %c0_14 = arith.constant 0 : index
    %c0_15 = arith.constant 0 : index
    %c0_16 = arith.constant 0 : index
    %19 = vector.load %arg6[%c0_14, %c0_15, %c0_16] : memref<9x1x128xf32, #tpu.memory_space<vmem>>, vector<1x1x128xf32>
    %20 = vector.shape_cast %19 : vector<1x1x128xf32> to vector<1x128xf32>
    %21 = vector.broadcast %20 : vector<1x128xf32> to vector<8x128xf32>
    %22 = arith.mulf %18, %21 : vector<8x128xf32>
    %c0_17 = arith.constant 0 : index
    %c0_18 = arith.constant 0 : index
    %c0_19 = arith.constant 0 : index
    %23 = vector.load %arg7[%c0_17, %c0_18, %c0_19] : memref<9x8x1xf32, #tpu.memory_space<vmem>>, vector<1x8x1xf32>
    %24 = vector.shape_cast %23 : vector<1x8x1xf32> to vector<8x1xf32>
    %25 = vector.broadcast %24 : vector<8x1xf32> to vector<8x128xf32>
    %26 = arith.mulf %22, %25 : vector<8x128xf32>
    %c8_i32 = arith.constant 8 : i32
    %27 = tpu.dynamic_rotate %14 by %c8_i32 dim 1 : vector<8x128xf32>, i32 -> vector<8x128xf32>
    %c1 = arith.constant 1 : index
    %c0_20 = arith.constant 0 : index
    %c0_21 = arith.constant 0 : index
    %28 = vector.load %arg6[%c1, %c0_20, %c0_21] : memref<9x1x128xf32, #tpu.memory_space<vmem>>, vector<1x1x128xf32>
    %29 = vector.shape_cast %28 : vector<1x1x128xf32> to vector<1x128xf32>
    %30 = vector.broadcast %29 : vector<1x128xf32> to vector<8x128xf32>
    %31 = arith.mulf %27, %30 : vector<8x128xf32>
    %c1_22 = arith.constant 1 : index
    %c0_23 = arith.constant 0 : index
    %c0_24 = arith.constant 0 : index
    %32 = vector.load %arg7[%c1_22, %c0_23, %c0_24] : memref<9x8x1xf32, #tpu.memory_space<vmem>>, vector<1x8x1xf32>
    %33 = vector.shape_cast %32 : vector<1x8x1xf32> to vector<8x1xf32>
    %34 = vector.broadcast %33 : vector<8x1xf32> to vector<8x128xf32>
    %35 = arith.mulf %31, %34 : vector<8x128xf32>
    %c7_i32 = arith.constant 7 : i32
    %36 = tpu.dynamic_rotate %14 by %c7_i32 dim 1 : vector<8x128xf32>, i32 -> vector<8x128xf32>
    %c2 = arith.constant 2 : index
    %c0_25 = arith.constant 0 : index
    %c0_26 = arith.constant 0 : index
    %37 = vector.load %arg6[%c2, %c0_25, %c0_26] : memref<9x1x128xf32, #tpu.memory_space<vmem>>, vector<1x1x128xf32>
    %38 = vector.shape_cast %37 : vector<1x1x128xf32> to vector<1x128xf32>
    %39 = vector.broadcast %38 : vector<1x128xf32> to vector<8x128xf32>
    %40 = arith.mulf %36, %39 : vector<8x128xf32>
    %c2_27 = arith.constant 2 : index
    %c0_28 = arith.constant 0 : index
    %c0_29 = arith.constant 0 : index
    %41 = vector.load %arg7[%c2_27, %c0_28, %c0_29] : memref<9x8x1xf32, #tpu.memory_space<vmem>>, vector<1x8x1xf32>
    %42 = vector.shape_cast %41 : vector<1x8x1xf32> to vector<8x1xf32>
    %43 = vector.broadcast %42 : vector<8x1xf32> to vector<8x128xf32>
    %44 = arith.mulf %40, %43 : vector<8x128xf32>
    %c1_i32 = arith.constant 1 : i32
    %45 = tpu.dynamic_rotate %14 by %c1_i32 dim 1 : vector<8x128xf32>, i32 -> vector<8x128xf32>
    %c3 = arith.constant 3 : index
    %c0_30 = arith.constant 0 : index
    %c0_31 = arith.constant 0 : index
    %46 = vector.load %arg6[%c3, %c0_30, %c0_31] : memref<9x1x128xf32, #tpu.memory_space<vmem>>, vector<1x1x128xf32>
    %47 = vector.shape_cast %46 : vector<1x1x128xf32> to vector<1x128xf32>
    %48 = vector.broadcast %47 : vector<1x128xf32> to vector<8x128xf32>
    %49 = arith.mulf %45, %48 : vector<8x128xf32>
    %c3_32 = arith.constant 3 : index
    %c0_33 = arith.constant 0 : index
    %c0_34 = arith.constant 0 : index
    %50 = vector.load %arg7[%c3_32, %c0_33, %c0_34] : memref<9x8x1xf32, #tpu.memory_space<vmem>>, vector<1x8x1xf32>
    %51 = vector.shape_cast %50 : vector<1x8x1xf32> to vector<8x1xf32>
    %52 = vector.broadcast %51 : vector<8x1xf32> to vector<8x128xf32>
    %53 = arith.mulf %49, %52 : vector<8x128xf32>
    %54 = arith.addf %26, %53 : vector<8x128xf32>
    %c4 = arith.constant 4 : index
    %c0_35 = arith.constant 0 : index
    %c0_36 = arith.constant 0 : index
    %55 = vector.load %arg7[%c4, %c0_35, %c0_36] : memref<9x8x1xf32, #tpu.memory_space<vmem>>, vector<1x8x1xf32>
    %56 = vector.shape_cast %55 : vector<1x8x1xf32> to vector<8x1xf32>
    %57 = vector.broadcast %56 : vector<8x1xf32> to vector<8x128xf32>
    %58 = arith.mulf %14, %57 : vector<8x128xf32>
    %59 = arith.addf %35, %58 : vector<8x128xf32>
    %c127_i32 = arith.constant 127 : i32
    %60 = tpu.dynamic_rotate %14 by %c127_i32 dim 1 : vector<8x128xf32>, i32 -> vector<8x128xf32>
    %c5 = arith.constant 5 : index
    %c0_37 = arith.constant 0 : index
    %c0_38 = arith.constant 0 : index
    %61 = vector.load %arg6[%c5, %c0_37, %c0_38] : memref<9x1x128xf32, #tpu.memory_space<vmem>>, vector<1x1x128xf32>
    %62 = vector.shape_cast %61 : vector<1x1x128xf32> to vector<1x128xf32>
    %63 = vector.broadcast %62 : vector<1x128xf32> to vector<8x128xf32>
    %64 = arith.mulf %60, %63 : vector<8x128xf32>
    %c5_39 = arith.constant 5 : index
    %c0_40 = arith.constant 0 : index
    %c0_41 = arith.constant 0 : index
    %65 = vector.load %arg7[%c5_39, %c0_40, %c0_41] : memref<9x8x1xf32, #tpu.memory_space<vmem>>, vector<1x8x1xf32>
    %66 = vector.shape_cast %65 : vector<1x8x1xf32> to vector<8x1xf32>
    %67 = vector.broadcast %66 : vector<8x1xf32> to vector<8x128xf32>
    %68 = arith.mulf %64, %67 : vector<8x128xf32>
    %69 = arith.addf %44, %68 : vector<8x128xf32>
    %c121_i32 = arith.constant 121 : i32
    %70 = tpu.dynamic_rotate %14 by %c121_i32 dim 1 : vector<8x128xf32>, i32 -> vector<8x128xf32>
    %c6 = arith.constant 6 : index
    %c0_42 = arith.constant 0 : index
    %c0_43 = arith.constant 0 : index
    %71 = vector.load %arg6[%c6, %c0_42, %c0_43] : memref<9x1x128xf32, #tpu.memory_space<vmem>>, vector<1x1x128xf32>
    %72 = vector.shape_cast %71 : vector<1x1x128xf32> to vector<1x128xf32>
    %73 = vector.broadcast %72 : vector<1x128xf32> to vector<8x128xf32>
    %74 = arith.mulf %70, %73 : vector<8x128xf32>
    %c6_44 = arith.constant 6 : index
    %c0_45 = arith.constant 0 : index
    %c0_46 = arith.constant 0 : index
    %75 = vector.load %arg7[%c6_44, %c0_45, %c0_46] : memref<9x8x1xf32, #tpu.memory_space<vmem>>, vector<1x8x1xf32>
    %76 = vector.shape_cast %75 : vector<1x8x1xf32> to vector<8x1xf32>
    %77 = vector.broadcast %76 : vector<8x1xf32> to vector<8x128xf32>
    %78 = arith.mulf %74, %77 : vector<8x128xf32>
    %79 = arith.addf %54, %78 : vector<8x128xf32>
    %c120_i32 = arith.constant 120 : i32
    %80 = tpu.dynamic_rotate %14 by %c120_i32 dim 1 : vector<8x128xf32>, i32 -> vector<8x128xf32>
    %c7 = arith.constant 7 : index
    %c0_47 = arith.constant 0 : index
    %c0_48 = arith.constant 0 : index
    %81 = vector.load %arg6[%c7, %c0_47, %c0_48] : memref<9x1x128xf32, #tpu.memory_space<vmem>>, vector<1x1x128xf32>
    %82 = vector.shape_cast %81 : vector<1x1x128xf32> to vector<1x128xf32>
    %83 = vector.broadcast %82 : vector<1x128xf32> to vector<8x128xf32>
    %84 = arith.mulf %80, %83 : vector<8x128xf32>
    %c7_49 = arith.constant 7 : index
    %c0_50 = arith.constant 0 : index
    %c0_51 = arith.constant 0 : index
    %85 = vector.load %arg7[%c7_49, %c0_50, %c0_51] : memref<9x8x1xf32, #tpu.memory_space<vmem>>, vector<1x8x1xf32>
    %86 = vector.shape_cast %85 : vector<1x8x1xf32> to vector<8x1xf32>
    %87 = vector.broadcast %86 : vector<8x1xf32> to vector<8x128xf32>
    %88 = arith.mulf %84, %87 : vector<8x128xf32>
    %89 = arith.addf %59, %88 : vector<8x128xf32>
    %c119_i32 = arith.constant 119 : i32
    %90 = tpu.dynamic_rotate %14 by %c119_i32 dim 1 : vector<8x128xf32>, i32 -> vector<8x128xf32>
    %c8 = arith.constant 8 : index
    %c0_52 = arith.constant 0 : index
    %c0_53 = arith.constant 0 : index
    %91 = vector.load %arg6[%c8, %c0_52, %c0_53] : memref<9x1x128xf32, #tpu.memory_space<vmem>>, vector<1x1x128xf32>
    %92 = vector.shape_cast %91 : vector<1x1x128xf32> to vector<1x128xf32>
    %93 = vector.broadcast %92 : vector<1x128xf32> to vector<8x128xf32>
    %94 = arith.mulf %90, %93 : vector<8x128xf32>
    %c8_54 = arith.constant 8 : index
    %c0_55 = arith.constant 0 : index
    %c0_56 = arith.constant 0 : index
    %95 = vector.load %arg7[%c8_54, %c0_55, %c0_56] : memref<9x8x1xf32, #tpu.memory_space<vmem>>, vector<1x8x1xf32>
    %96 = vector.shape_cast %95 : vector<1x8x1xf32> to vector<8x1xf32>
    %97 = vector.broadcast %96 : vector<8x1xf32> to vector<8x128xf32>
    %98 = arith.mulf %94, %97 : vector<8x128xf32>
    %99 = arith.addf %69, %98 : vector<8x128xf32>
    %100 = arith.addf %79, %89 : vector<8x128xf32>
    %101 = arith.addf %100, %99 : vector<8x128xf32>
    %102 = vector.broadcast %17 : vector<8x1xf32> to vector<8x128xf32>
    %103 = arith.addf %101, %102 : vector<8x128xf32>
    %cst_57 = arith.constant 5.000000e-01 : f32
    %104 = vector.broadcast %cst_57 : f32 to vector<8x128xf32>
    %105 = arith.mulf %104, %103 : vector<8x128xf32>
    %106 = math.tanh %105 : vector<8x128xf32>
    %cst_58 = arith.constant 1.000000e+00 : f32
    %107 = vector.broadcast %cst_58 : f32 to vector<8x128xf32>
    %108 = arith.addf %106, %107 : vector<8x128xf32>
    %cst_59 = arith.constant 5.000000e-01 : f32
    %109 = vector.broadcast %cst_59 : f32 to vector<8x128xf32>
    %110 = arith.mulf %109, %108 : vector<8x128xf32>
    %111 = arith.mulf %103, %110 : vector<8x128xf32>
    %c0_60 = arith.constant 0 : index
    %c0_61 = arith.constant 0 : index
    %112 = vector.load %arg9[%c0_60, %c0_61] : memref<2x8xbf16, #tpu.memory_space<vmem>>, vector<2x8xbf16>
    %c0_62 = arith.constant 0 : index
    %c0_63 = arith.constant 0 : index
    %113 = vector.load %arg10[%c0_62, %c0_63] : memref<2x1xf32, #tpu.memory_space<vmem>>, vector<2x1xf32>
    %c0_64 = arith.constant 0 : index
    %c0_65 = arith.constant 0 : index
    %114 = vector.load %arg11[%c0_64, %c0_65] : memref<8x2xbf16, #tpu.memory_space<vmem>>, vector<8x2xbf16>
    %c0_66 = arith.constant 0 : index
    %c0_67 = arith.constant 0 : index
    %115 = vector.load %arg12[%c0_66, %c0_67] : memref<8x1xf32, #tpu.memory_space<vmem>>, vector<8x1xf32>
    %116 = arith.truncf %111 : vector<8x128xf32> to vector<8x128xbf16>
    %cst_68 = arith.constant dense<0.000000e+00> : vector<8x2xf32>
    %117 = tpu.matmul %116, %15, %cst_68 {dimension_numbers = #tpu.dot_dimension_numbers<[1], [0], [0], [1], [0, 0, 1, 1], [], []>} : vector<8x128xbf16>, vector<128x2xbf16>, vector<8x2xf32> -> vector<8x2xf32>
    %118 = arith.truncf %117 : vector<8x2xf32> to vector<8x2xbf16>
    %cst_69 = arith.constant dense<0.000000e+00> : vector<2x2xf32>
    %119 = tpu.matmul %112, %118, %cst_69 {dimension_numbers = #tpu.dot_dimension_numbers<[1], [0], [0], [1], [0, 0, 1, 1], [], []>} : vector<2x8xbf16>, vector<8x2xbf16>, vector<2x2xf32> -> vector<2x2xf32>
    %120 = vector.broadcast %113 : vector<2x1xf32> to vector<2x2xf32>
    %121 = arith.addf %119, %120 : vector<2x2xf32>
    %cst_70 = arith.constant 5.000000e-01 : f32
    %122 = vector.broadcast %cst_70 : f32 to vector<2x2xf32>
    %123 = arith.mulf %122, %121 : vector<2x2xf32>
    %124 = math.tanh %123 : vector<2x2xf32>
    %cst_71 = arith.constant 1.000000e+00 : f32
    %125 = vector.broadcast %cst_71 : f32 to vector<2x2xf32>
    %126 = arith.addf %124, %125 : vector<2x2xf32>
    %cst_72 = arith.constant 5.000000e-01 : f32
    %127 = vector.broadcast %cst_72 : f32 to vector<2x2xf32>
    %128 = arith.mulf %127, %126 : vector<2x2xf32>
    %129 = arith.mulf %121, %128 : vector<2x2xf32>
    %130 = arith.truncf %129 : vector<2x2xf32> to vector<2x2xbf16>
    %cst_73 = arith.constant dense<0.000000e+00> : vector<8x2xf32>
    %131 = tpu.matmul %114, %130, %cst_73 {dimension_numbers = #tpu.dot_dimension_numbers<[1], [0], [0], [1], [0, 0, 1, 1], [], []>} : vector<8x2xbf16>, vector<2x2xbf16>, vector<8x2xf32> -> vector<8x2xf32>
    %132 = vector.broadcast %115 : vector<8x1xf32> to vector<8x2xf32>
    %133 = arith.addf %131, %132 : vector<8x2xf32>
    %cst_74 = arith.constant 5.000000e-01 : f32
    %134 = vector.broadcast %cst_74 : f32 to vector<8x2xf32>
    %135 = arith.mulf %134, %133 : vector<8x2xf32>
    %136 = math.tanh %135 : vector<8x2xf32>
    %cst_75 = arith.constant 1.000000e+00 : f32
    %137 = vector.broadcast %cst_75 : f32 to vector<8x2xf32>
    %138 = arith.addf %136, %137 : vector<8x2xf32>
    %cst_76 = arith.constant 5.000000e-01 : f32
    %139 = vector.broadcast %cst_76 : f32 to vector<8x2xf32>
    %140 = arith.mulf %139, %138 : vector<8x2xf32>
    %141 = arith.truncf %140 : vector<8x2xf32> to vector<8x2xbf16>
    %cst_77 = arith.constant dense<0.000000e+00> : vector<8x128xf32>
    %142 = tpu.matmul %141, %16, %cst_77 {dimension_numbers = #tpu.dot_dimension_numbers<[1], [0], [0], [1], [0, 0, 1, 1], [], []>} : vector<8x2xbf16>, vector<2x128xbf16>, vector<8x128xf32> -> vector<8x128xf32>
    %143 = arith.mulf %111, %142 : vector<8x128xf32>
    %c0_78 = arith.constant 0 : index
    %c0_79 = arith.constant 0 : index
    %144 = vector.load %arg13[%c0_78, %c0_79] : memref<8x8xbf16, #tpu.memory_space<vmem>>, vector<8x8xbf16>
    %c0_80 = arith.constant 0 : index
    %c0_81 = arith.constant 0 : index
    %145 = vector.load %arg14[%c0_80, %c0_81] : memref<8x1xf32, #tpu.memory_space<vmem>>, vector<8x1xf32>
    %146 = arith.truncf %143 : vector<8x128xf32> to vector<8x128xbf16>
    %cst_82 = arith.constant dense<0.000000e+00> : vector<8x128xf32>
    %147 = tpu.matmul %144, %146, %cst_82 {dimension_numbers = #tpu.dot_dimension_numbers<[1], [0], [0], [1], [0, 0, 1, 1], [], []>} : vector<8x8xbf16>, vector<8x128xbf16>, vector<8x128xf32> -> vector<8x128xf32>
    %148 = vector.broadcast %145 : vector<8x1xf32> to vector<8x128xf32>
    %149 = arith.addf %147, %148 : vector<8x128xf32>
    %150 = arith.addf %149, %14 : vector<8x128xf32>
    %c0_83 = arith.constant 0 : index
    %c0_84 = arith.constant 0 : index
    %151 = vector.load %arg15[%c0_83, %c0_84] : memref<48x8xbf16, #tpu.memory_space<vmem>>, vector<48x8xbf16>
    %c0_85 = arith.constant 0 : index
    %c0_86 = arith.constant 0 : index
    %152 = vector.load %arg16[%c0_85, %c0_86] : memref<48x1xf32, #tpu.memory_space<vmem>>, vector<48x1xf32>
    %153 = arith.truncf %150 : vector<8x128xf32> to vector<8x128xbf16>
    %cst_87 = arith.constant dense<0.000000e+00> : vector<48x128xf32>
    %154 = tpu.matmul %151, %153, %cst_87 {dimension_numbers = #tpu.dot_dimension_numbers<[1], [0], [0], [1], [0, 0, 1, 1], [], []>} : vector<48x8xbf16>, vector<8x128xbf16>, vector<48x128xf32> -> vector<48x128xf32>
    %155 = vector.broadcast %152 : vector<48x1xf32> to vector<48x128xf32>
    %156 = arith.addf %154, %155 : vector<48x128xf32>
    %cst_88 = arith.constant 5.000000e-01 : f32
    %157 = vector.broadcast %cst_88 : f32 to vector<48x128xf32>
    %158 = arith.mulf %157, %156 : vector<48x128xf32>
    %159 = math.tanh %158 : vector<48x128xf32>
    %cst_89 = arith.constant 1.000000e+00 : f32
    %160 = vector.broadcast %cst_89 : f32 to vector<48x128xf32>
    %161 = arith.addf %159, %160 : vector<48x128xf32>
    %cst_90 = arith.constant 5.000000e-01 : f32
    %162 = vector.broadcast %cst_90 : f32 to vector<48x128xf32>
    %163 = arith.mulf %162, %161 : vector<48x128xf32>
    %164 = arith.mulf %156, %163 : vector<48x128xf32>
    %c0_91 = arith.constant 0 : index
    %c0_92 = arith.constant 0 : index
    %165 = vector.load %arg18[%c0_91, %c0_92] : memref<48x1xf32, #tpu.memory_space<vmem>>, vector<48x1xf32>
    %c9_i32_93 = arith.constant 9 : i32
    %166 = tpu.dynamic_rotate %164 by %c9_i32_93 dim 1 : vector<48x128xf32>, i32 -> vector<48x128xf32>
    %c0_94 = arith.constant 0 : index
    %c0_95 = arith.constant 0 : index
    %c0_96 = arith.constant 0 : index
    %167 = vector.load %arg6[%c0_94, %c0_95, %c0_96] : memref<9x1x128xf32, #tpu.memory_space<vmem>>, vector<1x1x128xf32>
    %168 = vector.shape_cast %167 : vector<1x1x128xf32> to vector<1x128xf32>
    %169 = vector.broadcast %168 : vector<1x128xf32> to vector<48x128xf32>
    %170 = arith.mulf %166, %169 : vector<48x128xf32>
    %c0_97 = arith.constant 0 : index
    %c0_98 = arith.constant 0 : index
    %c0_99 = arith.constant 0 : index
    %171 = vector.load %arg17[%c0_97, %c0_98, %c0_99] : memref<9x48x1xf32, #tpu.memory_space<vmem>>, vector<1x48x1xf32>
    %172 = vector.shape_cast %171 : vector<1x48x1xf32> to vector<48x1xf32>
    %173 = vector.broadcast %172 : vector<48x1xf32> to vector<48x128xf32>
    %174 = arith.mulf %170, %173 : vector<48x128xf32>
    %c8_i32_100 = arith.constant 8 : i32
    %175 = tpu.dynamic_rotate %164 by %c8_i32_100 dim 1 : vector<48x128xf32>, i32 -> vector<48x128xf32>
    %c1_101 = arith.constant 1 : index
    %c0_102 = arith.constant 0 : index
    %c0_103 = arith.constant 0 : index
    %176 = vector.load %arg6[%c1_101, %c0_102, %c0_103] : memref<9x1x128xf32, #tpu.memory_space<vmem>>, vector<1x1x128xf32>
    %177 = vector.shape_cast %176 : vector<1x1x128xf32> to vector<1x128xf32>
    %178 = vector.broadcast %177 : vector<1x128xf32> to vector<48x128xf32>
    %179 = arith.mulf %175, %178 : vector<48x128xf32>
    %c1_104 = arith.constant 1 : index
    %c0_105 = arith.constant 0 : index
    %c0_106 = arith.constant 0 : index
    %180 = vector.load %arg17[%c1_104, %c0_105, %c0_106] : memref<9x48x1xf32, #tpu.memory_space<vmem>>, vector<1x48x1xf32>
    %181 = vector.shape_cast %180 : vector<1x48x1xf32> to vector<48x1xf32>
    %182 = vector.broadcast %181 : vector<48x1xf32> to vector<48x128xf32>
    %183 = arith.mulf %179, %182 : vector<48x128xf32>
    %c7_i32_107 = arith.constant 7 : i32
    %184 = tpu.dynamic_rotate %164 by %c7_i32_107 dim 1 : vector<48x128xf32>, i32 -> vector<48x128xf32>
    %c2_108 = arith.constant 2 : index
    %c0_109 = arith.constant 0 : index
    %c0_110 = arith.constant 0 : index
    %185 = vector.load %arg6[%c2_108, %c0_109, %c0_110] : memref<9x1x128xf32, #tpu.memory_space<vmem>>, vector<1x1x128xf32>
    %186 = vector.shape_cast %185 : vector<1x1x128xf32> to vector<1x128xf32>
    %187 = vector.broadcast %186 : vector<1x128xf32> to vector<48x128xf32>
    %188 = arith.mulf %184, %187 : vector<48x128xf32>
    %c2_111 = arith.constant 2 : index
    %c0_112 = arith.constant 0 : index
    %c0_113 = arith.constant 0 : index
    %189 = vector.load %arg17[%c2_111, %c0_112, %c0_113] : memref<9x48x1xf32, #tpu.memory_space<vmem>>, vector<1x48x1xf32>
    %190 = vector.shape_cast %189 : vector<1x48x1xf32> to vector<48x1xf32>
    %191 = vector.broadcast %190 : vector<48x1xf32> to vector<48x128xf32>
    %192 = arith.mulf %188, %191 : vector<48x128xf32>
    %c1_i32_114 = arith.constant 1 : i32
    %193 = tpu.dynamic_rotate %164 by %c1_i32_114 dim 1 : vector<48x128xf32>, i32 -> vector<48x128xf32>
    %c3_115 = arith.constant 3 : index
    %c0_116 = arith.constant 0 : index
    %c0_117 = arith.constant 0 : index
    %194 = vector.load %arg6[%c3_115, %c0_116, %c0_117] : memref<9x1x128xf32, #tpu.memory_space<vmem>>, vector<1x1x128xf32>
    %195 = vector.shape_cast %194 : vector<1x1x128xf32> to vector<1x128xf32>
    %196 = vector.broadcast %195 : vector<1x128xf32> to vector<48x128xf32>
    %197 = arith.mulf %193, %196 : vector<48x128xf32>
    %c3_118 = arith.constant 3 : index
    %c0_119 = arith.constant 0 : index
    %c0_120 = arith.constant 0 : index
    %198 = vector.load %arg17[%c3_118, %c0_119, %c0_120] : memref<9x48x1xf32, #tpu.memory_space<vmem>>, vector<1x48x1xf32>
    %199 = vector.shape_cast %198 : vector<1x48x1xf32> to vector<48x1xf32>
    %200 = vector.broadcast %199 : vector<48x1xf32> to vector<48x128xf32>
    %201 = arith.mulf %197, %200 : vector<48x128xf32>
    %202 = arith.addf %174, %201 : vector<48x128xf32>
    %c4_121 = arith.constant 4 : index
    %c0_122 = arith.constant 0 : index
    %c0_123 = arith.constant 0 : index
    %203 = vector.load %arg17[%c4_121, %c0_122, %c0_123] : memref<9x48x1xf32, #tpu.memory_space<vmem>>, vector<1x48x1xf32>
    %204 = vector.shape_cast %203 : vector<1x48x1xf32> to vector<48x1xf32>
    %205 = vector.broadcast %204 : vector<48x1xf32> to vector<48x128xf32>
    %206 = arith.mulf %164, %205 : vector<48x128xf32>
    %207 = arith.addf %183, %206 : vector<48x128xf32>
    %c127_i32_124 = arith.constant 127 : i32
    %208 = tpu.dynamic_rotate %164 by %c127_i32_124 dim 1 : vector<48x128xf32>, i32 -> vector<48x128xf32>
    %c5_125 = arith.constant 5 : index
    %c0_126 = arith.constant 0 : index
    %c0_127 = arith.constant 0 : index
    %209 = vector.load %arg6[%c5_125, %c0_126, %c0_127] : memref<9x1x128xf32, #tpu.memory_space<vmem>>, vector<1x1x128xf32>
    %210 = vector.shape_cast %209 : vector<1x1x128xf32> to vector<1x128xf32>
    %211 = vector.broadcast %210 : vector<1x128xf32> to vector<48x128xf32>
    %212 = arith.mulf %208, %211 : vector<48x128xf32>
    %c5_128 = arith.constant 5 : index
    %c0_129 = arith.constant 0 : index
    %c0_130 = arith.constant 0 : index
    %213 = vector.load %arg17[%c5_128, %c0_129, %c0_130] : memref<9x48x1xf32, #tpu.memory_space<vmem>>, vector<1x48x1xf32>
    %214 = vector.shape_cast %213 : vector<1x48x1xf32> to vector<48x1xf32>
    %215 = vector.broadcast %214 : vector<48x1xf32> to vector<48x128xf32>
    %216 = arith.mulf %212, %215 : vector<48x128xf32>
    %217 = arith.addf %192, %216 : vector<48x128xf32>
    %c121_i32_131 = arith.constant 121 : i32
    %218 = tpu.dynamic_rotate %164 by %c121_i32_131 dim 1 : vector<48x128xf32>, i32 -> vector<48x128xf32>
    %c6_132 = arith.constant 6 : index
    %c0_133 = arith.constant 0 : index
    %c0_134 = arith.constant 0 : index
    %219 = vector.load %arg6[%c6_132, %c0_133, %c0_134] : memref<9x1x128xf32, #tpu.memory_space<vmem>>, vector<1x1x128xf32>
    %220 = vector.shape_cast %219 : vector<1x1x128xf32> to vector<1x128xf32>
    %221 = vector.broadcast %220 : vector<1x128xf32> to vector<48x128xf32>
    %222 = arith.mulf %218, %221 : vector<48x128xf32>
    %c6_135 = arith.constant 6 : index
    %c0_136 = arith.constant 0 : index
    %c0_137 = arith.constant 0 : index
    %223 = vector.load %arg17[%c6_135, %c0_136, %c0_137] : memref<9x48x1xf32, #tpu.memory_space<vmem>>, vector<1x48x1xf32>
    %224 = vector.shape_cast %223 : vector<1x48x1xf32> to vector<48x1xf32>
    %225 = vector.broadcast %224 : vector<48x1xf32> to vector<48x128xf32>
    %226 = arith.mulf %222, %225 : vector<48x128xf32>
    %227 = arith.addf %202, %226 : vector<48x128xf32>
    %c120_i32_138 = arith.constant 120 : i32
    %228 = tpu.dynamic_rotate %164 by %c120_i32_138 dim 1 : vector<48x128xf32>, i32 -> vector<48x128xf32>
    %c7_139 = arith.constant 7 : index
    %c0_140 = arith.constant 0 : index
    %c0_141 = arith.constant 0 : index
    %229 = vector.load %arg6[%c7_139, %c0_140, %c0_141] : memref<9x1x128xf32, #tpu.memory_space<vmem>>, vector<1x1x128xf32>
    %230 = vector.shape_cast %229 : vector<1x1x128xf32> to vector<1x128xf32>
    %231 = vector.broadcast %230 : vector<1x128xf32> to vector<48x128xf32>
    %232 = arith.mulf %228, %231 : vector<48x128xf32>
    %c7_142 = arith.constant 7 : index
    %c0_143 = arith.constant 0 : index
    %c0_144 = arith.constant 0 : index
    %233 = vector.load %arg17[%c7_142, %c0_143, %c0_144] : memref<9x48x1xf32, #tpu.memory_space<vmem>>, vector<1x48x1xf32>
    %234 = vector.shape_cast %233 : vector<1x48x1xf32> to vector<48x1xf32>
    %235 = vector.broadcast %234 : vector<48x1xf32> to vector<48x128xf32>
    %236 = arith.mulf %232, %235 : vector<48x128xf32>
    %237 = arith.addf %207, %236 : vector<48x128xf32>
    %c119_i32_145 = arith.constant 119 : i32
    %238 = tpu.dynamic_rotate %164 by %c119_i32_145 dim 1 : vector<48x128xf32>, i32 -> vector<48x128xf32>
    %c8_146 = arith.constant 8 : index
    %c0_147 = arith.constant 0 : index
    %c0_148 = arith.constant 0 : index
    %239 = vector.load %arg6[%c8_146, %c0_147, %c0_148] : memref<9x1x128xf32, #tpu.memory_space<vmem>>, vector<1x1x128xf32>
    %240 = vector.shape_cast %239 : vector<1x1x128xf32> to vector<1x128xf32>
    %241 = vector.broadcast %240 : vector<1x128xf32> to vector<48x128xf32>
    %242 = arith.mulf %238, %241 : vector<48x128xf32>
    %c8_149 = arith.constant 8 : index
    %c0_150 = arith.constant 0 : index
    %c0_151 = arith.constant 0 : index
    %243 = vector.load %arg17[%c8_149, %c0_150, %c0_151] : memref<9x48x1xf32, #tpu.memory_space<vmem>>, vector<1x48x1xf32>
    %244 = vector.shape_cast %243 : vector<1x48x1xf32> to vector<48x1xf32>
    %245 = vector.broadcast %244 : vector<48x1xf32> to vector<48x128xf32>
    %246 = arith.mulf %242, %245 : vector<48x128xf32>
    %247 = arith.addf %217, %246 : vector<48x128xf32>
    %248 = arith.addf %227, %237 : vector<48x128xf32>
    %249 = arith.addf %248, %247 : vector<48x128xf32>
    %250 = vector.broadcast %165 : vector<48x1xf32> to vector<48x128xf32>
    %251 = arith.addf %249, %250 : vector<48x128xf32>
    %cst_152 = arith.constant 5.000000e-01 : f32
    %252 = vector.broadcast %cst_152 : f32 to vector<48x128xf32>
    %253 = arith.mulf %252, %251 : vector<48x128xf32>
    %254 = math.tanh %253 : vector<48x128xf32>
    %cst_153 = arith.constant 1.000000e+00 : f32
    %255 = vector.broadcast %cst_153 : f32 to vector<48x128xf32>
    %256 = arith.addf %254, %255 : vector<48x128xf32>
    %cst_154 = arith.constant 5.000000e-01 : f32
    %257 = vector.broadcast %cst_154 : f32 to vector<48x128xf32>
    %258 = arith.mulf %257, %256 : vector<48x128xf32>
    %259 = arith.mulf %251, %258 : vector<48x128xf32>
    %c0_155 = arith.constant 0 : index
    %c0_156 = arith.constant 0 : index
    %260 = vector.load %arg19[%c0_155, %c0_156] : memref<2x48xbf16, #tpu.memory_space<vmem>>, vector<2x48xbf16>
    %c0_157 = arith.constant 0 : index
    %c0_158 = arith.constant 0 : index
    %261 = vector.load %arg20[%c0_157, %c0_158] : memref<2x1xf32, #tpu.memory_space<vmem>>, vector<2x1xf32>
    %c0_159 = arith.constant 0 : index
    %c0_160 = arith.constant 0 : index
    %262 = vector.load %arg21[%c0_159, %c0_160] : memref<48x2xbf16, #tpu.memory_space<vmem>>, vector<48x2xbf16>
    %c0_161 = arith.constant 0 : index
    %c0_162 = arith.constant 0 : index
    %263 = vector.load %arg22[%c0_161, %c0_162] : memref<48x1xf32, #tpu.memory_space<vmem>>, vector<48x1xf32>
    %264 = arith.truncf %259 : vector<48x128xf32> to vector<48x128xbf16>
    %cst_163 = arith.constant dense<0.000000e+00> : vector<48x2xf32>
    %265 = tpu.matmul %264, %15, %cst_163 {dimension_numbers = #tpu.dot_dimension_numbers<[1], [0], [0], [1], [0, 0, 1, 1], [], []>} : vector<48x128xbf16>, vector<128x2xbf16>, vector<48x2xf32> -> vector<48x2xf32>
    %266 = arith.truncf %265 : vector<48x2xf32> to vector<48x2xbf16>
    %cst_164 = arith.constant dense<0.000000e+00> : vector<2x2xf32>
    %267 = tpu.matmul %260, %266, %cst_164 {dimension_numbers = #tpu.dot_dimension_numbers<[1], [0], [0], [1], [0, 0, 1, 1], [], []>} : vector<2x48xbf16>, vector<48x2xbf16>, vector<2x2xf32> -> vector<2x2xf32>
    %268 = vector.broadcast %261 : vector<2x1xf32> to vector<2x2xf32>
    %269 = arith.addf %267, %268 : vector<2x2xf32>
    %cst_165 = arith.constant 5.000000e-01 : f32
    %270 = vector.broadcast %cst_165 : f32 to vector<2x2xf32>
    %271 = arith.mulf %270, %269 : vector<2x2xf32>
    %272 = math.tanh %271 : vector<2x2xf32>
    %cst_166 = arith.constant 1.000000e+00 : f32
    %273 = vector.broadcast %cst_166 : f32 to vector<2x2xf32>
    %274 = arith.addf %272, %273 : vector<2x2xf32>
    %cst_167 = arith.constant 5.000000e-01 : f32
    %275 = vector.broadcast %cst_167 : f32 to vector<2x2xf32>
    %276 = arith.mulf %275, %274 : vector<2x2xf32>
    %277 = arith.mulf %269, %276 : vector<2x2xf32>
    %278 = arith.truncf %277 : vector<2x2xf32> to vector<2x2xbf16>
    %cst_168 = arith.constant dense<0.000000e+00> : vector<48x2xf32>
    %279 = tpu.matmul %262, %278, %cst_168 {dimension_numbers = #tpu.dot_dimension_numbers<[1], [0], [0], [1], [0, 0, 1, 1], [], []>} : vector<48x2xbf16>, vector<2x2xbf16>, vector<48x2xf32> -> vector<48x2xf32>
    %280 = vector.broadcast %263 : vector<48x1xf32> to vector<48x2xf32>
    %281 = arith.addf %279, %280 : vector<48x2xf32>
    %cst_169 = arith.constant 5.000000e-01 : f32
    %282 = vector.broadcast %cst_169 : f32 to vector<48x2xf32>
    %283 = arith.mulf %282, %281 : vector<48x2xf32>
    %284 = math.tanh %283 : vector<48x2xf32>
    %cst_170 = arith.constant 1.000000e+00 : f32
    %285 = vector.broadcast %cst_170 : f32 to vector<48x2xf32>
    %286 = arith.addf %284, %285 : vector<48x2xf32>
    %cst_171 = arith.constant 5.000000e-01 : f32
    %287 = vector.broadcast %cst_171 : f32 to vector<48x2xf32>
    %288 = arith.mulf %287, %286 : vector<48x2xf32>
    %289 = arith.truncf %288 : vector<48x2xf32> to vector<48x2xbf16>
    %cst_172 = arith.constant dense<0.000000e+00> : vector<48x128xf32>
    %290 = tpu.matmul %289, %16, %cst_172 {dimension_numbers = #tpu.dot_dimension_numbers<[1], [0], [0], [1], [0, 0, 1, 1], [], []>} : vector<48x2xbf16>, vector<2x128xbf16>, vector<48x128xf32> -> vector<48x128xf32>
    %291 = arith.mulf %259, %290 : vector<48x128xf32>
    %c0_173 = arith.constant 0 : index
    %c0_174 = arith.constant 0 : index
    %292 = vector.load %arg23[%c0_173, %c0_174] : memref<8x48xbf16, #tpu.memory_space<vmem>>, vector<8x48xbf16>
    %c0_175 = arith.constant 0 : index
    %c0_176 = arith.constant 0 : index
    %293 = vector.load %arg24[%c0_175, %c0_176] : memref<8x1xf32, #tpu.memory_space<vmem>>, vector<8x1xf32>
    %294 = arith.truncf %291 : vector<48x128xf32> to vector<48x128xbf16>
    %cst_177 = arith.constant dense<0.000000e+00> : vector<8x128xf32>
    %295 = tpu.matmul %292, %294, %cst_177 {dimension_numbers = #tpu.dot_dimension_numbers<[1], [0], [0], [1], [0, 0, 1, 1], [], []>} : vector<8x48xbf16>, vector<48x128xbf16>, vector<8x128xf32> -> vector<8x128xf32>
    %296 = vector.broadcast %293 : vector<8x1xf32> to vector<8x128xf32>
    %297 = arith.addf %295, %296 : vector<8x128xf32>
    %298 = arith.addf %297, %150 : vector<8x128xf32>
    %c0_178 = arith.constant 0 : index
    %c0_179 = arith.constant 0 : index
    %299 = vector.load %arg25[%c0_178, %c0_179] : memref<48x8xbf16, #tpu.memory_space<vmem>>, vector<48x8xbf16>
    %c0_180 = arith.constant 0 : index
    %c0_181 = arith.constant 0 : index
    %300 = vector.load %arg26[%c0_180, %c0_181] : memref<48x1xf32, #tpu.memory_space<vmem>>, vector<48x1xf32>
    %301 = arith.truncf %298 : vector<8x128xf32> to vector<8x128xbf16>
    %cst_182 = arith.constant dense<0.000000e+00> : vector<48x128xf32>
    %302 = tpu.matmul %299, %301, %cst_182 {dimension_numbers = #tpu.dot_dimension_numbers<[1], [0], [0], [1], [0, 0, 1, 1], [], []>} : vector<48x8xbf16>, vector<8x128xbf16>, vector<48x128xf32> -> vector<48x128xf32>
    %303 = vector.broadcast %300 : vector<48x1xf32> to vector<48x128xf32>
    %304 = arith.addf %302, %303 : vector<48x128xf32>
    %cst_183 = arith.constant 5.000000e-01 : f32
    %305 = vector.broadcast %cst_183 : f32 to vector<48x128xf32>
    %306 = arith.mulf %305, %304 : vector<48x128xf32>
    %307 = math.tanh %306 : vector<48x128xf32>
    %cst_184 = arith.constant 1.000000e+00 : f32
    %308 = vector.broadcast %cst_184 : f32 to vector<48x128xf32>
    %309 = arith.addf %307, %308 : vector<48x128xf32>
    %cst_185 = arith.constant 5.000000e-01 : f32
    %310 = vector.broadcast %cst_185 : f32 to vector<48x128xf32>
    %311 = arith.mulf %310, %309 : vector<48x128xf32>
    %312 = arith.mulf %304, %311 : vector<48x128xf32>
    %c0_186 = arith.constant 0 : index
    %c0_187 = arith.constant 0 : index
    %313 = vector.load %arg28[%c0_186, %c0_187] : memref<48x1xf32, #tpu.memory_space<vmem>>, vector<48x1xf32>
    %c9_i32_188 = arith.constant 9 : i32
    %314 = tpu.dynamic_rotate %312 by %c9_i32_188 dim 1 : vector<48x128xf32>, i32 -> vector<48x128xf32>
    %c0_189 = arith.constant 0 : index
    %c0_190 = arith.constant 0 : index
    %c0_191 = arith.constant 0 : index
    %315 = vector.load %arg6[%c0_189, %c0_190, %c0_191] : memref<9x1x128xf32, #tpu.memory_space<vmem>>, vector<1x1x128xf32>
    %316 = vector.shape_cast %315 : vector<1x1x128xf32> to vector<1x128xf32>
    %317 = vector.broadcast %316 : vector<1x128xf32> to vector<48x128xf32>
    %318 = arith.mulf %314, %317 : vector<48x128xf32>
    %c0_192 = arith.constant 0 : index
    %c0_193 = arith.constant 0 : index
    %c0_194 = arith.constant 0 : index
    %319 = vector.load %arg27[%c0_192, %c0_193, %c0_194] : memref<9x48x1xf32, #tpu.memory_space<vmem>>, vector<1x48x1xf32>
    %320 = vector.shape_cast %319 : vector<1x48x1xf32> to vector<48x1xf32>
    %321 = vector.broadcast %320 : vector<48x1xf32> to vector<48x128xf32>
    %322 = arith.mulf %318, %321 : vector<48x128xf32>
    %c8_i32_195 = arith.constant 8 : i32
    %323 = tpu.dynamic_rotate %312 by %c8_i32_195 dim 1 : vector<48x128xf32>, i32 -> vector<48x128xf32>
    %c1_196 = arith.constant 1 : index
    %c0_197 = arith.constant 0 : index
    %c0_198 = arith.constant 0 : index
    %324 = vector.load %arg6[%c1_196, %c0_197, %c0_198] : memref<9x1x128xf32, #tpu.memory_space<vmem>>, vector<1x1x128xf32>
    %325 = vector.shape_cast %324 : vector<1x1x128xf32> to vector<1x128xf32>
    %326 = vector.broadcast %325 : vector<1x128xf32> to vector<48x128xf32>
    %327 = arith.mulf %323, %326 : vector<48x128xf32>
    %c1_199 = arith.constant 1 : index
    %c0_200 = arith.constant 0 : index
    %c0_201 = arith.constant 0 : index
    %328 = vector.load %arg27[%c1_199, %c0_200, %c0_201] : memref<9x48x1xf32, #tpu.memory_space<vmem>>, vector<1x48x1xf32>
    %329 = vector.shape_cast %328 : vector<1x48x1xf32> to vector<48x1xf32>
    %330 = vector.broadcast %329 : vector<48x1xf32> to vector<48x128xf32>
    %331 = arith.mulf %327, %330 : vector<48x128xf32>
    %c7_i32_202 = arith.constant 7 : i32
    %332 = tpu.dynamic_rotate %312 by %c7_i32_202 dim 1 : vector<48x128xf32>, i32 -> vector<48x128xf32>
    %c2_203 = arith.constant 2 : index
    %c0_204 = arith.constant 0 : index
    %c0_205 = arith.constant 0 : index
    %333 = vector.load %arg6[%c2_203, %c0_204, %c0_205] : memref<9x1x128xf32, #tpu.memory_space<vmem>>, vector<1x1x128xf32>
    %334 = vector.shape_cast %333 : vector<1x1x128xf32> to vector<1x128xf32>
    %335 = vector.broadcast %334 : vector<1x128xf32> to vector<48x128xf32>
    %336 = arith.mulf %332, %335 : vector<48x128xf32>
    %c2_206 = arith.constant 2 : index
    %c0_207 = arith.constant 0 : index
    %c0_208 = arith.constant 0 : index
    %337 = vector.load %arg27[%c2_206, %c0_207, %c0_208] : memref<9x48x1xf32, #tpu.memory_space<vmem>>, vector<1x48x1xf32>
    %338 = vector.shape_cast %337 : vector<1x48x1xf32> to vector<48x1xf32>
    %339 = vector.broadcast %338 : vector<48x1xf32> to vector<48x128xf32>
    %340 = arith.mulf %336, %339 : vector<48x128xf32>
    %c1_i32_209 = arith.constant 1 : i32
    %341 = tpu.dynamic_rotate %312 by %c1_i32_209 dim 1 : vector<48x128xf32>, i32 -> vector<48x128xf32>
    %c3_210 = arith.constant 3 : index
    %c0_211 = arith.constant 0 : index
    %c0_212 = arith.constant 0 : index
    %342 = vector.load %arg6[%c3_210, %c0_211, %c0_212] : memref<9x1x128xf32, #tpu.memory_space<vmem>>, vector<1x1x128xf32>
    %343 = vector.shape_cast %342 : vector<1x1x128xf32> to vector<1x128xf32>
    %344 = vector.broadcast %343 : vector<1x128xf32> to vector<48x128xf32>
    %345 = arith.mulf %341, %344 : vector<48x128xf32>
    %c3_213 = arith.constant 3 : index
    %c0_214 = arith.constant 0 : index
    %c0_215 = arith.constant 0 : index
    %346 = vector.load %arg27[%c3_213, %c0_214, %c0_215] : memref<9x48x1xf32, #tpu.memory_space<vmem>>, vector<1x48x1xf32>
    %347 = vector.shape_cast %346 : vector<1x48x1xf32> to vector<48x1xf32>
    %348 = vector.broadcast %347 : vector<48x1xf32> to vector<48x128xf32>
    %349 = arith.mulf %345, %348 : vector<48x128xf32>
    %350 = arith.addf %322, %349 : vector<48x128xf32>
    %c4_216 = arith.constant 4 : index
    %c0_217 = arith.constant 0 : index
    %c0_218 = arith.constant 0 : index
    %351 = vector.load %arg27[%c4_216, %c0_217, %c0_218] : memref<9x48x1xf32, #tpu.memory_space<vmem>>, vector<1x48x1xf32>
    %352 = vector.shape_cast %351 : vector<1x48x1xf32> to vector<48x1xf32>
    %353 = vector.broadcast %352 : vector<48x1xf32> to vector<48x128xf32>
    %354 = arith.mulf %312, %353 : vector<48x128xf32>
    %355 = arith.addf %331, %354 : vector<48x128xf32>
    %c127_i32_219 = arith.constant 127 : i32
    %356 = tpu.dynamic_rotate %312 by %c127_i32_219 dim 1 : vector<48x128xf32>, i32 -> vector<48x128xf32>
    %c5_220 = arith.constant 5 : index
    %c0_221 = arith.constant 0 : index
    %c0_222 = arith.constant 0 : index
    %357 = vector.load %arg6[%c5_220, %c0_221, %c0_222] : memref<9x1x128xf32, #tpu.memory_space<vmem>>, vector<1x1x128xf32>
    %358 = vector.shape_cast %357 : vector<1x1x128xf32> to vector<1x128xf32>
    %359 = vector.broadcast %358 : vector<1x128xf32> to vector<48x128xf32>
    %360 = arith.mulf %356, %359 : vector<48x128xf32>
    %c5_223 = arith.constant 5 : index
    %c0_224 = arith.constant 0 : index
    %c0_225 = arith.constant 0 : index
    %361 = vector.load %arg27[%c5_223, %c0_224, %c0_225] : memref<9x48x1xf32, #tpu.memory_space<vmem>>, vector<1x48x1xf32>
    %362 = vector.shape_cast %361 : vector<1x48x1xf32> to vector<48x1xf32>
    %363 = vector.broadcast %362 : vector<48x1xf32> to vector<48x128xf32>
    %364 = arith.mulf %360, %363 : vector<48x128xf32>
    %365 = arith.addf %340, %364 : vector<48x128xf32>
    %c121_i32_226 = arith.constant 121 : i32
    %366 = tpu.dynamic_rotate %312 by %c121_i32_226 dim 1 : vector<48x128xf32>, i32 -> vector<48x128xf32>
    %c6_227 = arith.constant 6 : index
    %c0_228 = arith.constant 0 : index
    %c0_229 = arith.constant 0 : index
    %367 = vector.load %arg6[%c6_227, %c0_228, %c0_229] : memref<9x1x128xf32, #tpu.memory_space<vmem>>, vector<1x1x128xf32>
    %368 = vector.shape_cast %367 : vector<1x1x128xf32> to vector<1x128xf32>
    %369 = vector.broadcast %368 : vector<1x128xf32> to vector<48x128xf32>
    %370 = arith.mulf %366, %369 : vector<48x128xf32>
    %c6_230 = arith.constant 6 : index
    %c0_231 = arith.constant 0 : index
    %c0_232 = arith.constant 0 : index
    %371 = vector.load %arg27[%c6_230, %c0_231, %c0_232] : memref<9x48x1xf32, #tpu.memory_space<vmem>>, vector<1x48x1xf32>
    %372 = vector.shape_cast %371 : vector<1x48x1xf32> to vector<48x1xf32>
    %373 = vector.broadcast %372 : vector<48x1xf32> to vector<48x128xf32>
    %374 = arith.mulf %370, %373 : vector<48x128xf32>
    %375 = arith.addf %350, %374 : vector<48x128xf32>
    %c120_i32_233 = arith.constant 120 : i32
    %376 = tpu.dynamic_rotate %312 by %c120_i32_233 dim 1 : vector<48x128xf32>, i32 -> vector<48x128xf32>
    %c7_234 = arith.constant 7 : index
    %c0_235 = arith.constant 0 : index
    %c0_236 = arith.constant 0 : index
    %377 = vector.load %arg6[%c7_234, %c0_235, %c0_236] : memref<9x1x128xf32, #tpu.memory_space<vmem>>, vector<1x1x128xf32>
    %378 = vector.shape_cast %377 : vector<1x1x128xf32> to vector<1x128xf32>
    %379 = vector.broadcast %378 : vector<1x128xf32> to vector<48x128xf32>
    %380 = arith.mulf %376, %379 : vector<48x128xf32>
    %c7_237 = arith.constant 7 : index
    %c0_238 = arith.constant 0 : index
    %c0_239 = arith.constant 0 : index
    %381 = vector.load %arg27[%c7_237, %c0_238, %c0_239] : memref<9x48x1xf32, #tpu.memory_space<vmem>>, vector<1x48x1xf32>
    %382 = vector.shape_cast %381 : vector<1x48x1xf32> to vector<48x1xf32>
    %383 = vector.broadcast %382 : vector<48x1xf32> to vector<48x128xf32>
    %384 = arith.mulf %380, %383 : vector<48x128xf32>
    %385 = arith.addf %355, %384 : vector<48x128xf32>
    %c119_i32_240 = arith.constant 119 : i32
    %386 = tpu.dynamic_rotate %312 by %c119_i32_240 dim 1 : vector<48x128xf32>, i32 -> vector<48x128xf32>
    %c8_241 = arith.constant 8 : index
    %c0_242 = arith.constant 0 : index
    %c0_243 = arith.constant 0 : index
    %387 = vector.load %arg6[%c8_241, %c0_242, %c0_243] : memref<9x1x128xf32, #tpu.memory_space<vmem>>, vector<1x1x128xf32>
    %388 = vector.shape_cast %387 : vector<1x1x128xf32> to vector<1x128xf32>
    %389 = vector.broadcast %388 : vector<1x128xf32> to vector<48x128xf32>
    %390 = arith.mulf %386, %389 : vector<48x128xf32>
    %c8_244 = arith.constant 8 : index
    %c0_245 = arith.constant 0 : index
    %c0_246 = arith.constant 0 : index
    %391 = vector.load %arg27[%c8_244, %c0_245, %c0_246] : memref<9x48x1xf32, #tpu.memory_space<vmem>>, vector<1x48x1xf32>
    %392 = vector.shape_cast %391 : vector<1x48x1xf32> to vector<48x1xf32>
    %393 = vector.broadcast %392 : vector<48x1xf32> to vector<48x128xf32>
    %394 = arith.mulf %390, %393 : vector<48x128xf32>
    %395 = arith.addf %365, %394 : vector<48x128xf32>
    %396 = arith.addf %375, %385 : vector<48x128xf32>
    %397 = arith.addf %396, %395 : vector<48x128xf32>
    %398 = vector.broadcast %313 : vector<48x1xf32> to vector<48x128xf32>
    %399 = arith.addf %397, %398 : vector<48x128xf32>
    %cst_247 = arith.constant 5.000000e-01 : f32
    %400 = vector.broadcast %cst_247 : f32 to vector<48x128xf32>
    %401 = arith.mulf %400, %399 : vector<48x128xf32>
    %402 = math.tanh %401 : vector<48x128xf32>
    %cst_248 = arith.constant 1.000000e+00 : f32
    %403 = vector.broadcast %cst_248 : f32 to vector<48x128xf32>
    %404 = arith.addf %402, %403 : vector<48x128xf32>
    %cst_249 = arith.constant 5.000000e-01 : f32
    %405 = vector.broadcast %cst_249 : f32 to vector<48x128xf32>
    %406 = arith.mulf %405, %404 : vector<48x128xf32>
    %407 = arith.mulf %399, %406 : vector<48x128xf32>
    %c0_250 = arith.constant 0 : index
    %c0_251 = arith.constant 0 : index
    %408 = vector.load %arg29[%c0_250, %c0_251] : memref<2x48xbf16, #tpu.memory_space<vmem>>, vector<2x48xbf16>
    %c0_252 = arith.constant 0 : index
    %c0_253 = arith.constant 0 : index
    %409 = vector.load %arg30[%c0_252, %c0_253] : memref<2x1xf32, #tpu.memory_space<vmem>>, vector<2x1xf32>
    %c0_254 = arith.constant 0 : index
    %c0_255 = arith.constant 0 : index
    %410 = vector.load %arg31[%c0_254, %c0_255] : memref<48x2xbf16, #tpu.memory_space<vmem>>, vector<48x2xbf16>
    %c0_256 = arith.constant 0 : index
    %c0_257 = arith.constant 0 : index
    %411 = vector.load %arg32[%c0_256, %c0_257] : memref<48x1xf32, #tpu.memory_space<vmem>>, vector<48x1xf32>
    %412 = arith.truncf %407 : vector<48x128xf32> to vector<48x128xbf16>
    %cst_258 = arith.constant dense<0.000000e+00> : vector<48x2xf32>
    %413 = tpu.matmul %412, %15, %cst_258 {dimension_numbers = #tpu.dot_dimension_numbers<[1], [0], [0], [1], [0, 0, 1, 1], [], []>} : vector<48x128xbf16>, vector<128x2xbf16>, vector<48x2xf32> -> vector<48x2xf32>
    %414 = arith.truncf %413 : vector<48x2xf32> to vector<48x2xbf16>
    %cst_259 = arith.constant dense<0.000000e+00> : vector<2x2xf32>
    %415 = tpu.matmul %408, %414, %cst_259 {dimension_numbers = #tpu.dot_dimension_numbers<[1], [0], [0], [1], [0, 0, 1, 1], [], []>} : vector<2x48xbf16>, vector<48x2xbf16>, vector<2x2xf32> -> vector<2x2xf32>
    %416 = vector.broadcast %409 : vector<2x1xf32> to vector<2x2xf32>
    %417 = arith.addf %415, %416 : vector<2x2xf32>
    %cst_260 = arith.constant 5.000000e-01 : f32
    %418 = vector.broadcast %cst_260 : f32 to vector<2x2xf32>
    %419 = arith.mulf %418, %417 : vector<2x2xf32>
    %420 = math.tanh %419 : vector<2x2xf32>
    %cst_261 = arith.constant 1.000000e+00 : f32
    %421 = vector.broadcast %cst_261 : f32 to vector<2x2xf32>
    %422 = arith.addf %420, %421 : vector<2x2xf32>
    %cst_262 = arith.constant 5.000000e-01 : f32
    %423 = vector.broadcast %cst_262 : f32 to vector<2x2xf32>
    %424 = arith.mulf %423, %422 : vector<2x2xf32>
    %425 = arith.mulf %417, %424 : vector<2x2xf32>
    %426 = arith.truncf %425 : vector<2x2xf32> to vector<2x2xbf16>
    %cst_263 = arith.constant dense<0.000000e+00> : vector<48x2xf32>
    %427 = tpu.matmul %410, %426, %cst_263 {dimension_numbers = #tpu.dot_dimension_numbers<[1], [0], [0], [1], [0, 0, 1, 1], [], []>} : vector<48x2xbf16>, vector<2x2xbf16>, vector<48x2xf32> -> vector<48x2xf32>
    %428 = vector.broadcast %411 : vector<48x1xf32> to vector<48x2xf32>
    %429 = arith.addf %427, %428 : vector<48x2xf32>
    %cst_264 = arith.constant 5.000000e-01 : f32
    %430 = vector.broadcast %cst_264 : f32 to vector<48x2xf32>
    %431 = arith.mulf %430, %429 : vector<48x2xf32>
    %432 = math.tanh %431 : vector<48x2xf32>
    %cst_265 = arith.constant 1.000000e+00 : f32
    %433 = vector.broadcast %cst_265 : f32 to vector<48x2xf32>
    %434 = arith.addf %432, %433 : vector<48x2xf32>
    %cst_266 = arith.constant 5.000000e-01 : f32
    %435 = vector.broadcast %cst_266 : f32 to vector<48x2xf32>
    %436 = arith.mulf %435, %434 : vector<48x2xf32>
    %437 = arith.truncf %436 : vector<48x2xf32> to vector<48x2xbf16>
    %cst_267 = arith.constant dense<0.000000e+00> : vector<48x128xf32>
    %438 = tpu.matmul %437, %16, %cst_267 {dimension_numbers = #tpu.dot_dimension_numbers<[1], [0], [0], [1], [0, 0, 1, 1], [], []>} : vector<48x2xbf16>, vector<2x128xbf16>, vector<48x128xf32> -> vector<48x128xf32>
    %439 = arith.mulf %407, %438 : vector<48x128xf32>
    %c0_268 = arith.constant 0 : index
    %c0_269 = arith.constant 0 : index
    %440 = vector.load %arg33[%c0_268, %c0_269] : memref<8x48xbf16, #tpu.memory_space<vmem>>, vector<8x48xbf16>
    %c0_270 = arith.constant 0 : index
    %c0_271 = arith.constant 0 : index
    %441 = vector.load %arg34[%c0_270, %c0_271] : memref<8x1xf32, #tpu.memory_space<vmem>>, vector<8x1xf32>
    %442 = arith.truncf %439 : vector<48x128xf32> to vector<48x128xbf16>
    %cst_272 = arith.constant dense<0.000000e+00> : vector<8x128xf32>
    %443 = tpu.matmul %440, %442, %cst_272 {dimension_numbers = #tpu.dot_dimension_numbers<[1], [0], [0], [1], [0, 0, 1, 1], [], []>} : vector<8x48xbf16>, vector<48x128xbf16>, vector<8x128xf32> -> vector<8x128xf32>
    %444 = vector.broadcast %441 : vector<8x1xf32> to vector<8x128xf32>
    %445 = arith.addf %443, %444 : vector<8x128xf32>
    %446 = arith.addf %445, %298 : vector<8x128xf32>
    %c0_273 = arith.constant 0 : index
    %c0_274 = arith.constant 0 : index
    %447 = vector.load %arg35[%c0_273, %c0_274] : memref<160x8xbf16, #tpu.memory_space<vmem>>, vector<160x8xbf16>
    %c0_275 = arith.constant 0 : index
    %c0_276 = arith.constant 0 : index
    %448 = vector.load %arg36[%c0_275, %c0_276] : memref<160x1xf32, #tpu.memory_space<vmem>>, vector<160x1xf32>
    %c0_277 = arith.constant 0 : index
    %c0_278 = arith.constant 0 : index
    %449 = vector.load %arg37[%c0_277, %c0_278] : memref<160x10xbf16, #tpu.memory_space<vmem>>, vector<160x10xbf16>
    %c0_279 = arith.constant 0 : index
    %c0_280 = arith.constant 0 : index
    %450 = vector.load %arg38[%c0_279, %c0_280] : memref<1x10xf32, #tpu.memory_space<vmem>>, vector<1x10xf32>
    %451 = arith.truncf %446 : vector<8x128xf32> to vector<8x128xbf16>
    %cst_281 = arith.constant dense<0.000000e+00> : vector<160x128xf32>
    %452 = tpu.matmul %447, %451, %cst_281 {dimension_numbers = #tpu.dot_dimension_numbers<[1], [0], [0], [1], [0, 0, 1, 1], [], []>} : vector<160x8xbf16>, vector<8x128xbf16>, vector<160x128xf32> -> vector<160x128xf32>
    %453 = vector.broadcast %448 : vector<160x1xf32> to vector<160x128xf32>
    %454 = arith.addf %452, %453 : vector<160x128xf32>
    %455 = arith.truncf %454 : vector<160x128xf32> to vector<160x128xbf16>
    %cst_282 = arith.constant dense<0.000000e+00> : vector<2x160xf32>
    %456 = tpu.matmul %16, %455, %cst_282 {dimension_numbers = #tpu.dot_dimension_numbers<[1], [1], [0], [0], [0, 0, 1, 0], [], []>} : vector<2x128xbf16>, vector<160x128xbf16>, vector<2x160xf32> -> vector<2x160xf32>
    %457 = arith.mulf %456, %456 : vector<2x160xf32>
    %cst_283 = arith.constant dense<0.000000e+00> : vector<2xf32>
    %458 = vector.multi_reduction <add>, %457, %cst_283 [1] : vector<2x160xf32> to vector<2xf32>
    %459 = vector.shape_cast %458 : vector<2xf32> to vector<2x1xf32>
    %cst_284 = arith.constant 1.000000e-24 : f32
    %460 = vector.broadcast %cst_284 : f32 to vector<2x1xf32>
    %461 = arith.maximumf %459, %460 : vector<2x1xf32>
    %462 = math.rsqrt %461 : vector<2x1xf32>
    %463 = vector.broadcast %462 : vector<2x1xf32> to vector<2x160xf32>
    %464 = arith.mulf %456, %463 : vector<2x160xf32>
    %cst_285 = arith.constant 2.000000e+01 : f32
    %465 = vector.broadcast %cst_285 : f32 to vector<2x160xf32>
    %466 = arith.mulf %464, %465 : vector<2x160xf32>
    %467 = arith.truncf %466 : vector<2x160xf32> to vector<2x160xbf16>
    %cst_286 = arith.constant dense<0.000000e+00> : vector<2x10xf32>
    %468 = tpu.matmul %467, %449, %cst_286 {dimension_numbers = #tpu.dot_dimension_numbers<[1], [0], [0], [1], [0, 0, 1, 1], [], []>} : vector<2x160xbf16>, vector<160x10xbf16>, vector<2x10xf32> -> vector<2x10xf32>
    %469 = vector.broadcast %450 : vector<1x10xf32> to vector<2x10xf32>
    %470 = arith.addf %468, %469 : vector<2x10xf32>
    %c0_287 = arith.constant 0 : index
    %c0_288 = arith.constant 0 : index
    %471 = vector.load %arg39[%c0_287, %c0_288] : memref<2x10xf32, #tpu.memory_space<vmem>>, vector<2x10xf32>
    tpu.vector_store %arg39[%c0_287, %c0_288], %470 {strides = array<i32>} : memref<2x10xf32, #tpu.memory_space<vmem>>, vector<2x10xf32>,
    return
  }
  func.func @transform_0(%arg0: i32) -> (i32, i32) {
    %c0_i32 = arith.constant 0 : i32
    %c0_i32_0 = arith.constant 0 : i32
    %c0_i32_1 = arith.constant 0 : i32
    return %c0_i32, %c0_i32_0 : i32, i32
  }
  func.func @transform_1(%arg0: i32) -> (i32, i32) {
    %c0_i32 = arith.constant 0 : i32
    %c0_i32_0 = arith.constant 0 : i32
    %c0_i32_1 = arith.constant 0 : i32
    return %c0_i32, %c0_i32_0 : i32, i32
  }
  func.func @transform_2(%arg0: i32) -> (i32, i32) {
    %c0_i32 = arith.constant 0 : i32
    %c0_i32_0 = arith.constant 0 : i32
    %c0_i32_1 = arith.constant 0 : i32
    return %c0_i32, %c0_i32_0 : i32, i32
  }
  func.func @transform_3(%arg0: i32) -> (i32, i32) {
    %c0_i32 = arith.constant 0 : i32
    %c0_i32_0 = arith.constant 0 : i32
    %c0_i32_1 = arith.constant 0 : i32
    return %c0_i32, %c0_i32_0 : i32, i32
  }
  func.func @transform_4(%arg0: i32) -> (i32, i32) {
    %c0_i32 = arith.constant 0 : i32
    %c0_i32_0 = arith.constant 0 : i32
    %c0_i32_1 = arith.constant 0 : i32
    return %c0_i32, %c0_i32_0 : i32, i32
  }
  func.func @transform_5(%arg0: i32) -> (i32, i32, i32) {
    %c0_i32 = arith.constant 0 : i32
    %c0_i32_0 = arith.constant 0 : i32
    %c0_i32_1 = arith.constant 0 : i32
    %c0_i32_2 = arith.constant 0 : i32
    return %c0_i32, %c0_i32_0, %c0_i32_1 : i32, i32, i32
  }
  func.func @transform_6(%arg0: i32) -> (i32, i32, i32) {
    %c0_i32 = arith.constant 0 : i32
    %c0_i32_0 = arith.constant 0 : i32
    %c0_i32_1 = arith.constant 0 : i32
    %c0_i32_2 = arith.constant 0 : i32
    return %c0_i32, %c0_i32_0, %c0_i32_1 : i32, i32, i32
  }
  func.func @transform_7(%arg0: i32) -> (i32, i32) {
    %c0_i32 = arith.constant 0 : i32
    %c0_i32_0 = arith.constant 0 : i32
    %c0_i32_1 = arith.constant 0 : i32
    return %c0_i32, %c0_i32_0 : i32, i32
  }
  func.func @transform_8(%arg0: i32) -> (i32, i32) {
    %c0_i32 = arith.constant 0 : i32
    %c0_i32_0 = arith.constant 0 : i32
    %c0_i32_1 = arith.constant 0 : i32
    return %c0_i32, %c0_i32_0 : i32, i32
  }
  func.func @transform_9(%arg0: i32) -> (i32, i32) {
    %c0_i32 = arith.constant 0 : i32
    %c0_i32_0 = arith.constant 0 : i32
    %c0_i32_1 = arith.constant 0 : i32
    return %c0_i32, %c0_i32_0 : i32, i32
  }
  func.func @transform_10(%arg0: i32) -> (i32, i32) {
    %c0_i32 = arith.constant 0 : i32
    %c0_i32_0 = arith.constant 0 : i32
    %c0_i32_1 = arith.constant 0 : i32
    return %c0_i32, %c0_i32_0 : i32, i32
  }
  func.func @transform_11(%arg0: i32) -> (i32, i32) {
    %c0_i32 = arith.constant 0 : i32
    %c0_i32_0 = arith.constant 0 : i32
    %c0_i32_1 = arith.constant 0 : i32
    return %c0_i32, %c0_i32_0 : i32, i32
  }
  func.func @transform_12(%arg0: i32) -> (i32, i32) {
    %c0_i32 = arith.constant 0 : i32
    %c0_i32_0 = arith.constant 0 : i32
    %c0_i32_1 = arith.constant 0 : i32
    return %c0_i32, %c0_i32_0 : i32, i32
  }
  func.func @transform_13(%arg0: i32) -> (i32, i32) {
    %c0_i32 = arith.constant 0 : i32
    %c0_i32_0 = arith.constant 0 : i32
    %c0_i32_1 = arith.constant 0 : i32
    return %c0_i32, %c0_i32_0 : i32, i32
  }
  func.func @transform_14(%arg0: i32) -> (i32, i32) {
    %c0_i32 = arith.constant 0 : i32
    %c0_i32_0 = arith.constant 0 : i32
    %c0_i32_1 = arith.constant 0 : i32
    return %c0_i32, %c0_i32_0 : i32, i32
  }
  func.func @transform_15(%arg0: i32) -> (i32, i32) {
    %c0_i32 = arith.constant 0 : i32
    %c0_i32_0 = arith.constant 0 : i32
    %c0_i32_1 = arith.constant 0 : i32
    return %c0_i32, %c0_i32_0 : i32, i32
  }
  func.func @transform_16(%arg0: i32) -> (i32, i32, i32) {
    %c0_i32 = arith.constant 0 : i32
    %c0_i32_0 = arith.constant 0 : i32
    %c0_i32_1 = arith.constant 0 : i32
    %c0_i32_2 = arith.constant 0 : i32
    return %c0_i32, %c0_i32_0, %c0_i32_1 : i32, i32, i32
  }
  func.func @transform_17(%arg0: i32) -> (i32, i32) {
    %c0_i32 = arith.constant 0 : i32
    %c0_i32_0 = arith.constant 0 : i32
    %c0_i32_1 = arith.constant 0 : i32
    return %c0_i32, %c0_i32_0 : i32, i32
  }
  func.func @transform_18(%arg0: i32) -> (i32, i32) {
    %c0_i32 = arith.constant 0 : i32
    %c0_i32_0 = arith.constant 0 : i32
    %c0_i32_1 = arith.constant 0 : i32
    return %c0_i32, %c0_i32_0 : i32, i32
  }
  func.func @transform_19(%arg0: i32) -> (i32, i32) {
    %c0_i32 = arith.constant 0 : i32
    %c0_i32_0 = arith.constant 0 : i32
    %c0_i32_1 = arith.constant 0 : i32
    return %c0_i32, %c0_i32_0 : i32, i32
  }
  func.func @transform_20(%arg0: i32) -> (i32, i32) {
    %c0_i32 = arith.constant 0 : i32
    %c0_i32_0 = arith.constant 0 : i32
    %c0_i32_1 = arith.constant 0 : i32
    return %c0_i32, %c0_i32_0 : i32, i32
  }
  func.func @transform_21(%arg0: i32) -> (i32, i32) {
    %c0_i32 = arith.constant 0 : i32
    %c0_i32_0 = arith.constant 0 : i32
    %c0_i32_1 = arith.constant 0 : i32
    return %c0_i32, %c0_i32_0 : i32, i32
  }
  func.func @transform_22(%arg0: i32) -> (i32, i32) {
    %c0_i32 = arith.constant 0 : i32
    %c0_i32_0 = arith.constant 0 : i32
    %c0_i32_1 = arith.constant 0 : i32
    return %c0_i32, %c0_i32_0 : i32, i32
  }
  func.func @transform_23(%arg0: i32) -> (i32, i32) {
    %c0_i32 = arith.constant 0 : i32
    %c0_i32_0 = arith.constant 0 : i32
    %c0_i32_1 = arith.constant 0 : i32
    return %c0_i32, %c0_i32_0 : i32, i32
  }
  func.func @transform_24(%arg0: i32) -> (i32, i32) {
    %c0_i32 = arith.constant 0 : i32
    %c0_i32_0 = arith.constant 0 : i32
    %c0_i32_1 = arith.constant 0 : i32
    return %c0_i32, %c0_i32_0 : i32, i32
  }
  func.func @transform_25(%arg0: i32) -> (i32, i32) {
    %c0_i32 = arith.constant 0 : i32
    %c0_i32_0 = arith.constant 0 : i32
    %c0_i32_1 = arith.constant 0 : i32
    return %c0_i32, %c0_i32_0 : i32, i32
  }
  func.func @transform_26(%arg0: i32) -> (i32, i32, i32) {
    %c0_i32 = arith.constant 0 : i32
    %c0_i32_0 = arith.constant 0 : i32
    %c0_i32_1 = arith.constant 0 : i32
    %c0_i32_2 = arith.constant 0 : i32
    return %c0_i32, %c0_i32_0, %c0_i32_1 : i32, i32, i32
  }
  func.func @transform_27(%arg0: i32) -> (i32, i32) {
    %c0_i32 = arith.constant 0 : i32
    %c0_i32_0 = arith.constant 0 : i32
    %c0_i32_1 = arith.constant 0 : i32
    return %c0_i32, %c0_i32_0 : i32, i32
  }
  func.func @transform_28(%arg0: i32) -> (i32, i32) {
    %c0_i32 = arith.constant 0 : i32
    %c0_i32_0 = arith.constant 0 : i32
    %c0_i32_1 = arith.constant 0 : i32
    return %c0_i32, %c0_i32_0 : i32, i32
  }
  func.func @transform_29(%arg0: i32) -> (i32, i32) {
    %c0_i32 = arith.constant 0 : i32
    %c0_i32_0 = arith.constant 0 : i32
    %c0_i32_1 = arith.constant 0 : i32
    return %c0_i32, %c0_i32_0 : i32, i32
  }
  func.func @transform_30(%arg0: i32) -> (i32, i32) {
    %c0_i32 = arith.constant 0 : i32
    %c0_i32_0 = arith.constant 0 : i32
    %c0_i32_1 = arith.constant 0 : i32
    return %c0_i32, %c0_i32_0 : i32, i32
  }
  func.func @transform_31(%arg0: i32) -> (i32, i32) {
    %c0_i32 = arith.constant 0 : i32
    %c0_i32_0 = arith.constant 0 : i32
    %c0_i32_1 = arith.constant 0 : i32
    return %c0_i32, %c0_i32_0 : i32, i32
  }
  func.func @transform_32(%arg0: i32) -> (i32, i32) {
    %c0_i32 = arith.constant 0 : i32
    %c0_i32_0 = arith.constant 0 : i32
    %c0_i32_1 = arith.constant 0 : i32
    return %c0_i32, %c0_i32_0 : i32, i32
  }
  func.func @transform_33(%arg0: i32) -> (i32, i32) {
    %c0_i32 = arith.constant 0 : i32
    %c0_i32_0 = arith.constant 0 : i32
    %c0_i32_1 = arith.constant 0 : i32
    return %c0_i32, %c0_i32_0 : i32, i32
  }
  func.func @transform_34(%arg0: i32) -> (i32, i32) {
    %c0_i32 = arith.constant 0 : i32
    %c0_i32_0 = arith.constant 0 : i32
    %c0_i32_1 = arith.constant 0 : i32
    return %c0_i32, %c0_i32_0 : i32, i32
  }
  func.func @transform_35(%arg0: i32) -> (i32, i32) {
    %c0_i32 = arith.constant 0 : i32
    %c0_i32_0 = arith.constant 0 : i32
    %c0_i32_1 = arith.constant 0 : i32
    return %c0_i32, %c0_i32_0 : i32, i32
  }
  func.func @transform_36(%arg0: i32) -> (i32, i32) {
    %c0_i32 = arith.constant 0 : i32
    %c0_i32_0 = arith.constant 0 : i32
    %c0_i32_1 = arith.constant 0 : i32
    return %c0_i32, %c0_i32_0 : i32, i32
  }
  func.func @transform_37(%arg0: i32) -> (i32, i32) {
    %c0_i32 = arith.constant 0 : i32
    %c0_i32_0 = arith.constant 0 : i32
    %c0_i32_1 = arith.constant 0 : i32
    return %c0_i32, %c0_i32_0 : i32, i32
  }
  func.func @transform_38(%arg0: i32) -> (i32, i32) {
    %c0_i32 = arith.constant 0 : i32
    %c0_i32_0 = arith.constant 0 : i32
    %c0_i32_1 = arith.constant 0 : i32
    return %c0_i32, %c0_i32_0 : i32, i32
  }
}

</mosaic_0001>

<bundles_post_ra>
// kernel: fwd.1
= control target key start
LH: loop header
LB: loop body
LE: loop exit
PB: predicated region body
PF: predicated region fallthrough
CT: control target
= control target key end

     0   :  { %s4503_s6 = smov 1   ;;  %s4504_s10 = smov 2   ;;  %s6090_s0 = inlined_call_operand.smem [shape: u32[39], index: -1, kind: input, shape index: {}] }
   0x1   :  { %s4562_s5 = sld [smem:[%s6090_s0]]   ;;  %s4505_s14 = smov 3  }
   0x2   :  { %s4567_s9 = sld [smem:[%s6090_s0 + %s4503_s6]]   ;;  %s4506_s18 = smov 4  }
   0x3   :  { %s4572_s13 = sld [smem:[%s6090_s0 + %s4504_s10]]   ;;  %s4507_s22 = smov 5  }
   0x4   :  { %s4577_s17 = sld [smem:[%s6090_s0 + %s4505_s14]]   ;;  %s4508_s26 = smov 6  }
   0x5   :  { %s4582_s21 = sld [smem:[%s6090_s0 + %s4506_s18]]   ;;  %s4509_s30 = smov 7  }
   0x6   :  { %s4587_s25 = sld [smem:[%s6090_s0 + %s4507_s22]]   ;;  %s4510_s4 = smov 8  }
   0x7   :  { %s4592_s29 = sld [smem:[%s6090_s0 + %s4508_s26]]   ;;  %s4511_s10 = smov 9  }
   0x8   :  { %s4597_s3 = sld [smem:[%s6090_s0 + %s4509_s30]]   ;;  %s4512_s15 = smov 10  }
   0x9   :  { %s4602_s8 = sld [smem:[%s6090_s0 + %s4510_s4]]   ;;  %s4513_s20 = smov 11  }
   0xa   :  { %s4607_s14 = sld [smem:[%s6090_s0 + %s4511_s10]]   ;;  %s4514_s26 = smov 12  }
   0xb   :  { %6115 = sst [smem:[#allocation5_spill]] %s4582_s21  ;;  %s4515_s1 = smov 13  }
   0xc   :  { %s4612_s19 = sld [smem:[%s6090_s0 + %s4512_s15]]   ;;  %s4516_s7 = smov 14  }
   0xd   :  { %s4617_s24 = sld [smem:[%s6090_s0 + %s4513_s20]]   ;;  %s4517_s15 = smov 15  }
   0xe   :  { %s4622_s30 = sld [smem:[%s6090_s0 + %s4514_s26]]   ;;  %s4518_s22 = smov 16  }
   0xf   :  { %s4627_s6 = sld [smem:[%s6090_s0 + %s4515_s1]]   ;;  %s4519_s28 = smov 17  }
  0x10   :  { %s4632_s12 = sld [smem:[%s6090_s0 + %s4516_s7]]   ;;  %s4520_s7 = smov 18  }
  0x11   :  { %s4637_s20 = sld [smem:[%s6090_s0 + %s4517_s15]]   ;;  %s4521_s15 = smov 19  }
  0x12   :  { %6116 = sst [smem:[#allocation6_spill]] %s4612_s19 }
  0x13   :  { %s4642_s27 = sld [smem:[%s6090_s0 + %s4518_s22]]   ;;  %s4522_s22 = smov 20  }
  0x14   :  { %6117 = sst [smem:[#allocation7_spill]] %s4622_s30 }
  0x15   :  { %s4647_s4 = sld [smem:[%s6090_s0 + %s4519_s28]]   ;;  %s4523_s28 = smov 21  }
  0x16   :  { %6118 = sst [smem:[#allocation8_spill]] %s4632_s12 }
  0x17   :  { %s4652_s12 = sld [smem:[%s6090_s0 + %s4520_s7]]   ;;  %s4524_s7 = smov 22  }
  0x18   :  { %s4657_s30 = sld [smem:[%s6090_s0 + %s4521_s15]]   ;;  %s4525_s15 = smov 23  }
  0x19   :  { %s4662_s21 = sld [smem:[%s6090_s0 + %s4522_s22]]   ;;  %s4526_s22 = smov 24  }
  0x1a   :  { %s4667_s19 = sld [smem:[%s6090_s0 + %s4523_s28]]   ;;  %s4527_s28 = smov 25  }
  0x1d   :  { %6119 = sst [smem:[#allocation9_spill]] %s4652_s12 }
  0x1e   :  { %6120 = sst [smem:[#allocation10_spill]] %s4657_s30 }
  0x1f   :  { %6121 = sst [smem:[#allocation11_spill]] %s4662_s21 }
  0x20   :  { %6122 = sst [smem:[#allocation12_spill]] %s4667_s19 }
  0x21   :  { %s4672_s12 = sld [smem:[%s6090_s0 + %s4524_s7]]   ;;  %s4528_s7 = smov 26  }
  0x22   :  { %s4677_s30 = sld [smem:[%s6090_s0 + %s4525_s15]]   ;;  %s4529_s15 = smov 27  }
  0x23   :  { %s4682_s21 = sld [smem:[%s6090_s0 + %s4526_s22]]   ;;  %s4530_s22 = smov 28  }
  0x24   :  { %s4687_s19 = sld [smem:[%s6090_s0 + %s4527_s28]]   ;;  %s4531_s28 = smov 29  }
  0x27   :  { %6123 = sst [smem:[#allocation13_spill]] %s4672_s12 }
  0x28   :  { %6124 = sst [smem:[#allocation14_spill]] %s4677_s30 }
  0x29   :  { %6125 = sst [smem:[#allocation15_spill]] %s4682_s21 }
  0x2a   :  { %6126 = sst [smem:[#allocation16_spill]] %s4687_s19 }
  0x2b   :  { %s4692_s12 = sld [smem:[%s6090_s0 + %s4528_s7]]   ;;  %s4532_s7 = smov 30  }
  0x2c   :  { %s4697_s30 = sld [smem:[%s6090_s0 + %s4529_s15]]   ;;  %s4533_s15 = smov 31  }
  0x2d   :  { %s4702_s21 = sld [smem:[%s6090_s0 + %s4530_s22]]   ;;  %s4534_s22 = smov 32  }
  0x2e   :  { %s4707_s19 = sld [smem:[%s6090_s0 + %s4531_s28]]   ;;  %s4535_s28 = smov 33  }
  0x31   :  { %6127 = sst [smem:[#allocation17_spill]] %s4692_s12 }
  0x32   :  { %6128 = sst [smem:[#allocation18_spill]] %s4697_s30 }
  0x33   :  { %6129 = sst [smem:[#allocation19_spill]] %s4702_s21 }
  0x34   :  { %6130 = sst [smem:[#allocation20_spill]] %s4707_s19 }
  0x35   :  { %s4712_s12 = sld [smem:[%s6090_s0 + %s4532_s7]]   ;;  %s4536_s7 = smov 34  }
  0x36   :  { %s4717_s30 = sld [smem:[%s6090_s0 + %s4533_s15]]   ;;  %s4537_s15 = smov 35  }
  0x37   :  { %s4722_s21 = sld [smem:[%s6090_s0 + %s4534_s22]]   ;;  %s4538_s22 = smov 36  }
  0x38   :  { %s4727_s19 = sld [smem:[%s6090_s0 + %s4535_s28]]   ;;  %s4539_s28 = smov 37  }
  0x3b   :  { %6131 = sst [smem:[#allocation21_spill]] %s4712_s12 }
  0x3c   :  { %6132 = sst [smem:[#allocation22_spill]] %s4717_s30 }
  0x3d   :  { %6133 = sst [smem:[#allocation23_spill]] %s4722_s21 }
  0x3e   :  { %6134 = sst [smem:[#allocation24_spill]] %s4727_s19 }
  0x3f   :  { %s4732_s12 = sld [smem:[%s6090_s0 + %s4536_s7]]   ;;  %s4540_s7 = smov 38  }
  0x40   :  { %s4737_s30 = sld [smem:[%s6090_s0 + %s4537_s15]]  }
  0x41   :  { %s4742_s21 = sld [smem:[%s6090_s0 + %s4538_s22]]  }
  0x42   :  { %s4747_s19 = sld [smem:[%s6090_s0 + %s4539_s28]]  }
  0x45   :  { %6135 = sst [smem:[#allocation25_spill]] %s4732_s12 }
  0x46   :  { %s4752_s12 = sld [smem:[%s6090_s0 + %s4540_s7]]  }
  0x47   :  { %v160_v0 = vld [vmem:[%s4562_s5] sm:$0xff]  ;;  %v161_v1 = vld [vmem:[%s4562_s5 + $0x8] sm:$0x1]  ;;  %vm174_vm0 = vcmask 1043456   ;;  %vm175_vm1 = vcmask 1044480   ;;  %v6104_v2 = vmov 0.0  }
  0x48   :  { %4024 = vmatprep.subr.bf16.mxu1 %v6104_v2  ;;  %v164_v3 = vpack.c.bf16 %v161_v1, %v160_v0  ;;  %v163_v4 = vld [vmem:[%s4572_s13] sm:$0xff]  ;;  %4050 = vmatprep.subr.bf16.mxu0 %v6104_v2  ;;  %v4542_v5 = vmov 65535   ;;  %vm4543_vm2 = vmmov 0   ;;  %vm170_vm3 = vcmask 72704   ;;  %v3738_v10 = vld [vmem:[%s4592_s29 + $0x8] sm:$0xff]  ;;  %v3744_v14 = vld [vmem:[%s4592_s29 + $0x18] sm:$0xff] }
  0x49   :  { %v176_v6 = vsel %vm174_vm0, 4294967295, %v4542_v5  ;;  %4026 = vmatprep.mubr.msk.bf16.mxu1 %vm4543_vm2, %v6104_v2  ;;  %4052 = vmatprep.mubr.msk.bf16.mxu0 %vm4543_vm2, %v6104_v2  ;;  %v6102_v8 = vmov 0   ;;  %v254_v9 = vld [vmem:[%s4592_s29] sm:$0xff]  ;;  %v3748_v15 = vld [vmem:[%s4592_s29 + $0x28] sm:$0xff]  ;;  %v3741_v16 = vld [vmem:[%s4592_s29 + $0x10] sm:$0xff] }
  0x4a   :  { %v177_v7 = vsel %vm175_vm1, %v176_v6, 0  ;;  %4328 = vset.pattern.permute.xlu0 %v6102_v8  ;;  %4329 = vset.pattern.permute.xlu1 %v6102_v8  ;;  %v162_v12 = vld [vmem:[%s4567_s9] sm:$0xf]  ;;  %v3754_v17 = vld [vmem:[%s4592_s29 + $0x38] sm:$0xff]  ;;  %v3751_v18 = vld [vmem:[%s4592_s29 + $0x30] sm:$0xff] }
  0x4b   :  { %v179_v11 = vand.u32 %v177_v7, %v164_v3  ;;  %167 = vperm.xlu0 %4328, %v163_v4   ;;  %276 = vperm.xlu1 %4329, %v3738_v10   ;;  %v3745_v13 = vld [vmem:[%s4592_s29 + $0x20] sm:$0xff] }
  0x4c   :  { %v3757_v19 = vld [vmem:[%s4592_s29 + $0x40] sm:$0xff] }
  0x4d   :  { %4025 = vmatpush3.bf16.msra.mxu1 %v179_v11 }
  0x4e   :  { %4030 = vmatprep.subr.bf16.mxu1 %v6104_v2 }
  0x4f   :  { %257 = vperm.xlu0 %4328, %v254_v9   ;;  %314 = vperm.xlu1 %4329, %v3744_v14  }
  0x50   :  { %4027 = vmatmul.mubr.msk.bf16.vlgmr.msra.gmra.mxu1 %vm170_vm3, %v162_v12 }
  0x51   :  { %4046 = vmatprep.mubr.msk.bf16.mxu1 %vm4543_vm2, %v6104_v2 }
  0x53   :  { %323 = vperm.xlu0 %4328, %v3745_v13   ;;  %295 = vperm.xlu1 %4329, %v3741_v16  }
  0x57   :  { %343 = vperm.xlu0 %4328, %v3748_v15   ;;  %363 = vperm.xlu1 %4329, %v3751_v18  }
  0x5b   :  { %383 = vperm.xlu0 %4328, %v3754_v17  }
  0x5f   :  { %403 = vperm.xlu0 %4328, %v3757_v19  }
  0x60   :  { %82 = vsyncpa [#allocation3], 0  ;;  %s4545_s0 = smov 8   ;;  %s4546_s5 = smov 9   ;;  %v4791_v31 = vld [vmem:[%s4577_s17 + $0x38] sm:$0xff]   ;;  %v4800_v32 = vld [vmem:[%s4577_s17 + $0x30] sm:$0xff]  }
  0x61   :  { %s4547_s9 = smov 127   ;;  %s4548_s13 = smov 1   ;;  %4031 = vmatpush3.bf16.msra.mxu1 %v4791_v31  ;;  %v243_v33 = vld [vmem:[%s4597_s3] sm:$0xff]  ;;  %v4808_v34 = vld [vmem:[%s4577_s17 + $0x28] sm:$0xff]   ;;  %v4823_v39 = vld [vmem:[%s4577_s17 + $0x18] sm:$0xff]   ;;  %vm520_vm4 = vcmask 64512  }
  0x62   :  { %4032 = vmatprep.subr.bf16.mxu1 %v6104_v2  ;;  %s4549_s29 = smov 120   ;;  %s4550_s15 = smov 7   ;;  %v424_v35 = vld [vmem:[%s4617_s24] sm:$0xff]  ;;  %v741_v40 = vld [vmem:[%s4637_s20 + $0x10] sm:$0xff]  ;;  %v740_v44 = vld [vmem:[%s4637_s20 + $0x8] sm:$0xff]  ;;  %vm582_vm5 = vcmask 1040384  }
  0x63   :  { %s4551_s16 = smov 121   ;;  %s4552_s3 = smov 119   ;;  %v4816_v36 = vld [vmem:[%s4577_s17 + $0x20] sm:$0xff]   ;;  %v4830_v42 = vld [vmem:[%s4577_s17 + $0x10] sm:$0xff]   ;;  %v4837_v45 = vld [vmem:[%s4577_s17 + $0x8] sm:$0xff]   ;;  %vm578_vm6 = vcmask 15360  }
  0x64   :  { %v739_v37 = vld [vmem:[%s4637_s20] sm:$0xff]  ;;  %v742_v47 = vld [vmem:[%s4637_s20 + $0x18] sm:$0xff]  ;;  %v3776_v49 = vld [vmem:[%s4642_s27 + $0x30] sm:$0xff]  ;;  %s6137_s24 = sld [smem:[#allocation5_spill]]  ;;  %vm1622_vm7 = vcmask 392192   ;;  %vm3555_vm8 = vcmask 1041408  }
  0x65   :  { %4033 = vmatpush3.bf16.msra.mxu1 %v4800_v32  ;;  %v422_v38 = vld [vmem:[%s4607_s14] sm:$0x3]  ;;  %v744_v50 = vld [vmem:[%s4637_s20 + $0x28] sm:$0xff]  ;;  %v3788_v51 = vld [vmem:[%s4642_s27 + $0x90] sm:$0xff]  ;;  %s6136_s14 = sld [smem:[#allocation6_spill]]  ;;  %vm3557_vm9 = vcmask 254976  }
  0x66   :  { %4034 = vmatprep.subr.bf16.mxu1 %v6104_v2  ;;  %v679_v41 = vld [vmem:[%s4627_s6] sm:$0xff]  ;;  %v915_v52 = vld [vmem:[%s4642_s27 + $0x8] sm:$0xff]  ;;  %v3777_v54 = vld [vmem:[%s4642_s27 + $0x38] sm:$0xff]  ;;  %s6140_s6 = sld [smem:[#allocation8_spill]]  ;;  %vm3636_vm10 = vcmask 261120   ;;  %vm3680_vm11 = vcmask 74752  }
  0x67   :  { %v743_v43 = vld [vmem:[%s4637_s20 + $0x20] sm:$0xff]  ;;  %v3789_v56 = vld [vmem:[%s4642_s27 + $0x98] sm:$0xff]  ;;  %v3800_v57 = vld [vmem:[%s4642_s27 + $0xf0] sm:$0xff]  ;;  %s6162_s20 = sld [smem:[#allocation10_spill]] }
  0x68   :  { %v914_v46 = vld [vmem:[%s4642_s27] sm:$0xff]  ;;  %v3795_v58 = vld [vmem:[%s4642_s27 + $0xc8] sm:$0xff]  ;;  %v3812_v61 = vld [vmem:[%s4642_s27 + $0x150] sm:$0xff]  ;;  %s6170_s18 = sld [smem:[#allocation16_spill]] }
  0x69   :  { %4035 = vmatpush3.bf16.msra.mxu1 %v4808_v34  ;;  %v4844_v48 = vld [vmem:[%s4577_s17] sm:$0xff]   ;;  %v3783_v60 = vld [vmem:[%s4642_s27 + $0x68] sm:$0xff]  ;;  %v3801_v62 = vld [vmem:[%s4642_s27 + $0xf8] sm:$0xff]  ;;  %s6171_s22 = sld [smem:[#allocation14_spill]] }
  0x6a   :  { %4036 = vmatprep.subr.bf16.mxu1 %v6104_v2  ;;  %v3794_v53 = vld [vmem:[%s4642_s27 + $0xc0] sm:$0xff]  ;;  %v3807_v0 = vld [vmem:[%s4642_s27 + $0x128] sm:$0xff]  ;;  %v916_v1 = vld [vmem:[%s4642_s27 + $0x10] sm:$0xff]  ;;  %s6190_s23 = sld [smem:[#allocation18_spill]] }
  0x6b   :  { %v3782_v55 = vld [vmem:[%s4642_s27 + $0x60] sm:$0xff]  ;;  %v3813_v3 = vld [vmem:[%s4642_s27 + $0x158] sm:$0xff]  ;;  %v3819_v5 = vld [vmem:[%s4642_s27 + $0x188] sm:$0xff]  ;;  %s6212_s26 = sld [smem:[#allocation9_spill]] }
  0x6c   :  { %v3806_v59 = vld [vmem:[%s4642_s27 + $0x120] sm:$0xff]  ;;  %v917_v7 = vld [vmem:[%s4642_s27 + $0x18] sm:$0xff]  ;;  %v3796_v9 = vld [vmem:[%s4642_s27 + $0xd0] sm:$0xff]  ;;  %s6213_s28 = sld [smem:[#allocation11_spill]] }
  0x6d   :  { %4037 = vmatpush3.bf16.msra.mxu1 %v4816_v36  ;;  %v3818_v63 = vld [vmem:[%s4642_s27 + $0x180] sm:$0xff]  ;;  %v3779_v10 = vld [vmem:[%s4642_s27 + $0x48] sm:$0xff]  ;;  %v3784_v11 = vld [vmem:[%s4642_s27 + $0x70] sm:$0xff]  ;;  %s6214_s1 = sld [smem:[#allocation13_spill]] }
  0x6e   :  { %4038 = vmatprep.subr.bf16.mxu1 %v6104_v2  ;;  %v3778_v4 = vld [vmem:[%s4642_s27 + $0x40] sm:$0xff]  ;;  %v3791_v12 = vld [vmem:[%s4642_s27 + $0xa8] sm:$0xff]  ;;  %v3797_v14 = vld [vmem:[%s4642_s27 + $0xd8] sm:$0xff]  ;;  %s6235_s2 = sld [smem:[#allocation20_spill]] }
  0x6f   :  { %v3790_v6 = vld [vmem:[%s4642_s27 + $0xa0] sm:$0xff]  ;;  %v3808_v16 = vld [vmem:[%s4642_s27 + $0x130] sm:$0xff]  ;;  %v3785_v17 = vld [vmem:[%s4642_s27 + $0x78] sm:$0xff]  ;;  %s6238_s7 = sld [smem:[#allocation22_spill]] }
  0x70   :  { %v3802_v13 = vld [vmem:[%s4642_s27 + $0x100] sm:$0xff]  ;;  %s6243_s10 = sld [smem:[#allocation24_spill]] }
  0x71   :  { %4039 = vmatpush3.bf16.msra.mxu1 %v4823_v39  ;;  %s6282_s11 = sld [smem:[#allocation23_spill]] }
  0x72   :  { %4040 = vmatprep.subr.bf16.mxu1 %v6104_v2 }
  0x75   :  { %4041 = vmatpush3.bf16.msra.mxu1 %v4830_v42 }
  0x76   :  { %4042 = vmatprep.subr.bf16.mxu1 %v6104_v2 }
  0x79   :  { %4043 = vmatpush3.bf16.msra.mxu1 %v4837_v45 }
  0x7a   :  { %4044 = vmatprep.subr.bf16.mxu1 %v6104_v2 }
  0x7d   :  { %4045 = vmatpush3.bf16.msra.mxu1 %v4844_v48 }
  0x7e   :  { %4074 = vmatprep.subr.bf16.mxu1 %v6104_v2 }
  0xc6   :  { %v168_v20 = vpop.permute.xlu0 %167  ;;  %v4882_v19 = vpop.permute.xlu1 %276 }
  0xca   :  { %v4876_v15 = vpop.permute.xlu0 %257 }
  0xce   :  { %v4880_v18 = vpop.permute.xlu0 %323 }
 0x110   :  { %v215_v21 = vpop.f32.mrf.mxu1 }
 0x111   :  { %v216_v22 = vadd.f32 %v215_v21, %v168_v20  ;;  %v3814_v20 = vld [vmem:[%s4642_s27 + $0x160] sm:$0xff]  ;;  %v3803_v21 = vld [vmem:[%s4642_s27 + $0x108] sm:$0xff] }
 0x112   :  { %v4028_v23 = vpop.f32.mrf.mxu1 }
 0x113   :  { %v221_v24 = vmul.f32 0.5, %v216_v22  ;;  %v3809_v23 = vld [vmem:[%s4642_s27 + $0x138] sm:$0xff] }
 0x114   :  { %v218_v25 = vpop.f32.mrf.mxu1 }
 0x115   :  { %4370 = vtanh.f32 %v221_v24  ;;  %v4888_v24 = vpop.permute.xlu0 %343  ;;  %v315_v25 = vpop.permute.xlu1 %314 }
 0x116   :  { %v4029_v26 = vpop.f32.mrf.mxu1 }
 0x117   :  { %v3820_v26 = vld [vmem:[%s4642_s27 + $0x190] sm:$0xff] }
 0x122   :  { %v4371_v27 = vpop.eup %4370 }
 0x123   :  { %v223_v28 = vadd.f32 1.0, %v4371_v27  ;;  %v3815_v27 = vld [vmem:[%s4642_s27 + $0x168] sm:$0xff] }
 0x125   :  { %v224_v29 = vmul.f32 0.5, %v223_v28  ;;  %v384_v28 = vpop.permute.xlu0 %383 }
 0x127   :  { %v4780_v30 = vmul.f32 %v224_v29, %v216_v22  ;;  %v890_v22 = vld [vmem:[%s4647_s4] sm:$0xff]  ;;  %v296_v29 = vpop.permute.xlu1 %295 }
 0x129   :  { %261 = vrot.lane.b32.xlu0 %v4780_v30, %s4545_s0  ;;  %244 = vrot.lane.b32.xlu1 %v4780_v30, %s4546_s5 }
 0x12d   :  { %328 = vrot.lane.b32.xlu0 %v4780_v30, %s4547_s9  ;;  %299 = vrot.lane.b32.xlu1 %v4780_v30, %s4548_s13 }
 0x131   :  { %368 = vrot.lane.b32.xlu0 %v4780_v30, %s4549_s29  ;;  %280 = vrot.lane.b32.xlu1 %v4780_v30, %s4550_s15 }
 0x135   :  { %412 = vperm.xlu0 %4328, %v243_v33   ;;  %348 = vrot.lane.b32.xlu1 %v4780_v30, %s4551_s16  ;;  %v918_v33 = vld [vmem:[%s4642_s27 + $0x20] sm:$0xff] }
 0x139   :  { %575 = vperm.xlu0 %4328, %v424_v35   ;;  %388 = vrot.lane.b32.xlu1 %v4780_v30, %s4552_s3  ;;  %v891_v35 = vld [vmem:[%s4647_s4 + $0x8] sm:$0xff] }
 0x13d   :  { %748 = vperm.xlu0 %4328, %v739_v37   ;;  %517 = vperm.xlu1 %4329, %v422_v38   ;;  %v3780_v37 = vld [vmem:[%s4642_s27 + $0x50] sm:$0xff]  ;;  %v3821_v38 = vld [vmem:[%s4642_s27 + $0x198] sm:$0xff] }
 0x141   :  { %758 = vperm.xlu0 %4328, %v741_v40   ;;  %683 = vperm.xlu1 %4329, %v679_v41   ;;  %v404_v40 = vpop.permute.xlu0 %403  ;;  %v364_v41 = vpop.permute.xlu1 %363 }
 0x145   :  { %768 = vperm.xlu0 %4328, %v743_v43   ;;  %753 = vperm.xlu1 %4329, %v740_v44   ;;  %v3792_v43 = vld [vmem:[%s4642_s27 + $0xb0] sm:$0xff]  ;;  %v919_v44 = vld [vmem:[%s4642_s27 + $0x28] sm:$0xff] }
 0x149   :  { %922 = vperm.xlu0 %4328, %v914_v46   ;;  %763 = vperm.xlu1 %4329, %v742_v47  }
 0x14d   :  { %983 = vperm.xlu0 %4328, %v3776_v49   ;;  %773 = vperm.xlu1 %4329, %v744_v50   ;;  %v3798_v49 = vld [vmem:[%s4642_s27 + $0xe0] sm:$0xff]  ;;  %v3781_v50 = vld [vmem:[%s4642_s27 + $0x58] sm:$0xff] }
 0x151   :  { %1105 = vperm.xlu0 %4328, %v3788_v51   ;;  %927 = vperm.xlu1 %4329, %v915_v52   ;;  %v4901_v52 = vld [vmem:[%s4587_s25 + $0x3] ss:$0 sm:$0xff] }
 0x155   :  { %1154 = vperm.xlu0 %4328, %v3794_v53   ;;  %988 = vperm.xlu1 %4329, %v3777_v54   ;;  %v4904_v54 = vld [vmem:[%s4587_s25 + $0x1] ss:$0 sm:$0xff] }
 0x159   :  { %1044 = vperm.xlu0 %4328, %v3782_v55   ;;  %1110 = vperm.xlu1 %4329, %v3789_v56   ;;  %v4907_v55 = vld [vmem:[%s4587_s25] ss:$0 sm:$0xff] }
 0x15d   :  { %1221 = vperm.xlu0 %4328, %v3800_v57   ;;  %1159 = vperm.xlu1 %4329, %v3795_v58   ;;  %v3786_v57 = vld [vmem:[%s4642_s27 + $0x80] sm:$0xff]  ;;  %v3793_v58 = vld [vmem:[%s4642_s27 + $0xb8] sm:$0xff] }
 0x161   :  { %1288 = vperm.xlu0 %4328, %v3806_v59   ;;  %1049 = vperm.xlu1 %4329, %v3783_v60   ;;  %v4913_v59 = vld [vmem:[%s4587_s25 + $0x7] ss:$0 sm:$0xff] }
 0x165   :  { %1355 = vperm.xlu0 %4328, %v3812_v61   ;;  %1226 = vperm.xlu1 %4329, %v3801_v62   ;;  %v4916_v61 = vld [vmem:[%s4587_s25 + $0x2] ss:$0 sm:$0xff] }
 0x169   :  { %1422 = vperm.xlu0 %4328, %v3818_v63   ;;  %1293 = vperm.xlu1 %4329, %v3807_v0  }
 0x16d   :  { %932 = vperm.xlu0 %4328, %v916_v1   ;;  %1360 = vperm.xlu1 %4329, %v3813_v3   ;;  %v4921_v1 = vld [vmem:[%s4587_s25 + $0x5] ss:$0 sm:$0xff]  ;;  %v4924_v3 = vld [vmem:[%s4587_s25 + $0x6] ss:$0 sm:$0xff] }
 0x171   :  { %993 = vperm.xlu0 %4328, %v3778_v4   ;;  %1427 = vperm.xlu1 %4329, %v3819_v5  }
 0x175   :  { %1115 = vperm.xlu0 %4328, %v3790_v6   ;;  %937 = vperm.xlu1 %4329, %v917_v7   ;;  %v3804_v7 = vld [vmem:[%s4642_s27 + $0x110] sm:$0xff] }
 0x179   :  { %1164 = vperm.xlu0 %4328, %v3796_v9   ;;  %998 = vperm.xlu1 %4329, %v3779_v10   ;;  %v3799_v9 = vld [vmem:[%s4642_s27 + $0xe8] sm:$0xff] }
 0x17d   :  { %1054 = vperm.xlu0 %4328, %v3784_v11   ;;  %1120 = vperm.xlu1 %4329, %v3791_v12  }
 0x181   :  { %1231 = vperm.xlu0 %4328, %v3802_v13   ;;  %1169 = vperm.xlu1 %4329, %v3797_v14  }
 0x185   :  { %1298 = vperm.xlu0 %4328, %v3808_v16   ;;  %1059 = vperm.xlu1 %4329, %v3785_v17   ;;  %v326_v16 = vmul.f32 %v4880_v18, %v4780_v30  ;;  %v4937_v17 = vld [vmem:[%s4587_s25 + $0x8] ss:$0 sm:$0xff] }
 0x189   :  { %1365 = vperm.xlu0 %4328, %v3814_v20   ;;  %1236 = vperm.xlu1 %4329, %v3803_v21  }
 0x18d   :  { %1476 = vperm.xlu0 %4328, %v890_v22   ;;  %1303 = vperm.xlu1 %4329, %v3809_v23  }
 0x191   :  { %1432 = vperm.xlu0 %4328, %v3820_v26   ;;  %1370 = vperm.xlu1 %4329, %v3815_v27  }
 0x195   :  { %942 = vperm.xlu0 %4328, %v918_v33   ;;  %1481 = vperm.xlu1 %4329, %v891_v35  }
 0x199   :  { %1003 = vperm.xlu0 %4328, %v3780_v37   ;;  %1437 = vperm.xlu1 %4329, %v3821_v38   ;;  %v3805_v38 = vld [vmem:[%s4642_s27 + $0x118] sm:$0xff] }
 0x19b   :  { %v262_v46 = vpop.permute.xlu0 %261  ;;  %v245_v47 = vpop.permute.xlu1 %244 }
 0x19c   :  { %v271_v63 = vmul.f32 %v4904_v54, %v262_v46  ;;  %v253_v0 = vmul.f32 %v4907_v55, %v245_v47  ;;  %v3811_v46 = vld [vmem:[%s4642_s27 + $0x148] sm:$0xff] }
 0x19d   :  { %1125 = vperm.xlu0 %4328, %v3792_v43   ;;  %947 = vperm.xlu1 %4329, %v919_v44   ;;  %v892_v44 = vld [vmem:[%s4647_s4 + $0x10] sm:$0xff] }
 0x19e   :  { %v279_v11 = vmul.f32 %v4882_v19, %v271_v63  ;;  %v260_v12 = vmul.f32 %v4876_v15, %v253_v0  ;;  %v3810_v19 = vld [vmem:[%s4642_s27 + $0x140] sm:$0xff] }
 0x19f   :  { %v329_v51 = vpop.permute.xlu0 %328  ;;  %v300_v53 = vpop.permute.xlu1 %299 }
 0x1a0   :  { %v309_v56 = vmul.f32 %v4901_v52, %v300_v53  ;;  %v338_v13 = vmul.f32 %v4921_v1, %v329_v51  ;;  %v327_v26 = vadd.f32 %v326_v16, %v279_v11  ;;  %v3822_v51 = vld [vmem:[%s4642_s27 + $0x1a0] sm:$0xff]  ;;  %v3817_v53 = vld [vmem:[%s4642_s27 + $0x178] sm:$0xff] }
 0x1a1   :  { %1174 = vperm.xlu0 %4328, %v3798_v49   ;;  %1008 = vperm.xlu1 %4329, %v3781_v50  }
 0x1a2   :  { %v317_v4 = vmul.f32 %v315_v25, %v309_v56  ;;  %v3787_v25 = vld [vmem:[%s4642_s27 + $0x88] sm:$0xff]  ;;  %v346_v27 = vmul.f32 %v4888_v24, %v338_v13 }
 0x1a3   :  { %v369_v60 = vpop.permute.xlu0 %368  ;;  %v281_v62 = vpop.permute.xlu1 %280  ;;  %v3823_v56 = vld [vmem:[%s4642_s27 + $0x1a8] sm:$0xff] }
 0x1a4   :  { %v378_v5 = vmul.f32 %v4913_v59, %v369_v60  ;;  %v290_v6 = vmul.f32 %v4916_v61, %v281_v62  ;;  %v318_v20 = vadd.f32 %v317_v4, %v260_v12 }
 0x1a5   :  { %1064 = vperm.xlu0 %4328, %v3786_v57   ;;  %1130 = vperm.xlu1 %4329, %v3793_v58  }
 0x1a6   :  { %v386_v21 = vmul.f32 %v384_v28, %v378_v5  ;;  %v298_v22 = vmul.f32 %v296_v29, %v290_v6  ;;  %v3816_v29 = vld [vmem:[%s4642_s27 + $0x170] sm:$0xff]  ;;  %s6165_s27 = sld [smem:[#allocation12_spill]] }
 0x1a7   :  { %v349_v10 = vpop.permute.xlu1 %348 }
 0x1a8   :  { %v358_v14 = vmul.f32 %v4924_v3, %v349_v10  ;;  %v387_v35 = vadd.f32 %v386_v21, %v327_v26  ;;  %v347_v37 = vadd.f32 %v346_v27, %v298_v22  ;;  %v423_v27 = vld [vmem:[%s6136_s14] sm:$0xf] }
 0x1a9   :  { %1241 = vperm.xlu0 %4328, %v3804_v7   ;;  %1179 = vperm.xlu1 %4329, %v3799_v9   ;;  %v421_v9 = vld [vmem:[%s4602_s8] sm:$0x1]  ;;  %s6139_s8 = sld [smem:[#allocation7_spill]] }
 0x1aa   :  { %v366_v23 = vmul.f32 %v364_v41, %v358_v14 }
 0x1ab   :  { %v389_v15 = vpop.permute.xlu1 %388 }
 0x1ac   :  { %v367_v33 = vadd.f32 %v366_v23, %v318_v20  ;;  %v398_v18 = vmul.f32 %v4937_v17, %v389_v15 }
 0x1ad   :  { %1308 = vperm.xlu0 %4328, %v3810_v19   ;;  %1069 = vperm.xlu1 %4329, %v3787_v25  }
 0x1ae   :  { %v406_v28 = vmul.f32 %v404_v40, %v398_v18  ;;  %v408_v43 = vadd.f32 %v387_v35, %v367_v33  ;;  %v893_v40 = vld [vmem:[%s4647_s4 + $0x18] sm:$0xff]  ;;  %v242_v33 = vld [vmem:[%s6137_s24] sm:$0x1] }
 0x1af   :  { %v4967_v18 = vsel %vm582_vm5, %v242_v33, 0 }
 0x1b0   :  { %v407_v41 = vadd.f32 %v406_v28, %v347_v37  ;;  %v413_v47 = vpop.permute.xlu0 %412  ;;  %6138 = vst [vmem:[#allocation26_spill] sm:$0xff] %v4967_v18 }
 0x1b1   :  { %1375 = vperm.xlu0 %4328, %v3816_v29   ;;  %1246 = vperm.xlu1 %4329, %v3805_v38  }
 0x1b2   :  { %v409_v24 = vadd.f32 %v408_v43, %v407_v41 }
 0x1b4   :  { %v415_v49 = vadd.f32 %v413_v47, %v409_v24  ;;  %v576_v35 = vpop.permute.xlu0 %575 }
 0x1b5   :  { %1486 = vperm.xlu0 %4328, %v892_v44   ;;  %1313 = vperm.xlu1 %4329, %v3811_v46  }
 0x1b6   :  { %v416_v50 = vmul.f32 0.5, %v415_v49 }
 0x1b8   :  { %4372 = vtanh.f32 %v416_v50  ;;  %v518_v11 = vpop.permute.xlu1 %517 }
 0x1b9   :  { %1442 = vperm.xlu0 %4328, %v3822_v51   ;;  %1380 = vperm.xlu1 %4329, %v3817_v53  }
 0x1bd   :  { %1491 = vperm.xlu1 %4329, %v893_v40  }
 0x1c1   :  { %1447 = vperm.xlu1 %4329, %v3823_v56  }
 0x1c5   :  { %v4373_v57 = vpop.eup %4372 }
 0x1c6   :  { %v418_v58 = vadd.f32 1.0, %v4373_v57 }
 0x1c8   :  { %v419_v60 = vmul.f32 0.5, %v418_v58  ;;  %v678_v58 = vld [vmem:[%s6139_s8] sm:$0xf] }
 0x1ca   :  { %v420_v62 = vmul.f32 %v419_v60, %v415_v49 }
 0x1cc   :  { %v425_v63 = vpack.c.bf16 %v420_v62, %v420_v62 }
 0x1ce   :  { %4047 = vmatmul.mubr.bf16.vlgmr.msra.gmra.mxu1 %v425_v63  ;;  %v4338_v63 = vld [vmem:[%s6140_s6] sm:$0xff]  }
 0x1cf   :  { %4076 = vmatprep.mubr.msk.bf16.mxu1 %vm4543_vm2, %v6104_v2 }
 0x28e   :  { %v508_v0 = vpop.f32.mrf.mxu1 }
 0x28f   :  { %v514_v4 = vpack.c.bf16 %v508_v0, %v508_v0  ;;  %v749_v0 = vpop.permute.xlu0 %748 }
 0x290   :  { %v4048_v5 = vpop.f32.mrf.mxu1 }
 0x291   :  { %v525_v6 = vsel %vm174_vm0, %v514_v4, 0 }
 0x292   :  { %v511_v7 = vpop.f32.mrf.mxu1  ;;  %4051 = vmatpush3.bf16.msra.mxu0 %v525_v6 }
 0x293   :  { %4056 = vmatprep.subr.bf16.mxu0 %v6104_v2  ;;  %v759_v5 = vpop.permute.xlu0 %758 }
 0x294   :  { %v4049_v10 = vpop.f32.mrf.mxu1 }
 0x295   :  { %4053 = vmatmul.mubr.msk.bf16.vlgmr.msra.gmra.mxu0 %vm520_vm4, %v421_v9 }
 0x296   :  { %4058 = vmatprep.mubr.msk.bf16.mxu0 %vm4543_vm2, %v6104_v2 }
 0x297   :  { %v5015_v7 = vpop.permute.xlu0 %768 }
 0x29b   :  { %v5019_v10 = vpop.permute.xlu0 %922 }
 0x355   :  { %v561_v12 = vpop.f32.mrf.mxu0 }
 0x356   :  { %v562_v13 = vadd.f32 %v561_v12, %v518_v11  ;;  %v5023_v12 = vpop.permute.xlu0 %983 }
 0x357   :  { %v4054_v14 = vpop.f32.mrf.mxu0 }
 0x358   :  { %v567_v16 = vmul.f32 0.5, %v562_v13 }
 0x359   :  { %v564_v20 = vpop.f32.mrf.mxu0 }
 0x35a   :  { %4374 = vtanh.f32 %v567_v16  ;;  %v5027_v14 = vpop.permute.xlu0 %1105 }
 0x35b   :  { %v4055_v21 = vpop.f32.mrf.mxu0 }
 0x35e   :  { %v5031_v20 = vpop.permute.xlu0 %1154 }
 0x367   :  { %v4375_v22 = vpop.eup %4374 }
 0x368   :  { %v569_v23 = vadd.f32 1.0, %v4375_v22  ;;  %v5035_v22 = vpop.permute.xlu0 %1044 }
 0x36a   :  { %v570_v19 = vmul.f32 0.5, %v569_v23 }
 0x36c   :  { %v571_v25 = vmul.f32 %v570_v19, %v562_v13  ;;  %v5039_v19 = vpop.permute.xlu0 %1221 }
 0x36e   :  { %v572_v15 = vpack.c.bf16 %v571_v25, %v571_v25 }
 0x370   :  { %v584_v26 = vsel %vm582_vm5, %v572_v15, 0  ;;  %v5043_v33 = vpop.permute.xlu0 %1288 }
 0x371   :  { %4057 = vmatpush3.bf16.msra.mxu0 %v584_v26 }
 0x372   :  { %4062 = vmatprep.subr.bf16.mxu0 %v6104_v2 }
 0x374   :  { %4059 = vmatmul.mubr.msk.bf16.vlgmr.msra.gmra.mxu0 %vm578_vm6, %v423_v27 }
 0x375   :  { %4064 = vmatprep.mubr.msk.bf16.mxu0 %vm4543_vm2, %v6104_v2  ;;  %4063 = vmatpush3.bf16.msra.mxu0 %v4967_v18  ;;  %v1950_v18 = vld [vmem:[%s6170_s18 + $0x28] sm:$0xff] }
 0x376   :  { %4068 = vmatprep.subr.bf16.mxu0 %v6104_v2 }
 0x434   :  { %v620_v37 = vpop.f32.mrf.mxu0 }
 0x435   :  { %v621_v28 = vadd.f32 %v620_v37, %v576_v35 }
 0x436   :  { %v4060_v29 = vpop.f32.mrf.mxu0 }
 0x437   :  { %v626_v38 = vmul.f32 0.5, %v621_v28 }
 0x438   :  { %v623_v41 = vpop.f32.mrf.mxu0 }
 0x439   :  { %4376 = vtanh.f32 %v626_v38 }
 0x43a   :  { %v4061_v43 = vpop.f32.mrf.mxu0 }
 0x446   :  { %v4377_v24 = vpop.eup %4376 }
 0x447   :  { %v628_v44 = vadd.f32 1.0, %v4377_v24  ;;  %v5047_v24 = vpop.permute.xlu0 %1355 }
 0x449   :  { %v629_v46 = vmul.f32 0.5, %v628_v44 }
 0x44b   :  { %v630_v47 = vpack.c.bf16 %v629_v46, %v629_v46 }
 0x44d   :  { %4065 = vmatmul.mubr.msk.bf16.vlgmr.msra.gmra.mxu0 %vm578_vm6, %v630_v47 }
 0x44e   :  { %4070 = vmatprep.mubr.msk.bf16.mxu0 %vm4543_vm2, %v6104_v2 }
 0x50d   :  { %v671_v49 = vpop.f32.mrf.mxu0 }
 0x50e   :  { %v677_v50 = vmul.f32 %v671_v49, %v420_v62 }
 0x50f   :  { %v4066_v51 = vpop.f32.mrf.mxu0 }
 0x510   :  { %v680_v53 = vpack.c.bf16 %v677_v50, %v677_v50  ;;  %v5051_v50 = vpop.permute.xlu0 %1422 }
 0x511   :  { %v674_v40 = vpop.f32.mrf.mxu0 }
 0x512   :  { %v690_v56 = vsel %vm174_vm0, %v680_v53, 0 }
 0x513   :  { %v4067_v57 = vpop.f32.mrf.mxu0  ;;  %4069 = vmatpush3.bf16.msra.mxu0 %v690_v56 }
 0x514   :  { %4088 = vmatprep.subr.bf16.mxu0 %v6104_v2 }
 0x516   :  { %4071 = vmatmul.mubr.msk.bf16.vlgmr.msra.gmra.mxu0 %vm520_vm4, %v678_v58 }
 0x517   :  { %4089 = vmatpush3.bf16.msra.mxu0 %v4791_v31  ;;  %4104 = vmatprep.mubr.msk.bf16.mxu0 %vm4543_vm2, %v6104_v2  ;;  %v684_v31 = vpop.permute.xlu1 %683 }
 0x518   :  { %4090 = vmatprep.subr.bf16.mxu0 %v6104_v2 }
 0x51b   :  { %4091 = vmatpush3.bf16.msra.mxu0 %v4800_v32  ;;  %v754_v4 = vpop.permute.xlu1 %753 }
 0x51c   :  { %4092 = vmatprep.subr.bf16.mxu0 %v6104_v2 }
 0x51f   :  { %4093 = vmatpush3.bf16.msra.mxu0 %v4808_v34  ;;  %v764_v6 = vpop.permute.xlu1 %763 }
 0x520   :  { %4094 = vmatprep.subr.bf16.mxu0 %v6104_v2 }
 0x523   :  { %4095 = vmatpush3.bf16.msra.mxu0 %v4816_v36  ;;  %v5017_v9 = vpop.permute.xlu1 %773 }
 0x524   :  { %4096 = vmatprep.subr.bf16.mxu0 %v6104_v2 }
 0x527   :  { %4097 = vmatpush3.bf16.msra.mxu0 %v4823_v39  ;;  %v5021_v11 = vpop.permute.xlu1 %927 }
 0x528   :  { %4098 = vmatprep.subr.bf16.mxu0 %v6104_v2 }
 0x52b   :  { %4099 = vmatpush3.bf16.msra.mxu0 %v4830_v42  ;;  %v5025_v13 = vpop.permute.xlu1 %988 }
 0x52c   :  { %4100 = vmatprep.subr.bf16.mxu0 %v6104_v2 }
 0x52f   :  { %4101 = vmatpush3.bf16.msra.mxu0 %v4837_v45  ;;  %v5029_v16 = vpop.permute.xlu1 %1110 }
 0x530   :  { %4102 = vmatprep.subr.bf16.mxu0 %v6104_v2 }
 0x533   :  { %4103 = vmatpush3.bf16.msra.mxu0 %v4844_v48  ;;  %v4339_v48 = vld [vmem:[%s6140_s6 + $0x8] sm:$0xff]   ;;  %v5033_v21 = vpop.permute.xlu1 %1159 }
 0x534   :  { %4140 = vmatprep.subr.bf16.mxu0 %v6104_v2 }
 0x537   :  { %v5037_v23 = vpop.permute.xlu1 %1049 }
 0x53b   :  { %v5041_v15 = vpop.permute.xlu1 %1226 }
 0x53f   :  { %v5045_v38 = vpop.permute.xlu1 %1293 }
 0x543   :  { %v5049_v47 = vpop.permute.xlu1 %1360 }
 0x547   :  { %v5053_v56 = vpop.permute.xlu1 %1427 }
 0x5d6   :  { %v726_v32 = vpop.f32.mrf.mxu0 }
 0x5d7   :  { %v727_v34 = vadd.f32 %v726_v32, %v684_v31  ;;  %v5055_v31 = vpop.permute.xlu0 %932 }
 0x5d8   :  { %v4072_v36 = vpop.f32.mrf.mxu0 }
 0x5d9   :  { %v4997_v39 = vadd.f32 %v727_v34, %v4780_v30  ;;  %v4340_v30 = vld [vmem:[%s6140_s6 + $0x10] sm:$0xff]  }
 0x5da   :  { %v729_v42 = vpop.f32.mrf.mxu0 }
 0x5db   :  { %6141 = vst [vmem:[#allocation27_spill] sm:$0xff] %v4997_v39  ;;  %v745_v60 = vpack.c.bf16 %v4997_v39, %v4997_v39 }
 0x5dc   :  { %v4073_v45 = vpop.f32.mrf.mxu0 }
 0x5dd   :  { %v801_v62 = vsel %vm174_vm0, %v745_v60, 0 }
 0x5de   :  { %4075 = vmatpush3.bf16.msra.mxu1 %v801_v62  ;;  %v5059_v62 = vpop.permute.xlu1 %937 }
 0x5df   :  { %4116 = vmatprep.subr.bf16.mxu1 %v6104_v2 }
 0x5e1   :  { %4077 = vmatmul.mubr.msk.bf16.vlgmr.msra.gmra.mxu1 %vm520_vm4, %v4338_v63 }
 0x5e2   :  { %4080 = vmatprep.mubr.msk.bf16.mxu1 %vm4543_vm2, %v6104_v2 }
 0x5e9   :  { %4081 = vmatmul.mubr.msk.bf16.gmra.mxu1 %vm520_vm4, %v4339_v48  ;;  %v5063_v48 = vpop.permute.xlu0 %993 }
 0x5ea   :  { %4084 = vmatprep.mubr.msk.bf16.mxu1 %vm4543_vm2, %v6104_v2 }
 0x5f1   :  { %4085 = vmatmul.mubr.msk.bf16.gmra.mxu1 %vm520_vm4, %v4340_v30 }
 0x5f2   :  { %4122 = vmatprep.mubr.msk.bf16.mxu1 %vm4543_vm2, %v6104_v2 }
 0x6a1   :  { %v837_v25 = vpop.f32.mrf.mxu1 }
 0x6a2   :  { %v838_v26 = vadd.f32 %v837_v25, %v749_v0  ;;  %v5071_v25 = vpop.permute.xlu1 %998 }
 0x6a3   :  { %v4078_v27 = vpop.f32.mrf.mxu1 }
 0x6a4   :  { %v860_v35 = vmul.f32 0.5, %v838_v26 }
 0x6a5   :  { %v840_v37 = vpop.f32.mrf.mxu1 }
 0x6a6   :  { %4378 = vtanh.f32 %v860_v35  ;;  %v841_v28 = vadd.f32 %v840_v37, %v754_v4 }
 0x6a7   :  { %v4079_v29 = vpop.f32.mrf.mxu1 }
 0x6a8   :  { %v861_v41 = vmul.f32 0.5, %v841_v28 }
 0x6a9   :  { %v845_v43 = vpop.f32.mrf.mxu1 }
 0x6aa   :  { %4380 = vtanh.f32 %v861_v41  ;;  %v846_v45 = vadd.f32 %v845_v43, %v759_v5 }
 0x6ab   :  { %v4082_v44 = vpop.f32.mrf.mxu1 }
 0x6ac   :  { %v862_v0 = vmul.f32 0.5, %v846_v45 }
 0x6ad   :  { %v848_v46 = vpop.f32.mrf.mxu1 }
 0x6ae   :  { %v849_v4 = vadd.f32 %v848_v46, %v764_v6  ;;  %4382 = vtanh.f32 %v862_v0  ;;  %v5079_v6 = vpop.permute.xlu1 %1120 }
 0x6af   :  { %v4083_v49 = vpop.f32.mrf.mxu1  ;;  %6142 = vst [vmem:[#allocation28_spill] sm:$0xff] %v5079_v6 }
 0x6b0   :  { %v863_v5 = vmul.f32 0.5, %v849_v4 }
 0x6b1   :  { %v853_v51 = vpop.f32.mrf.mxu1 }
 0x6b2   :  { %4384 = vtanh.f32 %v863_v5  ;;  %v5091_v35 = vpop.permute.xlu1 %1169 }
 0x6b3   :  { %v4379_v53 = vpop.eup %4378  ;;  %v4086_v40 = vpop.f32.mrf.mxu1 }
 0x6b4   :  { %v872_v57 = vadd.f32 1.0, %v4379_v53 }
 0x6b5   :  { %v856_v58 = vpop.f32.mrf.mxu1 }
 0x6b6   :  { %v878_v32 = vmul.f32 0.5, %v872_v57  ;;  %v5099_v43 = vpop.permute.xlu1 %1059 }
 0x6b7   :  { %v4381_v34 = vpop.eup %4380  ;;  %v4087_v36 = vpop.f32.mrf.mxu1  ;;  %6144 = vst [vmem:[#allocation30_spill] sm:$0xff] %v5099_v43 }
 0x6b8   :  { %v5057_v42 = vmul.f32 %v878_v32, %v838_v26  ;;  %v873_v60 = vadd.f32 1.0, %v4381_v34  ;;  %v5073_v26 = vpop.permute.xlu0 %1115  ;;  %v854_v32 = vadd.f32 %v853_v51, %v5015_v7 }
 0x6ba   :  { %v879_v63 = vmul.f32 0.5, %v873_v60  ;;  %896 = vrot.lane.b32.xlu0 %v5057_v42, %s4546_s5  ;;  %v5111_v53 = vpop.permute.xlu1 %1236  ;;  %v864_v60 = vmul.f32 0.5, %v854_v32 }
 0x6bb   :  { %v4383_v37 = vpop.eup %4382  ;;  %6145 = vst [vmem:[#allocation31_spill] sm:$0xff] %v5111_v53 }
 0x6bc   :  { %v5065_v30 = vmul.f32 %v879_v63, %v841_v28  ;;  %v5085_v27 = vpop.permute.xlu0 %1164  ;;  %v874_v29 = vadd.f32 1.0, %v4383_v37  ;;  %v857_v63 = vadd.f32 %v856_v58, %v5017_v9  ;;  %4386 = vtanh.f32 %v864_v60 }
 0x6be   :  { %956 = vrot.lane.b32.xlu0 %v5057_v42, %s4545_s0  ;;  %898 = vrot.lane.b32.xlu1 %v5065_v30, %s4546_s5  ;;  %v880_v46 = vmul.f32 0.5, %v874_v29  ;;  %v5125_v0 = vpop.permute.xlu1 %1303  ;;  %v865_v51 = vmul.f32 0.5, %v857_v63 }
 0x6bf   :  { %v4385_v41 = vpop.eup %4384  ;;  %6146 = vst [vmem:[#allocation32_spill] sm:$0xff] %v5125_v0 }
 0x6c0   :  { %v5093_v28 = vpop.permute.xlu0 %1054  ;;  %v875_v49 = vadd.f32 1.0, %v4385_v41  ;;  %v5113_v40 = vmul.f32 %v880_v46, %v846_v45  ;;  %4388 = vtanh.f32 %v865_v51 }
 0x6c1   :  { %6143 = vst [vmem:[#allocation29_spill] sm:$0xff] %v5093_v28  ;;  %v1182_v28 = vmul.f32 %v5031_v20, %v5057_v42 }
 0x6c2   :  { %1078 = vrot.lane.b32.xlu0 %v5057_v42, %s4548_s13  ;;  %958 = vrot.lane.b32.xlu1 %v5065_v30, %s4545_s0  ;;  %v881_v57 = vmul.f32 0.5, %v875_v49  ;;  %v5137_v45 = vpop.permute.xlu1 %1370 }
 0x6c3   :  { %6148 = vst [vmem:[#allocation34_spill] sm:$0xff] %v5137_v45 }
 0x6c4   :  { %v5105_v44 = vpop.permute.xlu0 %1231  ;;  %v5122_v36 = vmul.f32 %v881_v57, %v849_v4 }
 0x6c6   :  { %1017 = vrot.lane.b32.xlu0 %v5057_v42, %s4550_s15  ;;  %1080 = vrot.lane.b32.xlu1 %v5065_v30, %s4548_s13  ;;  %v5145_v58 = vpop.permute.xlu1 %1481 }
 0x6c8   :  { %v5116_v34 = vpop.permute.xlu0 %1298 }
 0x6c9   :  { %v4387_v5 = vpop.eup %4386 }
 0x6ca   :  { %1194 = vrot.lane.b32.xlu0 %v5057_v42, %s4547_s9  ;;  %1019 = vrot.lane.b32.xlu1 %v5065_v30, %s4550_s15  ;;  %v5157_v37 = vpop.permute.xlu1 %1437  ;;  %v876_v29 = vadd.f32 1.0, %v4387_v5 }
 0x6cb   :  { %6150 = vst [vmem:[#allocation36_spill] sm:$0xff] %v5157_v37 }
 0x6cc   :  { %v5131_v7 = vpop.permute.xlu0 %1365  ;;  %v882_v49 = vmul.f32 0.5, %v876_v29 }
 0x6cd   :  { %6147 = vst [vmem:[#allocation33_spill] sm:$0xff] %v5131_v7  ;;  %v4389_v41 = vpop.eup %4388 }
 0x6ce   :  { %1261 = vrot.lane.b32.xlu0 %v5057_v42, %s4551_s16  ;;  %1196 = vrot.lane.b32.xlu1 %v5065_v30, %s4547_s9  ;;  %v877_v57 = vadd.f32 1.0, %v4389_v41  ;;  %v5165_v60 = vpop.permute.xlu1 %947  ;;  %v5173_v5 = vmul.f32 %v882_v49, %v854_v32 }
 0x6cf   :  { %6152 = vst [vmem:[#allocation38_spill] sm:$0xff] %v5165_v60 }
 0x6d0   :  { %v5139_v9 = vpop.permute.xlu0 %1476  ;;  %6154 = vst [vmem:[#allocation40_spill] sm:$0xff] %v5173_v5  ;;  %v883_v8 = vmul.f32 0.5, %v877_v57 }
 0x6d2   :  { %1328 = vrot.lane.b32.xlu0 %v5057_v42, %s4549_s29  ;;  %1263 = vrot.lane.b32.xlu1 %v5065_v30, %s4551_s16  ;;  %v5179_v29 = vpop.permute.xlu1 %1008  ;;  %v5181_v41 = vmul.f32 %v883_v8, %v857_v63 }
 0x6d3   :  { %6155 = vst [vmem:[#allocation41_spill] sm:$0xff] %v5179_v29  ;;  %v1541_v29 = vld [vmem:[%s6162_s20] sm:$0x3] }
 0x6d4   :  { %v5151_v4 = vpop.permute.xlu0 %1432  ;;  %6156 = vst [vmem:[#allocation42_spill] sm:$0xff] %v5181_v41 }
 0x6d5   :  { %6149 = vst [vmem:[#allocation35_spill] sm:$0xff] %v5151_v4 }
 0x6d6   :  { %1395 = vrot.lane.b32.xlu0 %v5057_v42, %s4552_s3  ;;  %1330 = vrot.lane.b32.xlu1 %v5065_v30, %s4549_s29  ;;  %v5189_v32 = vpop.permute.xlu1 %1130 }
 0x6d7   :  { %6158 = vst [vmem:[#allocation44_spill] sm:$0xff] %v5189_v32 }
 0x6d8   :  { %v5159_v46 = vpop.permute.xlu0 %942 }
 0x6d9   :  { %6151 = vst [vmem:[#allocation37_spill] sm:$0xff] %v5159_v46 }
 0x6da   :  { %1397 = vrot.lane.b32.xlu1 %v5065_v30, %s4552_s3  ;;  %900 = vrot.lane.b32.xlu0 %v5113_v40, %s4546_s5  ;;  %v5201_v8 = vpop.permute.xlu1 %1179 }
 0x6db   :  { %6160 = vst [vmem:[#allocation46_spill] sm:$0xff] %v5201_v8 }
 0x6dc   :  { %v5171_v51 = vpop.permute.xlu0 %1003 }
 0x6dd   :  { %6153 = vst [vmem:[#allocation39_spill] sm:$0xff] %v5171_v51 }
 0x6de   :  { %960 = vrot.lane.b32.xlu0 %v5113_v40, %s4545_s0  ;;  %902 = vrot.lane.b32.xlu1 %v5122_v36, %s4546_s5  ;;  %v5209_v57 = vpop.permute.xlu1 %1069 }
 0x6df   :  { %6163 = vst [vmem:[#allocation48_spill] sm:$0xff] %v5209_v57  ;;  %v894_v57 = vld [vmem:[%s4647_s4 + $0x20] sm:$0xff] }
 0x6e0   :  { %v5183_v2 = vpop.permute.xlu0 %1125 }
 0x6e1   :  { %6157 = vst [vmem:[#allocation43_spill] sm:$0xff] %v5183_v2  ;;  %v1548_v2 = vld [vmem:[%s6165_s27] sm:$0xff] }
 0x6e2   :  { %1082 = vrot.lane.b32.xlu0 %v5113_v40, %s4548_s13  ;;  %962 = vrot.lane.b32.xlu1 %v5122_v36, %s4545_s0  ;;  %v5221_v60 = vpop.permute.xlu1 %1246 }
 0x6e3   :  { %6166 = vst [vmem:[#allocation50_spill] sm:$0xff] %v5221_v60  ;;  %v895_v60 = vld [vmem:[%s4647_s4 + $0x28] sm:$0xff]  ;;  %s6177_s4 = sld [smem:[#allocation17_spill]] }
 0x6e4   :  { %v5195_v49 = vpop.permute.xlu0 %1174 }
 0x6e5   :  { %6159 = vst [vmem:[#allocation45_spill] sm:$0xff] %v5195_v49  ;;  %v1886_v49 = vld [vmem:[%s6171_s22] sm:$0xff] }
 0x6e6   :  { %1021 = vrot.lane.b32.xlu0 %v5113_v40, %s4550_s15  ;;  %1084 = vrot.lane.b32.xlu1 %v5122_v36, %s4548_s13 }
 0x6e8   :  { %v5203_v63 = vpop.permute.xlu0 %1064 }
 0x6e9   :  { %6161 = vst [vmem:[#allocation47_spill] sm:$0xff] %v5203_v63  ;;  %v5230_v63 = vpop.permute.xlu1 %1313  ;;  %v2121_v37 = vld [vmem:[%s6177_s4 + $0x8] sm:$0xff]  ;;  %v3859_v6 = vld [vmem:[%s6177_s4 + $0xc0] sm:$0xff] }
 0x6ea   :  { %1198 = vrot.lane.b32.xlu0 %v5113_v40, %s4547_s9  ;;  %1023 = vrot.lane.b32.xlu1 %v5122_v36, %s4550_s15  ;;  %6168 = vst [vmem:[#allocation52_spill] sm:$0xff] %v5230_v63  ;;  %v1550_v63 = vld [vmem:[%s6165_s27 + $0x10] sm:$0xff] }
 0x6ec   :  { %v5215_v39 = vpop.permute.xlu0 %1241 }
 0x6ed   :  { %6164 = vst [vmem:[#allocation49_spill] sm:$0xff] %v5215_v39  ;;  %v1549_v39 = vld [vmem:[%s6165_s27 + $0x8] sm:$0xff]  ;;  %v5240_v46 = vpop.permute.xlu1 %1380 }
 0x6ee   :  { %1265 = vrot.lane.b32.xlu0 %v5113_v40, %s4551_s16  ;;  %1200 = vrot.lane.b32.xlu1 %v5122_v36, %s4547_s9  ;;  %6172 = vst [vmem:[#allocation54_spill] sm:$0xff] %v5240_v46  ;;  %v1945_v46 = vld [vmem:[%s6170_s18] sm:$0xff] }
 0x6f0   :  { %v5223_v32 = vpop.permute.xlu0 %1308 }
 0x6f1   :  { %6167 = vst [vmem:[#allocation51_spill] sm:$0xff] %v5223_v32 }
 0x6f2   :  { %1332 = vrot.lane.b32.xlu0 %v5113_v40, %s4549_s29  ;;  %1267 = vrot.lane.b32.xlu1 %v5122_v36, %s4551_s16 }
 0x6f4   :  { %v5236_v32 = vpop.permute.xlu0 %1375 }
 0x6f5   :  { %6169 = vst [vmem:[#allocation53_spill] sm:$0xff] %v5236_v32 }
 0x6f6   :  { %1399 = vrot.lane.b32.xlu0 %v5113_v40, %s4552_s3  ;;  %1334 = vrot.lane.b32.xlu1 %v5122_v36, %s4549_s29 }
 0x6f8   :  { %v5242_v8 = vpop.permute.xlu0 %1486 }
 0x6f9   :  { %6173 = vst [vmem:[#allocation55_spill] sm:$0xff] %v5242_v8  ;;  %v3841_v8 = vld [vmem:[%s6177_s4 + $0x30] sm:$0xff] }
 0x6fa   :  { %1401 = vrot.lane.b32.xlu1 %v5122_v36, %s4552_s3  ;;  %904 = vrot.lane.b32.xlu0 %v5173_v5, %s4546_s5 }
 0x6fc   :  { %v5250_v32 = vpop.permute.xlu0 %1442 }
 0x6fd   :  { %6175 = vst [vmem:[#allocation57_spill] sm:$0xff] %v5250_v32  ;;  %v1949_v32 = vld [vmem:[%s6170_s18 + $0x20] sm:$0xff] }
 0x6fe   :  { %964 = vrot.lane.b32.xlu0 %v5173_v5, %s4545_s0  ;;  %906 = vrot.lane.b32.xlu1 %v5181_v41, %s4546_s5 }
 0x702   :  { %1086 = vrot.lane.b32.xlu0 %v5173_v5, %s4548_s13  ;;  %966 = vrot.lane.b32.xlu1 %v5181_v41, %s4545_s0 }
 0x706   :  { %1025 = vrot.lane.b32.xlu0 %v5173_v5, %s4550_s15  ;;  %1088 = vrot.lane.b32.xlu1 %v5181_v41, %s4548_s13 }
 0x70a   :  { %1202 = vrot.lane.b32.xlu0 %v5173_v5, %s4547_s9  ;;  %1027 = vrot.lane.b32.xlu1 %v5181_v41, %s4550_s15 }
 0x70e   :  { %1269 = vrot.lane.b32.xlu0 %v5173_v5, %s4551_s16  ;;  %1204 = vrot.lane.b32.xlu1 %v5181_v41, %s4547_s9 }
 0x712   :  { %1336 = vrot.lane.b32.xlu0 %v5173_v5, %s4549_s29  ;;  %1271 = vrot.lane.b32.xlu1 %v5181_v41, %s4551_s16 }
 0x716   :  { %1403 = vrot.lane.b32.xlu0 %v5173_v5, %s4552_s3  ;;  %1338 = vrot.lane.b32.xlu1 %v5181_v41, %s4549_s29  ;;  %v1947_v5 = vld [vmem:[%s6170_s18 + $0x10] sm:$0xff] }
 0x71a   :  { %1496 = vperm.xlu0 %4328, %v894_v57   ;;  %1405 = vrot.lane.b32.xlu1 %v5181_v41, %s4552_s3  ;;  %v1551_v57 = vld [vmem:[%s6165_s27 + $0x18] sm:$0xff]  ;;  %v5246_v41 = vpop.permute.xlu1 %1491 }
 0x71b   :  { %6174 = vst [vmem:[#allocation56_spill] sm:$0xff] %v5246_v41 }
 0x71e   :  { %1619 = vperm.xlu0 %4328, %v1541_v29   ;;  %1501 = vperm.xlu1 %4329, %v895_v60   ;;  %v1553_v29 = vld [vmem:[%s6165_s27 + $0x28] sm:$0xff]  ;;  %v1552_v60 = vld [vmem:[%s6165_s27 + $0x20] sm:$0xff] }
 0x722   :  { %1679 = vperm.xlu0 %4328, %v1549_v39   ;;  %1674 = vperm.xlu1 %4329, %v1548_v2   ;;  %v5254_v39 = vpop.permute.xlu1 %1447 }
 0x723   :  { %6176 = vst [vmem:[#allocation58_spill] sm:$0xff] %v5254_v39  ;;  %v2120_v39 = vld [vmem:[%s6177_s4] sm:$0xff] }
 0x726   :  { %1689 = vperm.xlu0 %4328, %v1551_v57   ;;  %1684 = vperm.xlu1 %4329, %v1550_v63   ;;  %v1946_v57 = vld [vmem:[%s6170_s18 + $0x8] sm:$0xff] }
 0x72a   :  { %1699 = vperm.xlu0 %4328, %v1553_v29   ;;  %1694 = vperm.xlu1 %4329, %v1552_v60   ;;  %v1948_v29 = vld [vmem:[%s6170_s18 + $0x18] sm:$0xff] }
 0x72c   :  { %v897_v2 = vpop.permute.xlu0 %896 }
 0x72d   :  { %v908_v0 = vmul.f32 %v4907_v55, %v897_v2 }
 0x72e   :  { %1954 = vperm.xlu0 %4328, %v1945_v46   ;;  %1892 = vperm.xlu1 %4329, %v1886_v49  }
 0x730   :  { %v957_v63 = vpop.permute.xlu0 %956  ;;  %v899_v51 = vpop.permute.xlu1 %898 }
 0x731   :  { %v909_v7 = vmul.f32 %v4907_v55, %v899_v51 }
 0x732   :  { %1964 = vperm.xlu0 %4328, %v1947_v5   ;;  %1959 = vperm.xlu1 %4329, %v1946_v57   ;;  %v968_v5 = vmul.f32 %v4904_v54, %v957_v63  ;;  %v3853_v57 = vld [vmem:[%s6177_s4 + $0x90] sm:$0xff]  ;;  %v3854_v63 = vld [vmem:[%s6177_s4 + $0x98] sm:$0xff] }
 0x734   :  { %v1079_v60 = vpop.permute.xlu0 %1078  ;;  %v959_v41 = vpop.permute.xlu1 %958 }
 0x735   :  { %v1090_v53 = vmul.f32 %v4901_v52, %v1079_v60 }
 0x736   :  { %1974 = vperm.xlu0 %4328, %v1949_v32   ;;  %1969 = vperm.xlu1 %4329, %v1948_v29   ;;  %v3842_v32 = vld [vmem:[%s6177_s4 + $0x38] sm:$0xff] }
 0x738   :  { %v1018_v46 = vpop.permute.xlu0 %1017  ;;  %v1081_v49 = vpop.permute.xlu1 %1080 }
 0x739   :  { %v1029_v2 = vmul.f32 %v4916_v61, %v1018_v46  ;;  %v1091_v60 = vmul.f32 %v4901_v52, %v1081_v49 }
 0x73a   :  { %2128 = vperm.xlu0 %4328, %v2120_v39   ;;  %1979 = vperm.xlu1 %4329, %v1950_v18   ;;  %v969_v18 = vmul.f32 %v4904_v54, %v959_v41 }
 0x73c   :  { %v1195_v43 = vpop.permute.xlu0 %1194  ;;  %v1020_v45 = vpop.permute.xlu1 %1019  ;;  %v1012_v20 = vmul.f32 %v5025_v13, %v969_v18  ;;  %v1134_v13 = vmul.f32 %v5029_v16, %v1091_v60 }
 0x73d   :  { %v1206_v39 = vmul.f32 %v4921_v1, %v1195_v43 }
 0x73e   :  { %2189 = vperm.xlu0 %4328, %v3841_v8   ;;  %2133 = vperm.xlu1 %4329, %v2121_v37   ;;  %v1011_v8 = vmul.f32 %v5023_v12, %v968_v5  ;;  %v1133_v12 = vmul.f32 %v5027_v14, %v1090_v53  ;;  %v3847_v53 = vld [vmem:[%s6177_s4 + $0x60] sm:$0xff] }
 0x73f   :  { %v1249_v42 = vmul.f32 %v5039_v19, %v1206_v39  ;;  %v1030_v19 = vmul.f32 %v4916_v61, %v1020_v45 }
 0x740   :  { %v1262_v4 = vpop.permute.xlu0 %1261  ;;  %v1197_v29 = vpop.permute.xlu1 %1196  ;;  %v1188_v46 = vadd.f32 %v1182_v28, %v1011_v8  ;;  %v3865_v8 = vld [vmem:[%s6177_s4 + $0xf0] sm:$0xff] }
 0x741   :  { %v1273_v37 = vmul.f32 %v4924_v3, %v1262_v4  ;;  %v1183_v4 = vmul.f32 %v5033_v21, %v5065_v30  ;;  %v1207_v51 = vmul.f32 %v4921_v1, %v1197_v29  ;;  %v951_v21 = vmul.f32 %v5021_v11, %v909_v7 }
 0x742   :  { %2311 = vperm.xlu0 %4328, %v3853_v57   ;;  %2194 = vperm.xlu1 %4329, %v3842_v32   ;;  %v950_v57 = vmul.f32 %v5019_v10, %v908_v0  ;;  %v3860_v0 = vld [vmem:[%s6177_s4 + $0xc8] sm:$0xff]  ;;  %v1072_v30 = vmul.f32 %v5035_v22, %v1029_v2 }
 0x743   :  { %v1316_v49 = vmul.f32 %v5043_v33, %v1273_v37  ;;  %v1189_v18 = vadd.f32 %v1183_v4, %v1012_v20  ;;  %v1250_v11 = vmul.f32 %v5041_v15, %v1207_v51  ;;  %v3848_v37 = vld [vmem:[%s6177_s4 + $0x68] sm:$0xff]  ;;  %v3871_v4 = vld [vmem:[%s6177_s4 + $0x120] sm:$0xff] }
 0x744   :  { %v1329_v41 = vpop.permute.xlu0 %1328  ;;  %v1264_v43 = vpop.permute.xlu1 %1263  ;;  %v1139_v32 = vadd.f32 %v1133_v12, %v950_v57  ;;  %v1255_v39 = vadd.f32 %v1249_v42, %v1072_v30  ;;  %v3878_v30 = vld [vmem:[%s6177_s4 + $0x158] sm:$0xff] }
 0x745   :  { %v1340_v5 = vmul.f32 %v4913_v59, %v1329_v41  ;;  %v1274_v14 = vmul.f32 %v4924_v3, %v1264_v43 }
 0x746   :  { %2360 = vperm.xlu0 %4328, %v3859_v6   ;;  %2316 = vperm.xlu1 %4329, %v3854_v63   ;;  %v1322_v22 = vadd.f32 %v1316_v49, %v1139_v32  ;;  %v1140_v63 = vadd.f32 %v1134_v13, %v951_v21  ;;  %v3883_v21 = vld [vmem:[%s6177_s4 + $0x180] sm:$0xff] }
 0x747   :  { %v1383_v10 = vmul.f32 %v5047_v24, %v1340_v5  ;;  %v1317_v16 = vmul.f32 %v5045_v38, %v1274_v14  ;;  %v3866_v5 = vld [vmem:[%s6177_s4 + $0xf8] sm:$0xff]  ;;  %v3872_v14 = vld [vmem:[%s6177_s4 + $0x128] sm:$0xff] }
 0x748   :  { %v1396_v6 = vpop.permute.xlu0 %1395  ;;  %v1331_v28 = vpop.permute.xlu1 %1330 }
 0x749   :  { %v1389_v33 = vadd.f32 %v1383_v10, %v1188_v46  ;;  %v1407_v24 = vmul.f32 %v4937_v17, %v1396_v6  ;;  %v1341_v29 = vmul.f32 %v4913_v59, %v1331_v28  ;;  %v1073_v59 = vmul.f32 %v5037_v23, %v1030_v19  ;;  %v3877_v10 = vld [vmem:[%s6177_s4 + $0x150] sm:$0xff]  ;;  %v3884_v28 = vld [vmem:[%s6177_s4 + $0x188] sm:$0xff] }
 0x74a   :  { %2250 = vperm.xlu0 %4328, %v3847_v53   ;;  %2365 = vperm.xlu1 %4329, %v3860_v0   ;;  %v2122_v6 = vld [vmem:[%s6177_s4 + $0x10] sm:$0xff] }
 0x74b   :  { %v1450_v7 = vmul.f32 %v5051_v50, %v1407_v24  ;;  %v1384_v45 = vmul.f32 %v5049_v47, %v1341_v29  ;;  %v1462_v41 = vadd.f32 %v1389_v33, %v1322_v22  ;;  %v1256_v38 = vadd.f32 %v1250_v11, %v1073_v59  ;;  %v3843_v24 = vld [vmem:[%s6177_s4 + $0x40] sm:$0xff]  ;;  %v2123_v29 = vld [vmem:[%s6177_s4 + $0x18] sm:$0xff] }
 0x74c   :  { %v1398_v2 = vpop.permute.xlu1 %1397  ;;  %v901_v60 = vpop.permute.xlu0 %900  ;;  %v1323_v47 = vadd.f32 %v1317_v16, %v1140_v63  ;;  %v1184_v63 = vmul.f32 %v5085_v27, %v5113_v40  ;;  %v1185_v59 = vmul.f32 %v5091_v35, %v5122_v36  ;;  %v5349_v36 = vld [vmem:[%s4587_s25 + $0x7] ss:$0 sm:$0xff] }
 0x74d   :  { %v1456_v15 = vadd.f32 %v1450_v7, %v1255_v39  ;;  %v1390_v43 = vadd.f32 %v1384_v45, %v1189_v18  ;;  %v1408_v57 = vmul.f32 %v4937_v17, %v1398_v2  ;;  %v910_v18 = vmul.f32 %v4907_v55, %v901_v60  ;;  %v3855_v2 = vld [vmem:[%s6177_s4 + $0xa0] sm:$0xff] }
 0x74e   :  { %2427 = vperm.xlu0 %4328, %v3865_v8   ;;  %2255 = vperm.xlu1 %4329, %v3848_v37   ;;  %v5343_v60 = vld [vmem:[%s4587_s25 + $0x3] ss:$0 sm:$0xff] }
 0x74f   :  { %v1468_v50 = vadd.f32 %v1462_v41, %v1456_v15  ;;  %v1451_v12 = vmul.f32 %v5053_v56, %v1408_v57  ;;  %v1463_v51 = vadd.f32 %v1390_v43, %v1323_v47 }
 0x750   :  { %v961_v20 = vpop.permute.xlu0 %960  ;;  %v903_v23 = vpop.permute.xlu1 %902 }
 0x751   :  { %v5311_v42 = vadd.f32 %v5139_v9, %v1468_v50  ;;  %v1457_v17 = vadd.f32 %v1451_v12, %v1256_v38  ;;  %v911_v16 = vmul.f32 %v4907_v55, %v903_v23  ;;  %v3844_v55 = vld [vmem:[%s6177_s4 + $0x48] sm:$0xff]  ;;  %v5355_v38 = vld [vmem:[%s4587_s25 + $0x5] ss:$0 sm:$0xff]  ;;  %v6178_v50 = vld [vmem:[#allocation33_spill] sm:$0xff] }
 0x752   :  { %2494 = vperm.xlu0 %4328, %v3871_v4   ;;  %2432 = vperm.xlu1 %4329, %v3866_v5   ;;  %v5361_v12 = vld [vmem:[%s4587_s25 + $0x6] ss:$0 sm:$0xff]  ;;  %v3861_v5 = vld [vmem:[%s6177_s4 + $0xd0] sm:$0xff]  ;;  %v6179_v23 = vld [vmem:[#allocation29_spill] sm:$0xff] }
 0x753   :  { %v1510_v46 = vmul.f32 0.5, %v5311_v42  ;;  %v1469_v49 = vadd.f32 %v1463_v51, %v1457_v17  ;;  %v953_v35 = vmul.f32 %v5059_v62, %v911_v16  ;;  %v6180_v51 = vld [vmem:[#allocation28_spill] sm:$0xff] }
 0x754   :  { %v1083_v56 = vpop.permute.xlu0 %1082  ;;  %v963_v53 = vpop.permute.xlu1 %962  ;;  %v3862_v16 = vld [vmem:[%s6177_s4 + $0xd8] sm:$0xff] }
 0x755   :  { %4390 = vtanh.f32 %v1510_v46  ;;  %v5317_v0 = vadd.f32 %v5145_v58, %v1469_v49  ;;  %v970_v58 = vmul.f32 %v4904_v54, %v961_v20  ;;  %v1092_v7 = vmul.f32 %v4901_v52, %v1083_v56  ;;  %v3856_v20 = vld [vmem:[%s6177_s4 + $0xa8] sm:$0xff]  ;;  %v5369_v46 = vld [vmem:[%s4587_s25 + $0x2] ss:$0 sm:$0xff] }
 0x756   :  { %2561 = vperm.xlu0 %4328, %v3877_v10   ;;  %2499 = vperm.xlu1 %4329, %v3872_v14   ;;  %v971_v8 = vmul.f32 %v4904_v54, %v963_v53  ;;  %v952_v52 = vmul.f32 %v5055_v31, %v910_v18 }
 0x757   :  { %v1511_v9 = vmul.f32 0.5, %v5317_v0  ;;  %v1013_v22 = vmul.f32 %v5063_v48, %v970_v58  ;;  %v6182_v58 = vld [vmem:[#allocation32_spill] sm:$0xff] }
 0x758   :  { %v1022_v13 = vpop.permute.xlu0 %1021  ;;  %v1085_v19 = vpop.permute.xlu1 %1084  ;;  %v1014_v43 = vmul.f32 %v5071_v25, %v971_v8 }
 0x759   :  { %4392 = vtanh.f32 %v1511_v9  ;;  %v1031_v54 = vmul.f32 %v4916_v61, %v1022_v13  ;;  %v1190_v40 = vadd.f32 %v1184_v63, %v1013_v22  ;;  %v5373_v9 = vld [vmem:[%s4587_s25 + $0x8] ss:$0 sm:$0xff]  ;;  %v3849_v22 = vld [vmem:[%s6177_s4 + $0x70] sm:$0xff] }
 0x75a   :  { %2628 = vperm.xlu0 %4328, %v3883_v21   ;;  %2566 = vperm.xlu1 %4329, %v3878_v30   ;;  %v1191_v13 = vadd.f32 %v1185_v59, %v1014_v43 }
 0x75c   :  { %v1199_v32 = vpop.permute.xlu0 %1198  ;;  %v1024_v33 = vpop.permute.xlu1 %1023 }
 0x75d   :  { %v1208_v37 = vmul.f32 %v4921_v1, %v1199_v32  ;;  %v1093_v1 = vmul.f32 %v5343_v60, %v1085_v19  ;;  %v1032_v49 = vmul.f32 %v5369_v46, %v1024_v33 }
 0x75e   :  { %2138 = vperm.xlu0 %4328, %v2122_v6   ;;  %2633 = vperm.xlu1 %4329, %v3884_v28   ;;  %v6181_v6 = vld [vmem:[#allocation31_spill] sm:$0xff] }
 0x75f   :  { %v1251_v57 = vmul.f32 %v5105_v44, %v1208_v37  ;;  %v1074_v44 = vmul.f32 %v6179_v23, %v1031_v54  ;;  %v1136_v17 = vmul.f32 %v6180_v51, %v1093_v1 }
 0x760   :  { %v1266_v39 = vpop.permute.xlu0 %1265  ;;  %v1201_v11 = vpop.permute.xlu1 %1200 }
 0x761   :  { %v1275_v48 = vmul.f32 %v4924_v3, %v1266_v39  ;;  %v1135_v3 = vmul.f32 %v5073_v26, %v1092_v7  ;;  %v1209_v47 = vmul.f32 %v5355_v38, %v1201_v11  ;;  %v1257_v19 = vadd.f32 %v1251_v57, %v1074_v44  ;;  %v6184_v39 = vld [vmem:[#allocation34_spill] sm:$0xff]  ;;  %v6191_v44 = vld [vmem:[#allocation56_spill] sm:$0xff] }
 0x762   :  { %v4391_v45 = vpop.eup %4390  ;;  %2199 = vperm.xlu0 %4328, %v3843_v24   ;;  %2143 = vperm.xlu1 %4329, %v2123_v29   ;;  %v6183_v29 = vld [vmem:[#allocation35_spill] sm:$0xff]  ;;  %v1142_v7 = vadd.f32 %v1136_v17, %v953_v35  ;;  %v3867_v35 = vld [vmem:[%s6177_s4 + $0x100] sm:$0xff]  ;;  %v6187_v57 = vmov 0.0  }
 0x763   :  { %v1522_v27 = vadd.f32 1.0, %v4391_v45  ;;  %v1318_v62 = vmul.f32 %v5116_v34, %v1275_v48  ;;  %v1141_v56 = vadd.f32 %v1135_v3, %v952_v52  ;;  %v1252_v28 = vmul.f32 %v6181_v6, %v1209_v47  ;;  %v6185_v45 = vld [vmem:[#allocation30_spill] sm:$0xff]  ;;  %v6188_v47 = vld [vmem:[#allocation55_spill] sm:$0xff]  ;;  %v4462_v6 = vld [vmem:[%s4587_s25 + $0x1] ss:$0 sm:$0xff] }
 0x764   :  { %v1333_v41 = vpop.permute.xlu0 %1332  ;;  %v1268_v15 = vpop.permute.xlu1 %1267  ;;  %v1075_v8 = vmul.f32 %v6185_v45, %v1032_v49  ;;  %v3879_v17 = vld [vmem:[%s6177_s4 + $0x160] sm:$0xff]  ;;  %v3874_v49 = vld [vmem:[%s6177_s4 + $0x138] sm:$0xff] }
 0x765   :  { %v1342_v31 = vmul.f32 %v5349_v36, %v1333_v41  ;;  %v1276_v4 = vmul.f32 %v5361_v12, %v1268_v15  ;;  %v1528_v14 = vmul.f32 0.5, %v1522_v27  ;;  %v1324_v33 = vadd.f32 %v1318_v62, %v1141_v56  ;;  %v2096_v56 = vld [vmem:[%s6190_s23] sm:$0xff] }
 0x766   :  { %v4393_v61 = vpop.eup %4392  ;;  %2321 = vperm.xlu0 %4328, %v3855_v2   ;;  %2204 = vperm.xlu1 %4329, %v3844_v55   ;;  %v1258_v41 = vadd.f32 %v1252_v28, %v1075_v8 }
 0x767   :  { %v1385_v26 = vmul.f32 %v6178_v50, %v1342_v31  ;;  %v1523_v25 = vadd.f32 1.0, %v4393_v61  ;;  %v1319_v24 = vmul.f32 %v6182_v58, %v1276_v4  ;;  %v5385_v59 = vmul.f32 %v1528_v14, %v5311_v42  ;;  %v6186_v42 = vld [vmem:[#allocation36_spill] sm:$0xff]  ;;  %v3868_v4 = vld [vmem:[%s6177_s4 + $0x108] sm:$0xff] }
 0x768   :  { %v1400_v10 = vpop.permute.xlu0 %1399  ;;  %v1335_v34 = vpop.permute.xlu1 %1334 }
 0x769   :  { %v1391_v53 = vadd.f32 %v1385_v26, %v1190_v40  ;;  %v1409_v21 = vmul.f32 %v5373_v9, %v1400_v10  ;;  %v1343_v30 = vmul.f32 %v5349_v36, %v1335_v34  ;;  %v1529_v32 = vmul.f32 0.5, %v1523_v25  ;;  %v3873_v26 = vld [vmem:[%s6177_s4 + $0x130] sm:$0xff] }
 0x76a   :  { %2370 = vperm.xlu0 %4328, %v3861_v5   ;;  %2326 = vperm.xlu1 %4329, %v3856_v20   ;;  %v1325_v15 = vadd.f32 %v1319_v24, %v1142_v7  ;;  %v6189_v20 = vld [vmem:[#allocation26_spill] sm:$0xff]  ;;  %v4463_v24 = vld [vmem:[%s4587_s25] ss:$0 sm:$0xff] }
 0x76b   :  { %v1452_v18 = vmul.f32 %v6183_v29, %v1409_v21  ;;  %v1386_v11 = vmul.f32 %v6184_v39, %v1343_v30  ;;  %v5388_v48 = vmul.f32 %v1529_v32, %v5317_v0  ;;  %v1464_v2 = vadd.f32 %v1391_v53, %v1324_v33  ;;  %v3850_v0 = vld [vmem:[%s6177_s4 + $0x78] sm:$0xff]  ;;  %v3880_v53 = vld [vmem:[%s6177_s4 + $0x168] sm:$0xff]  ;;  %v2124_v39 = vld [vmem:[%s6177_s4 + $0x20] sm:$0xff] }
 0x76c   :  { %v1402_v37 = vpop.permute.xlu1 %1401  ;;  %v905_v63 = vpop.permute.xlu0 %904 }
 0x76d   :  { %v1458_v55 = vadd.f32 %v1452_v18, %v1257_v19  ;;  %v1392_v52 = vadd.f32 %v1386_v11, %v1191_v13  ;;  %v1410_v54 = vmul.f32 %v5373_v9, %v1402_v37  ;;  %v1554_v1 = vpack.c.bf16 %v5388_v48, %v5385_v59  ;;  %v3885_v13 = vld [vmem:[%s6177_s4 + $0x190] sm:$0xff]  ;;  %v2097_v19 = vld [vmem:[%s6190_s23 + $0x8] sm:$0xff]  ;;  %v3886_v11 = vld [vmem:[%s6177_s4 + $0x198] sm:$0xff] }
 0x76e   :  { %2260 = vperm.xlu0 %4328, %v3849_v22   ;;  %2375 = vperm.xlu1 %4329, %v3862_v16   ;;  %v912_v29 = vmul.f32 %v4463_v24, %v905_v63  ;;  %v6192_v22 = vld [vmem:[#allocation39_spill] sm:$0xff]  ;;  %v6193_v37 = vld [vmem:[#allocation40_spill] sm:$0xff] }
 0x76f   :  { %v1470_v27 = vadd.f32 %v1464_v2, %v1458_v55  ;;  %v1453_v40 = vmul.f32 %v6186_v42, %v1410_v54  ;;  %4105 = vmatmul.mubr.bf16.vlgmr.msra.gmra.mxu0 %v1554_v1  ;;  %v1465_v61 = vadd.f32 %v1392_v52, %v1325_v15  ;;  %v6194_v2 = vld [vmem:[#allocation45_spill] sm:$0xff]  ;;  %v6195_v1 = vld [vmem:[#allocation42_spill] sm:$0xff] }
 0x770   :  { %v965_v3 = vpop.permute.xlu0 %964  ;;  %v5396_v31 = vpop.permute.xlu1 %906  ;;  %4108 = vmatprep.mubr.msk.bf16.mxu0 %vm4543_vm2, %v6187_v57  ;;  %4141 = vmatpush3.bf16.msra.mxu0 %v6189_v20  ;;  %v1186_v55 = vmul.f32 %v6194_v2, %v6193_v37  ;;  %v6197_v42 = vld [vmem:[#allocation37_spill] sm:$0xff]  ;;  %v5830_v20 = vld [vmem:[%s4587_s25 + $0x3] ss:$0 sm:$0xff] }
 0x771   :  { %v1459_v43 = vadd.f32 %v1453_v40, %v1258_v41  ;;  %v5401_v62 = vadd.f32 %v6188_v47, %v1470_v27  ;;  %4178 = vmatprep.subr.bf16.mxu0 %v6187_v57  ;;  %v972_v28 = vmul.f32 %v4462_v6, %v965_v3  ;;  %v6196_v41 = vld [vmem:[#allocation46_spill] sm:$0xff]  ;;  %v954_v40 = vmul.f32 %v6197_v42, %v912_v29  ;;  %v6204_v29 = vld [vmem:[#allocation57_spill] sm:$0xff] }
 0x772   :  { %2437 = vperm.xlu0 %4328, %v3867_v35   ;;  %2265 = vperm.xlu1 %4329, %v3850_v0   ;;  %v1187_v63 = vmul.f32 %v6196_v41, %v6195_v1  ;;  %v6198_v35 = vld [vmem:[#allocation43_spill] sm:$0xff]  ;;  %v3863_v1 = vld [vmem:[%s6177_s4 + $0xe0] sm:$0xff]  ;;  %v3858_v41 = vld [vmem:[%s6177_s4 + $0xb8] sm:$0xff] }
 0x773   :  { %v1471_v50 = vadd.f32 %v1465_v61, %v1459_v43  ;;  %v1512_v5 = vmul.f32 0.5, %v5401_v62  ;;  %v1015_v16 = vmul.f32 %v6192_v22, %v972_v28  ;;  %v3845_v43 = vld [vmem:[%s6177_s4 + $0x50] sm:$0xff]  ;;  %v2125_v47 = vld [vmem:[%s6177_s4 + $0x28] sm:$0xff] }
 0x774   :  { %v1087_v25 = vpop.permute.xlu0 %1086  ;;  %v967_v23 = vpop.permute.xlu1 %966  ;;  %v6202_v28 = vld [vmem:[#allocation47_spill] sm:$0xff]  ;;  %v6205_v22 = vld [vmem:[#allocation44_spill] sm:$0xff]  ;;  %v6211_v42 = vld [vmem:[#allocation58_spill] sm:$0xff] }
 0x775   :  { %v5409_v51 = vadd.f32 %v6191_v44, %v1471_v50  ;;  %4394 = vtanh.f32 %v1512_v5  ;;  %v1094_v18 = vmul.f32 %v5343_v60, %v1087_v25  ;;  %v973_v54 = vmul.f32 %v4462_v6, %v967_v23 }
 0x776   :  { %2504 = vperm.xlu0 %4328, %v3873_v26   ;;  %2442 = vperm.xlu1 %4329, %v3868_v4   ;;  %v1192_v50 = vadd.f32 %v1186_v55, %v1015_v16  ;;  %v913_v26 = vmul.f32 %v4463_v24, %v5396_v31  ;;  %v3857_v24 = vld [vmem:[%s6177_s4 + $0xb0] sm:$0xff] }
 0x777   :  { %v1513_v10 = vmul.f32 0.5, %v5409_v51  ;;  %v1137_v0 = vmul.f32 %v6198_v35, %v1094_v18 }
 0x778   :  { %v1026_v34 = vpop.permute.xlu0 %1025  ;;  %v1089_v14 = vpop.permute.xlu1 %1088 }
 0x779   :  { %4396 = vtanh.f32 %v1513_v10  ;;  %v1033_v3 = vmul.f32 %v5369_v46, %v1026_v34  ;;  %v1095_v44 = vmul.f32 %v5343_v60, %v1089_v14  ;;  %v1143_v6 = vadd.f32 %v1137_v0, %v954_v40  ;;  %v6203_v14 = vld [vmem:[#allocation51_spill] sm:$0xff] }
 0x77a   :  { %2571 = vperm.xlu0 %4328, %v3879_v17   ;;  %2509 = vperm.xlu1 %4329, %v3874_v49   ;;  %v6199_v17 = vld [vmem:[#allocation49_spill] sm:$0xff] }
 0x77b   :  { %v1138_v16 = vmul.f32 %v6205_v22, %v1095_v44  ;;  %v3869_v44 = vld [vmem:[%s6177_s4 + $0x110] sm:$0xff] }
 0x77c   :  { %v1203_v21 = vpop.permute.xlu0 %1202  ;;  %v1028_v30 = vpop.permute.xlu1 %1027 }
 0x77d   :  { %v1210_v52 = vmul.f32 %v5355_v38, %v1203_v21  ;;  %v6201_v21 = vld [vmem:[#allocation53_spill] sm:$0xff]  ;;  %v1034_v60 = vmul.f32 %v5369_v46, %v1028_v30  ;;  %v6206_v30 = vld [vmem:[#allocation50_spill] sm:$0xff] }
 0x77e   :  { %2682 = vperm.xlu0 %4328, %v2096_v56   ;;  %2576 = vperm.xlu1 %4329, %v3880_v53   ;;  %v6200_v56 = vld [vmem:[#allocation41_spill] sm:$0xff] }
 0x77f   :  { %v1253_v49 = vmul.f32 %v6199_v17, %v1210_v52  ;;  %v1016_v53 = vmul.f32 %v6200_v56, %v973_v54  ;;  %v3852_v17 = vld [vmem:[%s6177_s4 + $0x88] sm:$0xff] }
 0x780   :  { %v1270_v32 = vpop.permute.xlu0 %1269  ;;  %v1205_v33 = vpop.permute.xlu1 %1204 }
 0x781   :  { %v1277_v61 = vmul.f32 %v5361_v12, %v1270_v32  ;;  %v1211_v10 = vmul.f32 %v5355_v38, %v1205_v33  ;;  %v1076_v32 = vmul.f32 %v6202_v28, %v1033_v3  ;;  %v3846_v38 = vld [vmem:[%s6177_s4 + $0x58] sm:$0xff]  ;;  %v1193_v52 = vadd.f32 %v1187_v63, %v1016_v53  ;;  %v3875_v53 = vld [vmem:[%s6177_s4 + $0x140] sm:$0xff] }
 0x782   :  { %2638 = vperm.xlu0 %4328, %v3885_v13   ;;  %2687 = vperm.xlu1 %4329, %v2097_v19   ;;  %v4395_v58 = vpop.eup %4394  ;;  %v3882_v28 = vld [vmem:[%s6177_s4 + $0x178] sm:$0xff] }
 0x783   :  { %v1524_v8 = vadd.f32 1.0, %v4395_v58  ;;  %v1320_v58 = vmul.f32 %v6203_v14, %v1277_v61  ;;  %v1259_v46 = vadd.f32 %v1253_v49, %v1076_v32  ;;  %v2099_v14 = vld [vmem:[%s6190_s23 + $0x18] sm:$0xff] }
 0x784   :  { %v1337_v7 = vpop.permute.xlu0 %1336  ;;  %v1272_v45 = vpop.permute.xlu1 %1271 }
 0x785   :  { %v1344_v15 = vmul.f32 %v5349_v36, %v1337_v7  ;;  %v1530_v23 = vmul.f32 0.5, %v1524_v8  ;;  %v1278_v33 = vmul.f32 %v5361_v12, %v1272_v45  ;;  %v1254_v7 = vmul.f32 %v6206_v30, %v1211_v10  ;;  %v6207_v12 = vld [vmem:[#allocation54_spill] sm:$0xff] }
 0x786   :  { %2148 = vperm.xlu0 %4328, %v2124_v39   ;;  %2643 = vperm.xlu1 %4329, %v3886_v11   ;;  %v4397_v27 = vpop.eup %4396 }
 0x787   :  { %v1525_v25 = vadd.f32 1.0, %v4397_v27  ;;  %v1387_v13 = vmul.f32 %v6201_v21, %v1344_v15  ;;  %v1326_v15 = vadd.f32 %v1320_v58, %v1143_v6  ;;  %v6210_v27 = vld [vmem:[#allocation52_spill] sm:$0xff] }
 0x788   :  { %v1404_v4 = vpop.permute.xlu0 %1403  ;;  %v1339_v5 = vpop.permute.xlu1 %1338  ;;  %v3870_v21 = vld [vmem:[%s6177_s4 + $0x118] sm:$0xff]  ;;  %v2098_v6 = vld [vmem:[%s6190_s23 + $0x10] sm:$0xff] }
 0x789   :  { %v1411_v34 = vmul.f32 %v5373_v9, %v1404_v4  ;;  %v1345_v31 = vmul.f32 %v5349_v36, %v1339_v5  ;;  %v1531_v19 = vmul.f32 0.5, %v1525_v25  ;;  %v5452_v36 = vmul.f32 %v1530_v23, %v5401_v62  ;;  %v6208_v62 = vld [vmem:[#allocation38_spill] sm:$0xff] }
 0x78a   :  { %2209 = vperm.xlu0 %4328, %v3845_v43   ;;  %2153 = vperm.xlu1 %4329, %v2125_v47   ;;  %v1393_v37 = vadd.f32 %v1387_v13, %v1192_v50  ;;  %v955_v55 = vmul.f32 %v6208_v62, %v913_v26  ;;  %v3851_v43 = vld [vmem:[%s6177_s4 + $0x80] sm:$0xff]  ;;  %v3864_v47 = vld [vmem:[%s6177_s4 + $0xe8] sm:$0xff] }
 0x78b   :  { %v1454_v18 = vmul.f32 %v6204_v29, %v1411_v34  ;;  %v5455_v11 = vmul.f32 %v1531_v19, %v5409_v51  ;;  %v1388_v45 = vmul.f32 %v6207_v12, %v1345_v31  ;;  %v6209_v51 = vld [vmem:[#allocation48_spill] sm:$0xff]  ;;  %v3876_v19 = vld [vmem:[%s6177_s4 + $0x148] sm:$0xff] }
 0x78c   :  { %v1406_v39 = vpop.permute.xlu1 %1405  ;;  %v1077_v54 = vmul.f32 %v6209_v51, %v1034_v60  ;;  %v1144_v0 = vadd.f32 %v1138_v16, %v955_v55  ;;  %v1466_v61 = vadd.f32 %v1393_v37, %v1326_v15  ;;  %v3881_v31 = vld [vmem:[%s6177_s4 + $0x170] sm:$0xff]  ;;  %v3887_v60 = vld [vmem:[%s6177_s4 + $0x1a0] sm:$0xff] }
 0x78d   :  { %v1412_v8 = vmul.f32 %v5373_v9, %v1406_v39  ;;  %v1555_v2 = vpack.c.bf16 %v5455_v11, %v5452_v36  ;;  %v1321_v9 = vmul.f32 %v6210_v27, %v1278_v33  ;;  %v1460_v35 = vadd.f32 %v1454_v18, %v1259_v46  ;;  %v1540_v15 = vld [vmem:[%s6212_s26] sm:$0x1] }
 0x78e   :  { %2331 = vperm.xlu0 %4328, %v3857_v24   ;;  %2214 = vperm.xlu1 %4329, %v3846_v38   ;;  %v1260_v3 = vadd.f32 %v1254_v7, %v1077_v54  ;;  %v1394_v63 = vadd.f32 %v1388_v45, %v1193_v52  ;;  %v3888_v38 = vld [vmem:[%s6177_s4 + $0x1a8] sm:$0xff] }
 0x78f   :  { %v1455_v40 = vmul.f32 %v6211_v42, %v1412_v8  ;;  %4109 = vmatmul.mubr.bf16.gmra.mxu0 %v1555_v2  ;;  %v1327_v50 = vadd.f32 %v1321_v9, %v1144_v0  ;;  %v1472_v26 = vadd.f32 %v1466_v61, %v1460_v35 }
 0x790   :  { %4112 = vmatprep.mubr.msk.bf16.mxu0 %vm4543_vm2, %v6187_v57 }
 0x791   :  { %v1461_v4 = vadd.f32 %v1455_v40, %v1260_v3  ;;  %v1467_v23 = vadd.f32 %v1394_v63, %v1327_v50 }
 0x792   :  { %2380 = vperm.xlu0 %4328, %v3863_v1   ;;  %2336 = vperm.xlu1 %4329, %v3858_v41  }
 0x793   :  { %v1473_v10 = vadd.f32 %v1467_v23, %v1461_v4  ;;  %v4341_v4 = vld [vmem:[%s6213_s28] sm:$0xff]  }
 0x795   :  { %v1497_v5 = vpop.permute.xlu0 %1496 }
 0x796   :  { %v1508_v25 = vadd.f32 %v1497_v5, %v1472_v26  ;;  %2270 = vperm.xlu0 %4328, %v3851_v43   ;;  %2385 = vperm.xlu1 %4329, %v3864_v47   ;;  %v4342_v5 = vld [vmem:[%s6213_s28 + $0x8] sm:$0xff]  }
 0x798   :  { %v1514_v49 = vmul.f32 0.5, %v1508_v25 }
 0x799   :  { %v1502_v34 = vpop.permute.xlu1 %1501  ;;  %v1620_v27 = vpop.permute.xlu0 %1619 }
 0x79a   :  { %4398 = vtanh.f32 %v1514_v49  ;;  %v1509_v56 = vadd.f32 %v1502_v34, %v1473_v10  ;;  %2447 = vperm.xlu0 %4328, %v3869_v44   ;;  %2275 = vperm.xlu1 %4329, %v3852_v17  }
 0x79c   :  { %v1515_v13 = vmul.f32 0.5, %v1509_v56 }
 0x79d   :  { %v1675_v23 = vpop.permute.xlu1 %1674  ;;  %v1680_v34 = vpop.permute.xlu0 %1679 }
 0x79e   :  { %4400 = vtanh.f32 %v1515_v13  ;;  %2514 = vperm.xlu0 %4328, %v3875_v53   ;;  %2452 = vperm.xlu1 %4329, %v3870_v21  }
 0x7a2   :  { %2581 = vperm.xlu0 %4328, %v3881_v31   ;;  %2519 = vperm.xlu1 %4329, %v3876_v19   ;;  %v1685_v31 = vpop.permute.xlu1 %1684 }
 0x7a6   :  { %2692 = vperm.xlu0 %4328, %v2098_v6   ;;  %2586 = vperm.xlu1 %4329, %v3882_v28  }
 0x7a7   :  { %v4399_v32 = vpop.eup %4398 }
 0x7a8   :  { %v1526_v58 = vadd.f32 1.0, %v4399_v32 }
 0x7aa   :  { %2648 = vperm.xlu0 %4328, %v3887_v60   ;;  %2697 = vperm.xlu1 %4329, %v2099_v14   ;;  %v1532_v33 = vmul.f32 0.5, %v1526_v58  ;;  %v1690_v60 = vpop.permute.xlu0 %1689 }
 0x7ab   :  { %v4401_v24 = vpop.eup %4400 }
 0x7ac   :  { %v1527_v29 = vadd.f32 1.0, %v4401_v24  ;;  %v5484_v39 = vmul.f32 %v1532_v33, %v1508_v25  ;;  %v4343_v25 = vld [vmem:[%s6213_s28 + $0x10] sm:$0xff]   ;;  %v1695_v33 = vpop.permute.xlu1 %1694 }
 0x7ae   :  { %v1533_v18 = vmul.f32 0.5, %v1527_v29  ;;  %2653 = vperm.xlu1 %4329, %v3888_v38  }
 0x7b0   :  { %v5486_v22 = vmul.f32 %v1533_v18, %v1509_v56 }
 0x7b2   :  { %v1556_v16 = vpack.c.bf16 %v5486_v22, %v5484_v39 }
 0x7b4   :  { %4113 = vmatmul.mubr.bf16.gmra.mxu0 %v1556_v16 }
 0x7b5   :  { %4142 = vmatprep.mubr.msk.bf16.mxu0 %vm4543_vm2, %v6187_v57 }
 0x82f   :  { %v1591_v46 = vpop.f32.mrf.mxu0 }
 0x831   :  { %v4106_v30 = vpop.f32.mrf.mxu0 }
 0x833   :  { %v1594_v7 = vpop.f32.mrf.mxu0 }
 0x834   :  { %v1614_v8 = vpack.c.bf16 %v1594_v7, %v1591_v46  ;;  %v1700_v7 = vpop.permute.xlu0 %1699 }
 0x835   :  { %v4107_v37 = vpop.f32.mrf.mxu0 }
 0x84f   :  { %v1599_v12 = vpop.f32.mrf.mxu0 }
 0x851   :  { %v4110_v45 = vpop.f32.mrf.mxu0 }
 0x853   :  { %v1602_v2 = vpop.f32.mrf.mxu0 }
 0x854   :  { %v1615_v41 = vpack.c.bf16 %v1602_v2, %v1599_v12 }
 0x855   :  { %v4111_v62 = vpop.f32.mrf.mxu0 }
 0x874   :  { %v1607_v55 = vpop.f32.mrf.mxu0 }
 0x876   :  { %v4114_v52 = vpop.f32.mrf.mxu0 }
 0x878   :  { %v1610_v51 = vpop.f32.mrf.mxu0 }
 0x879   :  { %v1616_v54 = vpack.c.bf16 %v1610_v51, %v1607_v55 }
 0x87a   :  { %v4115_v1 = vpop.f32.mrf.mxu0 }
 0x87b   :  { %4117 = vmatpush3.bf16.msra.mxu1 %v1616_v54 }
 0x87c   :  { %4118 = vmatprep.subr.bf16.mxu1 %v6187_v57 }
 0x87f   :  { %4119 = vmatpush3.bf16.msra.mxu1 %v1615_v41 }
 0x880   :  { %4120 = vmatprep.subr.bf16.mxu1 %v6187_v57 }
 0x883   :  { %4121 = vmatpush3.bf16.msra.mxu1 %v1614_v8 }
 0x884   :  { %4126 = vmatprep.subr.bf16.mxu1 %v6187_v57 }
 0x886   :  { %4123 = vmatmul.mubr.msk.bf16.vlgmr.msra.gmra.mxu1 %vm1622_vm7, %v1540_v15 }
 0x887   :  { %4128 = vmatprep.mubr.msk.bf16.mxu1 %vm4543_vm2, %v6187_v57 }
 0x946   :  { %v1660_v9 = vpop.f32.mrf.mxu1 }
 0x947   :  { %v1661_v42 = vadd.f32 %v1660_v9, %v1620_v27  ;;  %v4464_v27 = vld [vmem:[%s4577_s17 + $0x38] sm:$0xff]  }
 0x948   :  { %v4124_v40 = vpop.f32.mrf.mxu1 }
 0x949   :  { %v1666_v35 = vmul.f32 0.5, %v1661_v42 }
 0x94a   :  { %v1663_v0 = vpop.f32.mrf.mxu1 }
 0x94b   :  { %4402 = vtanh.f32 %v1666_v35  ;;  %v4465_v0 = vld [vmem:[%s4577_s17 + $0x30] sm:$0xff]  }
 0x94c   :  { %v4125_v3 = vpop.f32.mrf.mxu1 }
 0x958   :  { %v4403_v63 = vpop.eup %4402 }
 0x959   :  { %v1668_v61 = vadd.f32 1.0, %v4403_v63 }
 0x95b   :  { %v1669_v43 = vmul.f32 0.5, %v1668_v61 }
 0x95d   :  { %v1670_v47 = vmul.f32 %v1669_v43, %v1661_v42  ;;  %v4466_v43 = vld [vmem:[%s4577_s17 + $0x28] sm:$0xff]  }
 0x95f   :  { %v1671_v50 = vpack.c.bf16 %v1670_v47, %v1670_v47 }
 0x961   :  { %v1727_v26 = vsel %vm582_vm5, %v1671_v50, 0 }
 0x962   :  { %4127 = vmatpush3.bf16.msra.mxu1 %v1727_v26 }
 0x963   :  { %4154 = vmatprep.subr.bf16.mxu1 %v6187_v57 }
 0x965   :  { %4129 = vmatmul.mubr.msk.bf16.vlgmr.msra.gmra.mxu1 %vm578_vm6, %v4341_v4  ;;  %v4467_v4 = vld [vmem:[%s4577_s17 + $0x20] sm:$0xff]  }
 0x966   :  { %4132 = vmatprep.mubr.msk.bf16.mxu1 %vm4543_vm2, %v6187_v57 }
 0x96d   :  { %4133 = vmatmul.mubr.msk.bf16.gmra.mxu1 %vm578_vm6, %v4342_v5 }
 0x96e   :  { %4136 = vmatprep.mubr.msk.bf16.mxu1 %vm4543_vm2, %v6187_v57 }
 0x975   :  { %4137 = vmatmul.mubr.msk.bf16.gmra.mxu1 %vm578_vm6, %v4343_v25  ;;  %v4468_v25 = vld [vmem:[%s4577_s17 + $0x18] sm:$0xff]  }
 0x976   :  { %4160 = vmatprep.mubr.msk.bf16.mxu1 %vm4543_vm2, %v6187_v57 }
 0xa25   :  { %v1763_v44 = vpop.f32.mrf.mxu1 }
 0xa26   :  { %v1764_v17 = vadd.f32 %v1763_v44, %v1675_v23  ;;  %v4469_v23 = vld [vmem:[%s4577_s17 + $0x10] sm:$0xff]   ;;  %v4470_v44 = vld [vmem:[%s4577_s17 + $0x8] sm:$0xff]  }
 0xa27   :  { %v4130_v49 = vpop.f32.mrf.mxu1 }
 0xa28   :  { %v1786_v10 = vmul.f32 0.5, %v1764_v17  ;;  %v4471_v17 = vld [vmem:[%s4577_s17] sm:$0xff]   ;;  %s6215_s17 = sld [smem:[#allocation15_spill]] }
 0xa29   :  { %v1766_v56 = vpop.f32.mrf.mxu1 }
 0xa2a   :  { %4404 = vtanh.f32 %v1786_v10  ;;  %v1767_v53 = vadd.f32 %v1766_v56, %v1680_v34 }
 0xa2b   :  { %v4131_v21 = vpop.f32.mrf.mxu1 }
 0xa2c   :  { %v1787_v13 = vmul.f32 0.5, %v1767_v53 }
 0xa2d   :  { %v1771_v19 = vpop.f32.mrf.mxu1 }
 0xa2e   :  { %4406 = vtanh.f32 %v1787_v13  ;;  %v1772_v6 = vadd.f32 %v1771_v19, %v1685_v31 }
 0xa2f   :  { %v4134_v28 = vpop.f32.mrf.mxu1 }
 0xa30   :  { %v1788_v32 = vmul.f32 0.5, %v1772_v6 }
 0xa31   :  { %v1774_v14 = vpop.f32.mrf.mxu1 }
 0xa32   :  { %4408 = vtanh.f32 %v1788_v32  ;;  %v1775_v58 = vadd.f32 %v1774_v14, %v1690_v60 }
 0xa33   :  { %v4135_v24 = vpop.f32.mrf.mxu1 }
 0xa34   :  { %v1789_v38 = vmul.f32 0.5, %v1775_v58 }
 0xa35   :  { %v1779_v29 = vpop.f32.mrf.mxu1 }
 0xa36   :  { %4410 = vtanh.f32 %v1789_v38  ;;  %v1780_v18 = vadd.f32 %v1779_v29, %v1695_v33 }
 0xa37   :  { %v4405_v16 = vpop.eup %4404  ;;  %v4138_v46 = vpop.f32.mrf.mxu1 }
 0xa38   :  { %v1790_v30 = vmul.f32 0.5, %v1780_v18  ;;  %v1798_v37 = vadd.f32 1.0, %v4405_v16  ;;  %v6216_v16 = vld [vmem:[#allocation27_spill] sm:$0xff] }
 0xa39   :  { %v1782_v8 = vpop.f32.mrf.mxu1 }
 0xa3a   :  { %4412 = vtanh.f32 %v1790_v30  ;;  %v1783_v12 = vadd.f32 %v1782_v8, %v1700_v7  ;;  %v1804_v52 = vmul.f32 0.5, %v1798_v37 }
 0xa3b   :  { %v4407_v45 = vpop.eup %4406  ;;  %v4139_v2 = vpop.f32.mrf.mxu1 }
 0xa3c   :  { %v1799_v62 = vadd.f32 1.0, %v4407_v45  ;;  %v1791_v55 = vmul.f32 0.5, %v1783_v12  ;;  %v4344_v12 = vld [vmem:[%s6215_s17] sm:$0xff]   ;;  %v4345_v45 = vld [vmem:[%s6215_s17 + $0x8] sm:$0xff]   ;;  %v4346_v2 = vld [vmem:[%s6215_s17 + $0x10] sm:$0xff]  }
 0xa3e   :  { %v1805_v51 = vmul.f32 0.5, %v1799_v62  ;;  %4414 = vtanh.f32 %v1791_v55  ;;  %v1955_v62 = vpop.permute.xlu0 %1954 }
 0xa3f   :  { %v4409_v54 = vpop.eup %4408 }
 0xa40   :  { %v1810_v1 = vpack.c.bf16 %v1805_v51, %v1804_v52  ;;  %v1800_v41 = vadd.f32 1.0, %v4409_v54 }
 0xa42   :  { %4143 = vmatmul.mubr.msk.bf16.vlgmr.msra.gmra.mxu0 %vm578_vm6, %v1810_v1  ;;  %v1806_v42 = vmul.f32 0.5, %v1800_v41  ;;  %v1965_v52 = vpop.permute.xlu0 %1964 }
 0xa43   :  { %v4411_v15 = vpop.eup %4410  ;;  %4146 = vmatprep.mubr.msk.bf16.mxu0 %vm4543_vm2, %v6187_v57  ;;  %4179 = vmatpush3.bf16.msra.mxu0 %v4464_v27 }
 0xa44   :  { %v1801_v9 = vadd.f32 1.0, %v4411_v15  ;;  %4180 = vmatprep.subr.bf16.mxu0 %v6187_v57 }
 0xa46   :  { %v1807_v40 = vmul.f32 0.5, %v1801_v9  ;;  %v5570_v54 = vpop.permute.xlu0 %1974 }
 0xa47   :  { %v4413_v35 = vpop.eup %4412  ;;  %4181 = vmatpush3.bf16.msra.mxu0 %v4465_v0 }
 0xa48   :  { %v1811_v3 = vpack.c.bf16 %v1807_v40, %v1806_v42  ;;  %4182 = vmatprep.subr.bf16.mxu0 %v6187_v57  ;;  %v1802_v63 = vadd.f32 1.0, %v4413_v35 }
 0xa4a   :  { %4147 = vmatmul.mubr.msk.bf16.gmra.mxu0 %vm578_vm6, %v1811_v3  ;;  %v1808_v50 = vmul.f32 0.5, %v1802_v63  ;;  %v5574_v41 = vpop.permute.xlu0 %2128 }
 0xa4b   :  { %v4415_v61 = vpop.eup %4414  ;;  %4150 = vmatprep.mubr.msk.bf16.mxu0 %vm4543_vm2, %v6187_v57  ;;  %4183 = vmatpush3.bf16.msra.mxu0 %v4466_v43 }
 0xa4c   :  { %v1803_v47 = vadd.f32 1.0, %v4415_v61  ;;  %4184 = vmatprep.subr.bf16.mxu0 %v6187_v57 }
 0xa4e   :  { %v1809_v26 = vmul.f32 0.5, %v1803_v47  ;;  %v5578_v27 = vpop.permute.xlu0 %2189 }
 0xa4f   :  { %4185 = vmatpush3.bf16.msra.mxu0 %v4467_v4 }
 0xa50   :  { %v1812_v5 = vpack.c.bf16 %v1809_v26, %v1808_v50  ;;  %4186 = vmatprep.subr.bf16.mxu0 %v6187_v57 }
 0xa52   :  { %4151 = vmatmul.mubr.msk.bf16.gmra.mxu0 %vm578_vm6, %v1812_v5  ;;  %v5582_v42 = vpop.permute.xlu0 %2311 }
 0xa53   :  { %4187 = vmatpush3.bf16.msra.mxu0 %v4468_v25  ;;  %4194 = vmatprep.mubr.msk.bf16.mxu0 %vm4543_vm2, %v6187_v57 }
 0xa54   :  { %4188 = vmatprep.subr.bf16.mxu0 %v6187_v57 }
 0xa56   :  { %v5586_v35 = vpop.permute.xlu0 %2360 }
 0xa57   :  { %4189 = vmatpush3.bf16.msra.mxu0 %v4469_v23 }
 0xa58   :  { %4190 = vmatprep.subr.bf16.mxu0 %v6187_v57 }
 0xa5a   :  { %v5590_v3 = vpop.permute.xlu0 %2250 }
 0xa5b   :  { %4191 = vmatpush3.bf16.msra.mxu0 %v4470_v44 }
 0xa5c   :  { %4192 = vmatprep.subr.bf16.mxu0 %v6187_v57 }
 0xa5e   :  { %v5594_v61 = vpop.permute.xlu0 %2427 }
 0xa5f   :  { %4193 = vmatpush3.bf16.msra.mxu0 %v4471_v17 }
 0xa60   :  { %4230 = vmatprep.subr.bf16.mxu0 %v6187_v57 }
 0xa62   :  { %v5598_v4 = vpop.permute.xlu0 %2494 }
 0xb02   :  { %v1856_v49 = vpop.f32.mrf.mxu0 }
 0xb03   :  { %v1879_v18 = vmul.f32 %v1856_v49, %v5385_v59 }
 0xb04   :  { %v4144_v10 = vpop.f32.mrf.mxu0 }
 0xb06   :  { %v1859_v34 = vpop.f32.mrf.mxu0 }
 0xb07   :  { %v1880_v33 = vmul.f32 %v1859_v34, %v5388_v48  ;;  %v5602_v34 = vpop.permute.xlu0 %2561 }
 0xb08   :  { %v4145_v56 = vpop.f32.mrf.mxu0 }
 0xb0a   :  { %v1864_v53 = vpop.f32.mrf.mxu0 }
 0xb0b   :  { %v1881_v38 = vmul.f32 %v1864_v53, %v5452_v36  ;;  %v1893_v36 = vpop.permute.xlu1 %1892 }
 0xb0c   :  { %v4148_v21 = vpop.f32.mrf.mxu0 }
 0xb0e   :  { %v1867_v13 = vpop.f32.mrf.mxu0 }
 0xb0f   :  { %v1882_v58 = vmul.f32 %v1867_v13, %v5455_v11  ;;  %v1960_v55 = vpop.permute.xlu1 %1959 }
 0xb10   :  { %v4149_v31 = vpop.f32.mrf.mxu0 }
 0xb11   :  { %v1888_v29 = vpack.c.bf16 %v1882_v58, %v1881_v38  ;;  %v5606_v31 = vpop.permute.xlu0 %2628 }
 0xb12   :  { %v1872_v19 = vpop.f32.mrf.mxu0 }
 0xb13   :  { %v1883_v32 = vmul.f32 %v1872_v19, %v5484_v39  ;;  %v1887_v39 = vpack.c.bf16 %v1880_v33, %v1879_v18  ;;  %v1970_v51 = vpop.permute.xlu1 %1969 }
 0xb14   :  { %v4152_v6 = vpop.f32.mrf.mxu0 }
 0xb15   :  { %v5610_v58 = vpop.permute.xlu0 %2138 }
 0xb16   :  { %v1875_v28 = vpop.f32.mrf.mxu0 }
 0xb17   :  { %v1884_v60 = vmul.f32 %v1875_v28, %v5486_v22  ;;  %v1885_v22 = vld [vmem:[%s6214_s1] sm:$0xf]  ;;  %v5572_v1 = vpop.permute.xlu1 %1979 }
 0xb18   :  { %v4153_v14 = vpop.f32.mrf.mxu0 }
 0xb19   :  { %v1889_v24 = vpack.c.bf16 %v1884_v60, %v1883_v32 }
 0xb1b   :  { %4155 = vmatpush3.bf16.msra.mxu1 %v1889_v24  ;;  %v5576_v15 = vpop.permute.xlu1 %2133 }
 0xb1c   :  { %4156 = vmatprep.subr.bf16.mxu1 %v6187_v57 }
 0xb1f   :  { %4157 = vmatpush3.bf16.msra.mxu1 %v1888_v29  ;;  %v5580_v9 = vpop.permute.xlu1 %2194 }
 0xb20   :  { %4158 = vmatprep.subr.bf16.mxu1 %v6187_v57 }
 0xb23   :  { %4159 = vmatpush3.bf16.msra.mxu1 %v1887_v39  ;;  %v5584_v40 = vpop.permute.xlu1 %2316 }
 0xb24   :  { %4164 = vmatprep.subr.bf16.mxu1 %v6187_v57 }
 0xb26   :  { %4161 = vmatmul.mubr.msk.bf16.vlgmr.msra.gmra.mxu1 %vm1622_vm7, %v1885_v22 }
 0xb27   :  { %4166 = vmatprep.mubr.msk.bf16.mxu1 %vm4543_vm2, %v6187_v57  ;;  %v5588_v0 = vpop.permute.xlu1 %2365 }
 0xb2b   :  { %v5592_v63 = vpop.permute.xlu1 %2255 }
 0xb2f   :  { %v5596_v47 = vpop.permute.xlu1 %2432 }
 0xb33   :  { %v5600_v17 = vpop.permute.xlu1 %2499 }
 0xb37   :  { %v5604_v21 = vpop.permute.xlu1 %2566 }
 0xb3b   :  { %v5608_v32 = vpop.permute.xlu1 %2633 }
 0xb3f   :  { %v5614_v22 = vpop.permute.xlu1 %2143 }
 0xbe6   :  { %v1932_v48 = vpop.f32.mrf.mxu1 }
 0xbe7   :  { %v1933_v11 = vadd.f32 %v1932_v48, %v1893_v36  ;;  %v5618_v48 = vpop.permute.xlu0 %2199 }
 0xbe8   :  { %v4162_v59 = vpop.f32.mrf.mxu1 }
 0xbe9   :  { %v5552_v46 = vadd.f32 %v1933_v11, %v6216_v16 }
 0xbea   :  { %v1935_v30 = vpop.f32.mrf.mxu1 }
 0xbeb   :  { %6217 = vst [vmem:[#allocation33_spill] sm:$0xff] %v5552_v46  ;;  %v1951_v7 = vpack.c.bf16 %v5552_v46, %v5552_v46  ;;  %v5626_v30 = vpop.permute.xlu1 %2204 }
 0xbec   :  { %v4163_v8 = vpop.f32.mrf.mxu1 }
 0xbed   :  { %v2007_v37 = vsel %vm174_vm0, %v1951_v7, 0  ;;  %v5628_v8 = vpop.permute.xlu0 %2321 }
 0xbee   :  { %4165 = vmatpush3.bf16.msra.mxu1 %v2007_v37 }
 0xbef   :  { %4206 = vmatprep.subr.bf16.mxu1 %v6187_v57  ;;  %v5634_v37 = vpop.permute.xlu1 %2326 }
 0xbf1   :  { %4167 = vmatmul.mubr.msk.bf16.vlgmr.msra.gmra.mxu1 %vm520_vm4, %v4344_v12  ;;  %v5640_v12 = vpop.permute.xlu0 %2370 }
 0xbf2   :  { %4170 = vmatprep.mubr.msk.bf16.mxu1 %vm4543_vm2, %v6187_v57 }
 0xbf9   :  { %4171 = vmatmul.mubr.msk.bf16.gmra.mxu1 %vm520_vm4, %v4345_v45  ;;  %v5646_v45 = vpop.permute.xlu1 %2375 }
 0xbfa   :  { %4174 = vmatprep.mubr.msk.bf16.mxu1 %vm4543_vm2, %v6187_v57 }
 0xc01   :  { %4175 = vmatmul.mubr.msk.bf16.gmra.mxu1 %vm520_vm4, %v4346_v2 }
 0xc02   :  { %4212 = vmatprep.mubr.msk.bf16.mxu1 %vm4543_vm2, %v6187_v57 }
 0xcb1   :  { %v2043_v43 = vpop.f32.mrf.mxu1 }
 0xcb2   :  { %v2044_v50 = vadd.f32 %v2043_v43, %v1955_v62  ;;  %v5648_v62 = vpop.permute.xlu0 %2260 }
 0xcb3   :  { %v4168_v26 = vpop.f32.mrf.mxu1 }
 0xcb4   :  { %v2066_v5 = vmul.f32 0.5, %v2044_v50 }
 0xcb5   :  { %v2046_v25 = vpop.f32.mrf.mxu1 }
 0xcb6   :  { %4416 = vtanh.f32 %v2066_v5  ;;  %v2047_v23 = vadd.f32 %v2046_v25, %v1960_v55  ;;  %v5660_v43 = vpop.permute.xlu0 %2437 }
 0xcb7   :  { %v4169_v44 = vpop.f32.mrf.mxu1 }
 0xcb8   :  { %v2067_v49 = vmul.f32 0.5, %v2047_v23 }
 0xcb9   :  { %v2051_v10 = vpop.f32.mrf.mxu1 }
 0xcba   :  { %4418 = vtanh.f32 %v2067_v49  ;;  %v2052_v39 = vadd.f32 %v2051_v10, %v1965_v52  ;;  %v5671_v49 = vpop.permute.xlu0 %2504 }
 0xcbb   :  { %v4172_v56 = vpop.f32.mrf.mxu1 }
 0xcbc   :  { %v2068_v59 = vmul.f32 0.5, %v2052_v39 }
 0xcbd   :  { %v2054_v53 = vpop.f32.mrf.mxu1 }
 0xcbe   :  { %v2055_v16 = vadd.f32 %v2054_v53, %v1970_v51  ;;  %4420 = vtanh.f32 %v2068_v59  ;;  %v5654_v51 = vpop.permute.xlu1 %2265 }
 0xcbf   :  { %v4173_v13 = vpop.f32.mrf.mxu1  ;;  %6218 = vst [vmem:[#allocation29_spill] sm:$0xff] %v5654_v51 }
 0xcc0   :  { %v2069_v7 = vmul.f32 0.5, %v2055_v16 }
 0xcc1   :  { %v2059_v19 = vpop.f32.mrf.mxu1 }
 0xcc2   :  { %4422 = vtanh.f32 %v2069_v7  ;;  %v5666_v5 = vpop.permute.xlu1 %2442  ;;  %v2060_v44 = vadd.f32 %v2059_v19, %v5570_v54  ;;  %v5686_v54 = vpop.permute.xlu0 %2571 }
 0xcc3   :  { %v4417_v6 = vpop.eup %4416  ;;  %v4176_v28 = vpop.f32.mrf.mxu1  ;;  %6219 = vst [vmem:[#allocation28_spill] sm:$0xff] %v5666_v5 }
 0xcc4   :  { %v2078_v60 = vadd.f32 1.0, %v4417_v6  ;;  %v2070_v56 = vmul.f32 0.5, %v2060_v44 }
 0xcc5   :  { %v2062_v14 = vpop.f32.mrf.mxu1 }
 0xcc6   :  { %v2084_v24 = vmul.f32 0.5, %v2078_v60  ;;  %v2063_v53 = vadd.f32 %v2062_v14, %v5572_v1  ;;  %v5680_v13 = vpop.permute.xlu1 %2509  ;;  %4424 = vtanh.f32 %v2070_v56  ;;  %v5694_v1 = vpop.permute.xlu0 %2682 }
 0xcc7   :  { %v4419_v38 = vpop.eup %4418  ;;  %v4177_v33 = vpop.f32.mrf.mxu1  ;;  %6220 = vst [vmem:[#allocation31_spill] sm:$0xff] %v5680_v13 }
 0xcc8   :  { %v5612_v29 = vmul.f32 %v2084_v24, %v2044_v50  ;;  %v2079_v18 = vadd.f32 1.0, %v4419_v38  ;;  %v2071_v19 = vmul.f32 0.5, %v2063_v53 }
 0xcca   :  { %v2085_v36 = vmul.f32 0.5, %v2079_v18  ;;  %2102 = vrot.lane.b32.xlu0 %v5612_v29, %s4546_s5  ;;  %v5692_v6 = vpop.permute.xlu1 %2576  ;;  %4426 = vtanh.f32 %v2071_v19  ;;  %v5706_v60 = vpop.permute.xlu0 %2638 }
 0xccb   :  { %v4421_v2 = vpop.eup %4420  ;;  %6221 = vst [vmem:[#allocation32_spill] sm:$0xff] %v5692_v6  ;;  %6222 = vst [vmem:[#allocation35_spill] sm:$0xff] %v5706_v60  ;;  %v3169_v6 = vld [vmem:[%s4737_s30 + $0x28] sm:$0xff]  ;;  %v5849_v60 = vld [vmem:[%s4587_s25 + $0x2] ss:$0 sm:$0xff] }
 0xccc   :  { %v5620_v11 = vmul.f32 %v2085_v36, %v2047_v23  ;;  %v2080_v55 = vadd.f32 1.0, %v4421_v2 }
 0xcce   :  { %2162 = vrot.lane.b32.xlu0 %v5612_v29, %s4545_s0  ;;  %2104 = vrot.lane.b32.xlu1 %v5620_v11, %s4546_s5  ;;  %v2086_v50 = vmul.f32 0.5, %v2080_v55  ;;  %v5700_v28 = vpop.permute.xlu1 %2687  ;;  %v5714_v18 = vpop.permute.xlu0 %2148  ;;  %v2389_v13 = vmul.f32 %v5588_v0, %v5620_v11 }
 0xccf   :  { %v4423_v52 = vpop.eup %4422  ;;  %6224 = vst [vmem:[#allocation30_spill] sm:$0xff] %v5714_v18 }
 0xcd0   :  { %v2081_v26 = vadd.f32 1.0, %v4423_v52  ;;  %v5668_v25 = vmul.f32 %v2086_v50, %v2052_v39 }
 0xcd2   :  { %2284 = vrot.lane.b32.xlu0 %v5612_v29, %s4548_s13  ;;  %2164 = vrot.lane.b32.xlu1 %v5620_v11, %s4545_s0  ;;  %v2087_v23 = vmul.f32 0.5, %v2081_v26  ;;  %v5712_v24 = vpop.permute.xlu1 %2643 }
 0xcd3   :  { %v4425_v14 = vpop.eup %4424  ;;  %6223 = vst [vmem:[#allocation34_spill] sm:$0xff] %v5712_v24  ;;  %v5840_v24 = vld [vmem:[%s4587_s25 + $0x6] ss:$0 sm:$0xff] }
 0xcd4   :  { %v5677_v10 = vmul.f32 %v2087_v23, %v2055_v16  ;;  %v2082_v38 = vadd.f32 1.0, %v4425_v14  ;;  %v5726_v16 = vpop.permute.xlu0 %2209 }
 0xcd5   :  { %6226 = vst [vmem:[#allocation55_spill] sm:$0xff] %v5726_v16 }
 0xcd6   :  { %2223 = vrot.lane.b32.xlu0 %v5612_v29, %s4550_s15  ;;  %2286 = vrot.lane.b32.xlu1 %v5620_v11, %s4548_s13  ;;  %v2088_v39 = vmul.f32 0.5, %v2082_v38  ;;  %v5720_v59 = vpop.permute.xlu1 %2153 }
 0xcd7   :  { %v4427_v33 = vpop.eup %4426  ;;  %6225 = vst [vmem:[#allocation36_spill] sm:$0xff] %v5720_v59  ;;  %v2754_v59 = vld [vmem:[%s6238_s7] sm:$0xff] }
 0xcd8   :  { %v2083_v36 = vadd.f32 1.0, %v4427_v33  ;;  %v5728_v7 = vmul.f32 %v2088_v39, %v2060_v44  ;;  %v5738_v50 = vpop.permute.xlu0 %2331  ;;  %v2100_v33 = vld [vmem:[%s6190_s23 + $0x20] sm:$0xff] }
 0xcd9   :  { %6230 = vst [vmem:[#allocation45_spill] sm:$0xff] %v5738_v50 }
 0xcda   :  { %2400 = vrot.lane.b32.xlu0 %v5612_v29, %s4547_s9  ;;  %2225 = vrot.lane.b32.xlu1 %v5620_v11, %s4550_s15  ;;  %6227 = vst [vmem:[#allocation56_spill] sm:$0xff] %v5728_v7  ;;  %v2089_v2 = vmul.f32 0.5, %v2083_v36  ;;  %v5734_v55 = vpop.permute.xlu1 %2214  ;;  %v2747_v36 = vld [vmem:[%s6235_s2] sm:$0x3] }
 0xcdb   :  { %6228 = vst [vmem:[#allocation39_spill] sm:$0xff] %v5734_v55  ;;  %v3091_v55 = vld [vmem:[%s6243_s10] sm:$0xff] }
 0xcdc   :  { %v5736_v52 = vmul.f32 %v2089_v2, %v2063_v53  ;;  %v5750_v23 = vpop.permute.xlu0 %2380  ;;  %v2101_v2 = vld [vmem:[%s6190_s23 + $0x28] sm:$0xff] }
 0xcdd   :  { %6232 = vst [vmem:[#allocation46_spill] sm:$0xff] %v5750_v23  ;;  %v5820_v23 = vld [vmem:[%s4587_s25 + $0x1] ss:$0 sm:$0xff] }
 0xcde   :  { %2467 = vrot.lane.b32.xlu0 %v5612_v29, %s4551_s16  ;;  %2402 = vrot.lane.b32.xlu1 %v5620_v11, %s4547_s9  ;;  %6229 = vst [vmem:[#allocation40_spill] sm:$0xff] %v5736_v52  ;;  %v5744_v26 = vpop.permute.xlu1 %2336 }
 0xcdf   :  { %6231 = vst [vmem:[#allocation42_spill] sm:$0xff] %v5744_v26 }
 0xce0   :  { %v5758_v56 = vpop.permute.xlu0 %2270 }
 0xce1   :  { %6234 = vst [vmem:[#allocation43_spill] sm:$0xff] %v5758_v56 }
 0xce2   :  { %2534 = vrot.lane.b32.xlu0 %v5612_v29, %s4549_s29  ;;  %2469 = vrot.lane.b32.xlu1 %v5620_v11, %s4551_s16  ;;  %v5756_v44 = vpop.permute.xlu1 %2385 }
 0xce3   :  { %6233 = vst [vmem:[#allocation37_spill] sm:$0xff] %v5756_v44  ;;  %v3170_v44 = vld [vmem:[%s4737_s30 + $0x30] sm:$0xff] }
 0xce4   :  { %v5770_v19 = vpop.permute.xlu0 %2447 }
 0xce5   :  { %6237 = vst [vmem:[#allocation41_spill] sm:$0xff] %v5770_v19 }
 0xce6   :  { %2601 = vrot.lane.b32.xlu0 %v5612_v29, %s4552_s3  ;;  %2536 = vrot.lane.b32.xlu1 %v5620_v11, %s4549_s29  ;;  %v5764_v53 = vpop.permute.xlu1 %2275 }
 0xce7   :  { %6236 = vst [vmem:[#allocation49_spill] sm:$0xff] %v5764_v53  ;;  %v2755_v53 = vld [vmem:[%s6238_s7 + $0x8] sm:$0xff] }
 0xce8   :  { %v5778_v38 = vpop.permute.xlu0 %2514 }
 0xce9   :  { %6240 = vst [vmem:[#allocation47_spill] sm:$0xff] %v5778_v38 }
 0xcea   :  { %2603 = vrot.lane.b32.xlu1 %v5620_v11, %s4552_s3  ;;  %2106 = vrot.lane.b32.xlu0 %v5668_v25, %s4546_s5  ;;  %v5776_v14 = vpop.permute.xlu1 %2452  ;;  %v3164_v11 = vld [vmem:[%s4737_s30] sm:$0xff] }
 0xceb   :  { %6239 = vst [vmem:[#allocation53_spill] sm:$0xff] %v5776_v14 }
 0xcec   :  { %v5791_v46 = vpop.permute.xlu0 %2581 }
 0xced   :  { %6242 = vst [vmem:[#allocation57_spill] sm:$0xff] %v5791_v46  ;;  %v3176_v46 = vld [vmem:[%s4737_s30 + $0x60] sm:$0xff] }
 0xcee   :  { %2166 = vrot.lane.b32.xlu0 %v5668_v25, %s4545_s0  ;;  %2108 = vrot.lane.b32.xlu1 %v5677_v10, %s4546_s5  ;;  %v5785_v39 = vpop.permute.xlu1 %2519 }
 0xcef   :  { %6241 = vst [vmem:[#allocation51_spill] sm:$0xff] %v5785_v39  ;;  %v2756_v39 = vld [vmem:[%s6238_s7 + $0x10] sm:$0xff] }
 0xcf0   :  { %v5797_v26 = vpop.permute.xlu0 %2692 }
 0xcf1   :  { %6245 = vst [vmem:[#allocation50_spill] sm:$0xff] %v5797_v26  ;;  %v5835_v26 = vld [vmem:[%s4587_s25 + $0x5] ss:$0 sm:$0xff] }
 0xcf2   :  { %2288 = vrot.lane.b32.xlu0 %v5668_v25, %s4548_s13  ;;  %2168 = vrot.lane.b32.xlu1 %v5677_v10, %s4545_s0  ;;  %v5795_v14 = vpop.permute.xlu1 %2586 }
 0xcf3   :  { %6244 = vst [vmem:[#allocation44_spill] sm:$0xff] %v5795_v14  ;;  %v3178_v14 = vld [vmem:[%s4737_s30 + $0x70] sm:$0xff] }
 0xcf4   :  { %v5805_v56 = vpop.permute.xlu0 %2648 }
 0xcf5   :  { %6247 = vst [vmem:[#allocation38_spill] sm:$0xff] %v5805_v56  ;;  %v3174_v56 = vld [vmem:[%s4737_s30 + $0x50] sm:$0xff] }
 0xcf6   :  { %2227 = vrot.lane.b32.xlu0 %v5668_v25, %s4550_s15  ;;  %2290 = vrot.lane.b32.xlu1 %v5677_v10, %s4548_s13  ;;  %v5801_v38 = vpop.permute.xlu1 %2697 }
 0xcf7   :  { %6246 = vst [vmem:[#allocation54_spill] sm:$0xff] %v5801_v38  ;;  %v5826_v38 = vld [vmem:[%s4587_s25] ss:$0 sm:$0xff] }
 0xcfa   :  { %2404 = vrot.lane.b32.xlu0 %v5668_v25, %s4547_s9  ;;  %2229 = vrot.lane.b32.xlu1 %v5677_v10, %s4550_s15 }
 0xcfe   :  { %2471 = vrot.lane.b32.xlu0 %v5668_v25, %s4551_s16  ;;  %2406 = vrot.lane.b32.xlu1 %v5677_v10, %s4547_s9 }
 0xd02   :  { %2538 = vrot.lane.b32.xlu0 %v5668_v25, %s4549_s29  ;;  %2473 = vrot.lane.b32.xlu1 %v5677_v10, %s4551_s16 }
 0xd06   :  { %2605 = vrot.lane.b32.xlu0 %v5668_v25, %s4552_s3  ;;  %2540 = vrot.lane.b32.xlu1 %v5677_v10, %s4549_s29 }
 0xd0a   :  { %2607 = vrot.lane.b32.xlu1 %v5677_v10, %s4552_s3  ;;  %2110 = vrot.lane.b32.xlu0 %v5728_v7, %s4546_s5 }
 0xd0e   :  { %2170 = vrot.lane.b32.xlu0 %v5728_v7, %s4545_s0  ;;  %2112 = vrot.lane.b32.xlu1 %v5736_v52, %s4546_s5  ;;  %s4553_s5 = smov [#allocation2]  }
 0xd12   :  { %2292 = vrot.lane.b32.xlu0 %v5728_v7, %s4548_s13  ;;  %2172 = vrot.lane.b32.xlu1 %v5736_v52, %s4545_s0  ;;  %s6283_s0 = sld [smem:[#allocation25_spill]] }
 0xd16   :  { %2231 = vrot.lane.b32.xlu0 %v5728_v7, %s4550_s15  ;;  %2294 = vrot.lane.b32.xlu1 %v5736_v52, %s4548_s13 }
 0xd1a   :  { %2408 = vrot.lane.b32.xlu0 %v5728_v7, %s4547_s9  ;;  %2233 = vrot.lane.b32.xlu1 %v5736_v52, %s4550_s15 }
 0xd1e   :  { %2475 = vrot.lane.b32.xlu0 %v5728_v7, %s4551_s16  ;;  %2410 = vrot.lane.b32.xlu1 %v5736_v52, %s4547_s9 }
 0xd22   :  { %2542 = vrot.lane.b32.xlu0 %v5728_v7, %s4549_s29  ;;  %2477 = vrot.lane.b32.xlu1 %v5736_v52, %s4551_s16 }
 0xd26   :  { %2609 = vrot.lane.b32.xlu0 %v5728_v7, %s4552_s3  ;;  %2544 = vrot.lane.b32.xlu1 %v5736_v52, %s4549_s29  ;;  %v3171_v7 = vld [vmem:[%s4737_s30 + $0x38] sm:$0xff] }
 0xd2a   :  { %2702 = vperm.xlu0 %4328, %v2100_v33   ;;  %2611 = vrot.lane.b32.xlu1 %v5736_v52, %s4552_s3  ;;  %v2757_v33 = vld [vmem:[%s6238_s7 + $0x18] sm:$0xff] }
 0xd2e   :  { %2825 = vperm.xlu0 %4328, %v2747_v36   ;;  %2707 = vperm.xlu1 %4329, %v2101_v2   ;;  %v2759_v36 = vld [vmem:[%s6238_s7 + $0x28] sm:$0xff]  ;;  %v2758_v2 = vld [vmem:[%s6238_s7 + $0x20] sm:$0xff] }
 0xd32   :  { %2884 = vperm.xlu0 %4328, %v2755_v53   ;;  %2879 = vperm.xlu1 %4329, %v2754_v59   ;;  %v5809_v53 = vpop.permute.xlu1 %2653 }
 0xd33   :  { %6248 = vst [vmem:[#allocation48_spill] sm:$0xff] %v5809_v53  ;;  %v3172_v53 = vld [vmem:[%s4737_s30 + $0x40] sm:$0xff] }
 0xd36   :  { %2894 = vperm.xlu0 %4328, %v2757_v33   ;;  %2889 = vperm.xlu1 %4329, %v2756_v39   ;;  %v3179_v33 = vld [vmem:[%s4737_s30 + $0x78] sm:$0xff] }
 0xd3a   :  { %2904 = vperm.xlu0 %4328, %v2759_v36   ;;  %2899 = vperm.xlu1 %4329, %v2758_v2   ;;  %v3177_v36 = vld [vmem:[%s4737_s30 + $0x68] sm:$0xff] }
 0xd3c   :  { %v2103_v59 = vpop.permute.xlu0 %2102 }
 0xd3e   :  { %3278 = vperm.xlu0 %4328, %v3178_v14   ;;  %3097 = vperm.xlu1 %4329, %v3091_v55   ;;  %v3175_v14 = vld [vmem:[%s4737_s30 + $0x58] sm:$0xff] }
 0xd40   :  { %v2163_v39 = vpop.permute.xlu0 %2162  ;;  %v2105_v19 = vpop.permute.xlu1 %2104 }
 0xd42   :  { %3268 = vperm.xlu0 %4328, %v3176_v46   ;;  %3283 = vperm.xlu1 %4329, %v3179_v33   ;;  %v3173_v46 = vld [vmem:[%s4737_s30 + $0x48] sm:$0xff] }
 0xd44   :  { %v2285_v2 = vpop.permute.xlu0 %2284  ;;  %v2165_v50 = vpop.permute.xlu1 %2164 }
 0xd46   :  { %3258 = vperm.xlu0 %4328, %v3174_v56   ;;  %3273 = vperm.xlu1 %4329, %v3177_v36   ;;  %v2174_v56 = vmul.f32 %v5820_v23, %v2163_v39  ;;  %v3168_v36 = vld [vmem:[%s4737_s30 + $0x20] sm:$0xff] }
 0xd48   :  { %v2224_v55 = vpop.permute.xlu0 %2223  ;;  %v2287_v18 = vpop.permute.xlu1 %2286  ;;  %v2217_v57 = vmul.f32 %v5578_v27, %v2174_v56 }
 0xd4a   :  { %3248 = vperm.xlu0 %4328, %v3172_v53   ;;  %3263 = vperm.xlu1 %4329, %v3175_v14   ;;  %v2114_v14 = vmul.f32 %v5826_v38, %v2103_v59  ;;  %v3166_v59 = vld [vmem:[%s4737_s30 + $0x10] sm:$0xff] }
 0xd4c   :  { %v2401_v33 = vpop.permute.xlu0 %2400  ;;  %v2226_v52 = vpop.permute.xlu1 %2225  ;;  %v2156_v56 = vmul.f32 %v5574_v41, %v2114_v14  ;;  %v3167_v14 = vld [vmem:[%s4737_s30 + $0x18] sm:$0xff] }
 0xd4d   :  { %v2412_v39 = vmul.f32 %v5835_v26, %v2401_v33  ;;  %v2235_v33 = vmul.f32 %v5849_v60, %v2224_v55 }
 0xd4e   :  { %3238 = vperm.xlu0 %4328, %v3170_v44   ;;  %3253 = vperm.xlu1 %4329, %v3173_v46   ;;  %v2296_v44 = vmul.f32 %v5830_v20, %v2285_v2  ;;  %v2175_v46 = vmul.f32 %v5820_v23, %v2165_v50  ;;  %v2388_v2 = vmul.f32 %v5586_v35, %v5612_v29  ;;  %v5858_v35 = vld [vmem:[%s4587_s25 + $0x7] ss:$0 sm:$0xff] }
 0xd4f   :  { %v2115_v50 = vmul.f32 %v5826_v38, %v2105_v19  ;;  %v2455_v55 = vmul.f32 %v5594_v61, %v2412_v39 }
 0xd50   :  { %v2468_v16 = vpop.permute.xlu0 %2467  ;;  %v2403_v53 = vpop.permute.xlu1 %2402  ;;  %v2218_v19 = vmul.f32 %v5580_v9, %v2175_v46  ;;  %v2394_v5 = vadd.f32 %v2388_v2, %v2217_v57  ;;  %v2278_v9 = vmul.f32 %v5590_v3, %v2235_v33  ;;  %v3165_v33 = vld [vmem:[%s4737_s30 + $0x8] sm:$0xff] }
 0xd51   :  { %v2479_v51 = vmul.f32 %v5840_v24, %v2468_v16  ;;  %v2339_v16 = vmul.f32 %v5582_v42, %v2296_v44  ;;  %v2157_v44 = vmul.f32 %v5576_v15, %v2115_v50 }
 0xd52   :  { %3228 = vperm.xlu0 %4328, %v3168_v36   ;;  %3243 = vperm.xlu1 %4329, %v3171_v7   ;;  %v2297_v7 = vmul.f32 %v5830_v20, %v2287_v18  ;;  %v2413_v18 = vmul.f32 %v5835_v26, %v2403_v53  ;;  %v2236_v53 = vmul.f32 %v5849_v60, %v2226_v52 }
 0xd53   :  { %v2522_v41 = vmul.f32 %v5598_v4, %v2479_v51  ;;  %v2345_v57 = vadd.f32 %v2339_v16, %v2156_v56  ;;  %v5874_v51 = vld [vmem:[%s4587_s25 + $0x8] ss:$0 sm:$0xff]  ;;  %v2461_v15 = vadd.f32 %v2455_v55, %v2278_v9  ;;  %v3180_v55 = vld [vmem:[%s4737_s30 + $0x80] sm:$0xff]  ;;  %s6280_s25 = sld [smem:[#allocation19_spill]] }
 0xd54   :  { %v2535_v36 = vpop.permute.xlu0 %2534  ;;  %v2470_v27 = vpop.permute.xlu1 %2469  ;;  %v2340_v61 = vmul.f32 %v5584_v40, %v2297_v7  ;;  %v2456_v3 = vmul.f32 %v5596_v47, %v2413_v18  ;;  %v3183_v18 = vld [vmem:[%s4737_s30 + $0x98] sm:$0xff]  ;;  %v3181_v9 = vld [vmem:[%s4737_s30 + $0x88] sm:$0xff] }
 0xd55   :  { %v2546_v29 = vmul.f32 %v5858_v35, %v2535_v36  ;;  %v2480_v0 = vmul.f32 %v5840_v24, %v2470_v27  ;;  %v2528_v40 = vadd.f32 %v2522_v41, %v2345_v57  ;;  %v2279_v36 = vmul.f32 %v5592_v63, %v2236_v53 }
 0xd56   :  { %3218 = vperm.xlu0 %4328, %v3166_v59   ;;  %3233 = vperm.xlu1 %4329, %v3169_v6   ;;  %v2395_v59 = vadd.f32 %v2389_v13, %v2218_v19  ;;  %v2346_v7 = vadd.f32 %v2340_v61, %v2157_v44 }
 0xd57   :  { %v2589_v42 = vmul.f32 %v5602_v34, %v2546_v29  ;;  %v2523_v52 = vmul.f32 %v5600_v17, %v2480_v0  ;;  %v2462_v17 = vadd.f32 %v2456_v3, %v2279_v36 }
 0xd58   :  { %v2602_v46 = vpop.permute.xlu0 %2601  ;;  %v2537_v6 = vpop.permute.xlu1 %2536 }
 0xd59   :  { %v2595_v4 = vadd.f32 %v2589_v42, %v2394_v5  ;;  %v2613_v34 = vmul.f32 %v5874_v51, %v2602_v46  ;;  %v2547_v39 = vmul.f32 %v5858_v35, %v2537_v6  ;;  %v3182_v5 = vld [vmem:[%s4737_s30 + $0x90] sm:$0xff]  ;;  %s6281_s30 = sld [smem:[#allocation21_spill]] }
 0xd5a   :  { %3208 = vperm.xlu0 %4328, %v3164_v11   ;;  %3223 = vperm.xlu1 %4329, %v3167_v14  }
 0xd5b   :  { %v2656_v2 = vmul.f32 %v5606_v31, %v2613_v34  ;;  %v2590_v50 = vmul.f32 %v5604_v21, %v2547_v39  ;;  %v2668_v56 = vadd.f32 %v2595_v4, %v2528_v40  ;;  %v2529_v31 = vadd.f32 %v2523_v52, %v2346_v7 }
 0xd5c   :  { %v2604_v13 = vpop.permute.xlu1 %2603  ;;  %v2107_v27 = vpop.permute.xlu0 %2106 }
 0xd5d   :  { %v2662_v47 = vadd.f32 %v2656_v2, %v2461_v15  ;;  %v2596_v16 = vadd.f32 %v2590_v50, %v2395_v59  ;;  %v2614_v29 = vmul.f32 %v5874_v51, %v2604_v13  ;;  %v2116_v3 = vmul.f32 %v5826_v38, %v2107_v27 }
 0xd5e   :  { %3298 = vperm.xlu0 %4328, %v3182_v5   ;;  %3213 = vperm.xlu1 %4329, %v3165_v33   ;;  %v2390_v33 = vmul.f32 %v5640_v12, %v5668_v25  ;;  %v2391_v13 = vmul.f32 %v5646_v45, %v5677_v10 }
 0xd5f   :  { %v2674_v21 = vadd.f32 %v2668_v56, %v2662_v47  ;;  %v2657_v19 = vmul.f32 %v5608_v32, %v2614_v29  ;;  %v2669_v0 = vadd.f32 %v2596_v16, %v2529_v31  ;;  %v2158_v16 = vmul.f32 %v5610_v58, %v2116_v3 }
 0xd60   :  { %v2167_v41 = vpop.permute.xlu0 %2166  ;;  %v2109_v42 = vpop.permute.xlu1 %2108 }
 0xd61   :  { %v5890_v63 = vadd.f32 %v5694_v1, %v2674_v21  ;;  %v2663_v11 = vadd.f32 %v2657_v19, %v2462_v17  ;;  %v2176_v34 = vmul.f32 %v5820_v23, %v2167_v41  ;;  %v2117_v52 = vmul.f32 %v5826_v38, %v2109_v42 }
 0xd62   :  { %3288 = vperm.xlu0 %4328, %v3180_v55   ;;  %3303 = vperm.xlu1 %4329, %v3183_v18  }
 0xd63   :  { %v2716_v14 = vmul.f32 0.5, %v5890_v63  ;;  %v2675_v44 = vadd.f32 %v2669_v0, %v2663_v11  ;;  %v2219_v40 = vmul.f32 %v5618_v48, %v2176_v34  ;;  %v2159_v17 = vmul.f32 %v5614_v22, %v2117_v52 }
 0xd64   :  { %v2289_v61 = vpop.permute.xlu0 %2288  ;;  %v2169_v53 = vpop.permute.xlu1 %2168 }
 0xd65   :  { %4428 = vtanh.f32 %v2716_v14  ;;  %v2711_v32 = vadd.f32 %v5700_v28, %v2675_v44  ;;  %v2298_v39 = vmul.f32 %v5830_v20, %v2289_v61  ;;  %v2177_v2 = vmul.f32 %v5820_v23, %v2169_v53  ;;  %v6249_v61 = vld [vmem:[#allocation28_spill] sm:$0xff] }
 0xd66   :  { %3293 = vperm.xlu1 %4329, %v3181_v9   ;;  %v2396_v29 = vadd.f32 %v2390_v33, %v2219_v40 }
 0xd67   :  { %v2717_v46 = vmul.f32 0.5, %v2711_v32  ;;  %v2341_v7 = vmul.f32 %v5628_v8, %v2298_v39  ;;  %v2220_v8 = vmul.f32 %v5626_v30, %v2177_v2 }
 0xd68   :  { %v2228_v6 = vpop.permute.xlu0 %2227  ;;  %v2291_v57 = vpop.permute.xlu1 %2290 }
 0xd69   :  { %4430 = vtanh.f32 %v2717_v46  ;;  %v2237_v48 = vmul.f32 %v5849_v60, %v2228_v6  ;;  %v2299_v27 = vmul.f32 %v5830_v20, %v2291_v57  ;;  %v2347_v19 = vadd.f32 %v2341_v7, %v2158_v16  ;;  %v6256_v16 = vld [vmem:[#allocation50_spill] sm:$0xff] }
 0xd6a   :  { %v2397_v44 = vadd.f32 %v2391_v13, %v2220_v8  ;;  %v6258_v8 = vmov 0  }
 0xd6b   :  { %v2280_v22 = vmul.f32 %v5648_v62, %v2237_v48  ;;  %v2342_v41 = vmul.f32 %v5634_v37, %v2299_v27  ;;  %v6250_v62 = vld [vmem:[#allocation31_spill] sm:$0xff] }
 0xd6c   :  { %v2405_v1 = vpop.permute.xlu0 %2404  ;;  %v2230_v4 = vpop.permute.xlu1 %2229  ;;  %v6251_v37 = vld [vmem:[#allocation35_spill] sm:$0xff] }
 0xd6d   :  { %v2414_v50 = vmul.f32 %v5835_v26, %v2405_v1  ;;  %v2238_v42 = vmul.f32 %v5849_v60, %v2230_v4  ;;  %v6252_v1 = vld [vmem:[#allocation32_spill] sm:$0xff]  ;;  %v2348_v39 = vadd.f32 %v2342_v41, %v2159_v17  ;;  %v6257_v17 = vld [vmem:[#allocation26_spill] sm:$0xff] }
 0xd6f   :  { %v2457_v25 = vmul.f32 %v5660_v43, %v2414_v50 }
 0xd70   :  { %v2472_v59 = vpop.permute.xlu0 %2471  ;;  %v2407_v15 = vpop.permute.xlu1 %2406 }
 0xd71   :  { %v2481_v5 = vmul.f32 %v5840_v24, %v2472_v59  ;;  %v2415_v10 = vmul.f32 %v5835_v26, %v2407_v15  ;;  %v2463_v9 = vadd.f32 %v2457_v25, %v2280_v22  ;;  %v6253_v59 = vld [vmem:[#allocation29_spill] sm:$0xff] }
 0xd72   :  { %v4429_v28 = vpop.eup %4428  ;;  %v2281_v15 = vmul.f32 %v6253_v59, %v2238_v42  ;;  %v6265_v59 = vld [vmem:[#allocation30_spill] sm:$0xff] }
 0xd73   :  { %v2728_v36 = vadd.f32 1.0, %v4429_v28  ;;  %v2524_v45 = vmul.f32 %v5671_v49, %v2481_v5  ;;  %v2458_v53 = vmul.f32 %v6249_v61, %v2415_v10  ;;  %v6259_v10 = vld [vmem:[#allocation54_spill] sm:$0xff] }
 0xd74   :  { %v2539_v56 = vpop.permute.xlu0 %2538  ;;  %v2474_v47 = vpop.permute.xlu1 %2473 }
 0xd75   :  { %v2548_v31 = vmul.f32 %v5858_v35, %v2539_v56  ;;  %v2482_v58 = vmul.f32 %v5840_v24, %v2474_v47  ;;  %v2734_v18 = vmul.f32 0.5, %v2728_v36  ;;  %v2464_v5 = vadd.f32 %v2458_v53, %v2281_v15  ;;  %v6254_v36 = vld [vmem:[#allocation34_spill] sm:$0xff]  ;;  %v6261_v53 = vld [vmem:[#allocation56_spill] sm:$0xff] }
 0xd76   :  { %v4431_v12 = vpop.eup %4430  ;;  %v6255_v47 = vmov 0.0  }
 0xd77   :  { %v2729_v21 = vadd.f32 1.0, %v4431_v12  ;;  %v2591_v55 = vmul.f32 %v5686_v54, %v2548_v31  ;;  %v2530_v54 = vadd.f32 %v2524_v45, %v2347_v19  ;;  %v2525_v6 = vmul.f32 %v6250_v62, %v2482_v58  ;;  %v6262_v62 = vld [vmem:[#allocation46_spill] sm:$0xff] }
 0xd78   :  { %v2606_v30 = vpop.permute.xlu0 %2605  ;;  %v2541_v0 = vpop.permute.xlu1 %2540  ;;  %v5931_v34 = vmul.f32 %v2734_v18, %v5890_v63 }
 0xd79   :  { %v2735_v43 = vmul.f32 0.5, %v2729_v21  ;;  %v2597_v11 = vadd.f32 %v2591_v55, %v2396_v29  ;;  %v2615_v49 = vmul.f32 %v5874_v51, %v2606_v30  ;;  %v2549_v14 = vmul.f32 %v5858_v35, %v2541_v0 }
 0xd7a   :  { %v2531_v33 = vadd.f32 %v2525_v6, %v2348_v39  ;;  %v2392_v6 = vmul.f32 %v6262_v62, %v6261_v53  ;;  %v6278_v62 = vld [vmem:[#allocation51_spill] sm:$0xff] }
 0xd7b   :  { %v5925_v46 = vmul.f32 %v2735_v43, %v2711_v32  ;;  %v2658_v57 = vmul.f32 %v6251_v37, %v2615_v49  ;;  %v2592_v4 = vmul.f32 %v6252_v1, %v2549_v14  ;;  %v2670_v52 = vadd.f32 %v2597_v11, %v2530_v54  ;;  %v6260_v11 = vld [vmem:[#allocation55_spill] sm:$0xff]  ;;  %v6263_v37 = vld [vmem:[#allocation40_spill] sm:$0xff] }
 0xd7c   :  { %v2608_v3 = vpop.permute.xlu1 %2607  ;;  %v2111_v40 = vpop.permute.xlu0 %2110 }
 0xd7d   :  { %v2664_v28 = vadd.f32 %v2658_v57, %v2463_v9  ;;  %v2598_v2 = vadd.f32 %v2592_v4, %v2397_v44  ;;  %v2616_v32 = vmul.f32 %v5874_v51, %v2608_v3  ;;  %v2760_v50 = vpack.c.bf16 %v5925_v46, %v5931_v34  ;;  %v6264_v57 = vld [vmem:[#allocation37_spill] sm:$0xff] }
 0xd7e   :  { %v2118_v43 = vmul.f32 %v5826_v38, %v2111_v40  ;;  %v2393_v1 = vmul.f32 %v6264_v57, %v6263_v37  ;;  %v6279_v37 = vld [vmem:[#allocation48_spill] sm:$0xff] }
 0xd7f   :  { %v2676_v7 = vadd.f32 %v2670_v52, %v2664_v28  ;;  %v2659_v13 = vmul.f32 %v6254_v36, %v2616_v32  ;;  %4195 = vmatmul.mubr.bf16.vlgmr.msra.gmra.mxu0 %v2760_v50  ;;  %v2671_v27 = vadd.f32 %v2598_v2, %v2531_v33 }
 0xd80   :  { %v2171_v63 = vpop.permute.xlu0 %2170  ;;  %v2113_v48 = vpop.permute.xlu1 %2112  ;;  %4198 = vmatprep.mubr.msk.bf16.mxu0 %vm4543_vm2, %v6255_v47  ;;  %4231 = vmatpush3.bf16.msra.mxu0 %v6257_v17  ;;  %v2160_v15 = vmul.f32 %v6265_v59, %v2118_v43 }
 0xd81   :  { %v2665_v56 = vadd.f32 %v2659_v13, %v2464_v5  ;;  %v2712_v29 = vadd.f32 %v6256_v16, %v2676_v7  ;;  %3512 = vmatprep.subr.bf16.mxu0 %v6258_v8  ;;  %v2178_v41 = vmul.f32 %v5820_v23, %v2171_v63  ;;  %v2119_v2 = vmul.f32 %v5826_v38, %v2113_v48  ;;  %v6266_v7 = vld [vmem:[#allocation45_spill] sm:$0xff]  ;;  %v6269_v38 = vld [vmem:[#allocation39_spill] sm:$0xff] }
 0xd82   :  { %v6267_v63 = vld [vmem:[#allocation41_spill] sm:$0xff] }
 0xd83   :  { %v2677_v31 = vadd.f32 %v2671_v27, %v2665_v56  ;;  %v2718_v12 = vmul.f32 0.5, %v2712_v29  ;;  %v2221_v49 = vmul.f32 %v6260_v11, %v2178_v41  ;;  %v6268_v16 = vld [vmem:[#allocation57_spill] sm:$0xff] }
 0xd84   :  { %v2293_v25 = vpop.permute.xlu0 %2292  ;;  %v2173_v45 = vpop.permute.xlu1 %2172 }
 0xd85   :  { %v2713_v21 = vadd.f32 %v6259_v10, %v2677_v31  ;;  %4432 = vtanh.f32 %v2718_v12  ;;  %v2300_v54 = vmul.f32 %v5830_v20, %v2293_v25  ;;  %v2179_v3 = vmul.f32 %v5820_v23, %v2173_v45  ;;  %v6270_v25 = vld [vmem:[#allocation43_spill] sm:$0xff] }
 0xd86   :  { %v2398_v28 = vadd.f32 %v2392_v6, %v2221_v49  ;;  %v6274_v49 = vld [vmem:[#allocation53_spill] sm:$0xff] }
 0xd87   :  { %v2719_v19 = vmul.f32 0.5, %v2713_v21  ;;  %v2343_v36 = vmul.f32 %v6266_v7, %v2300_v54  ;;  %v2222_v48 = vmul.f32 %v6269_v38, %v2179_v3 }
 0xd88   :  { %v2232_v55 = vpop.permute.xlu0 %2231  ;;  %v2295_v58 = vpop.permute.xlu1 %2294 }
 0xd89   :  { %4434 = vtanh.f32 %v2719_v19  ;;  %v2239_v40 = vmul.f32 %v5849_v60, %v2232_v55  ;;  %v2301_v13 = vmul.f32 %v5830_v20, %v2295_v58  ;;  %v6271_v19 = vld [vmem:[#allocation47_spill] sm:$0xff]  ;;  %v6272_v58 = vld [vmem:[#allocation38_spill] sm:$0xff] }
 0xd8b   :  { %v2282_v45 = vmul.f32 %v6270_v25, %v2239_v40 }
 0xd8c   :  { %v2409_v18 = vpop.permute.xlu0 %2408  ;;  %v2234_v22 = vpop.permute.xlu1 %2233 }
 0xd8d   :  { %v2416_v61 = vmul.f32 %v5835_v26, %v2409_v18  ;;  %v2240_v10 = vmul.f32 %v5849_v60, %v2234_v22  ;;  %v6275_v22 = vld [vmem:[#allocation44_spill] sm:$0xff] }
 0xd8f   :  { %v2459_v27 = vmul.f32 %v6267_v63, %v2416_v61  ;;  %v6277_v61 = vld [vmem:[#allocation49_spill] sm:$0xff] }
 0xd90   :  { %v2476_v42 = vpop.permute.xlu0 %2475  ;;  %v2411_v30 = vpop.permute.xlu1 %2410 }
 0xd91   :  { %v2483_v52 = vmul.f32 %v5840_v24, %v2476_v42  ;;  %v2417_v23 = vmul.f32 %v5835_v26, %v2411_v30  ;;  %v2349_v30 = vadd.f32 %v2343_v36, %v2160_v15  ;;  %v2465_v43 = vadd.f32 %v2459_v27, %v2282_v45 }
 0xd92   :  { %v4433_v0 = vpop.eup %4432 }
 0xd93   :  { %v2730_v9 = vadd.f32 1.0, %v4433_v0  ;;  %v2526_v55 = vmul.f32 %v6271_v19, %v2483_v52 }
 0xd94   :  { %v2543_v14 = vpop.permute.xlu0 %2542  ;;  %v2478_v44 = vpop.permute.xlu1 %2477 }
 0xd95   :  { %v2550_v4 = vmul.f32 %v5858_v35, %v2543_v14  ;;  %v2736_v33 = vmul.f32 0.5, %v2730_v9  ;;  %v2484_v20 = vmul.f32 %v5840_v24, %v2478_v44  ;;  %v2460_v14 = vmul.f32 %v6274_v49, %v2417_v23  ;;  %v6276_v44 = vld [vmem:[#allocation36_spill] sm:$0xff] }
 0xd96   :  { %v4435_v39 = vpop.eup %4434  ;;  %v2161_v54 = vmul.f32 %v6276_v44, %v2119_v2  ;;  %v2532_v53 = vadd.f32 %v2526_v55, %v2349_v30 }
 0xd97   :  { %v2731_v5 = vadd.f32 1.0, %v4435_v39  ;;  %v2593_v17 = vmul.f32 %v6268_v16, %v2550_v4  ;;  %v5972_v42 = vmul.f32 %v2736_v33, %v2712_v29  ;;  %v2399_v29 = vadd.f32 %v2393_v1, %v2222_v48 }
 0xd98   :  { %v2610_v32 = vpop.permute.xlu0 %2609  ;;  %v2545_v50 = vpop.permute.xlu1 %2544  ;;  %v2527_v6 = vmul.f32 %v6278_v62, %v2484_v20  ;;  %v4347_v62 = vld [vmem:[%s6281_s30] sm:$0xff]  }
 0xd99   :  { %v2617_v56 = vmul.f32 %v5874_v51, %v2610_v32  ;;  %v2551_v31 = vmul.f32 %v5858_v35, %v2545_v50  ;;  %v2737_v12 = vmul.f32 0.5, %v2731_v5  ;;  %v6273_v35 = vld [vmem:[#allocation42_spill] sm:$0xff]  ;;  %v2599_v60 = vadd.f32 %v2593_v17, %v2398_v28 }
 0xd9a   :  { %v2344_v0 = vmul.f32 %v6273_v35, %v2301_v13 }
 0xd9b   :  { %v2660_v18 = vmul.f32 %v6272_v58, %v2617_v56  ;;  %v5974_v26 = vmul.f32 %v2737_v12, %v2713_v21  ;;  %v2594_v9 = vmul.f32 %v6275_v22, %v2551_v31  ;;  %v2283_v21 = vmul.f32 %v6277_v61, %v2240_v10 }
 0xd9c   :  { %v2612_v41 = vpop.permute.xlu1 %2611  ;;  %v2350_v4 = vadd.f32 %v2344_v0, %v2161_v54  ;;  %v2672_v15 = vadd.f32 %v2599_v60, %v2532_v53 }
 0xd9d   :  { %v2618_v11 = vmul.f32 %v5874_v51, %v2612_v41  ;;  %v2761_v24 = vpack.c.bf16 %v5974_v26, %v5972_v42  ;;  %v2666_v51 = vadd.f32 %v2660_v18, %v2465_v43  ;;  %v2466_v39 = vadd.f32 %v2460_v14, %v2283_v21  ;;  %v2746_v43 = vld [vmem:[%s6280_s25] sm:$0x1] }
 0xd9e   :  { %v2600_v59 = vadd.f32 %v2594_v9, %v2399_v29  ;;  %v2533_v3 = vadd.f32 %v2527_v6, %v2350_v4  ;;  %v4348_v6 = vld [vmem:[%s6281_s30 + $0x8] sm:$0xff]  }
 0xd9f   :  { %v2661_v57 = vmul.f32 %v6279_v37, %v2618_v11  ;;  %4199 = vmatmul.mubr.bf16.gmra.mxu0 %v2761_v24  ;;  %v2678_v40 = vadd.f32 %v2672_v15, %v2666_v51  ;;  %v4349_v37 = vld [vmem:[%s6281_s30 + $0x10] sm:$0xff]  }
 0xda0   :  { %4202 = vmatprep.mubr.msk.bf16.mxu0 %vm4543_vm2, %v6255_v47  ;;  %v2673_v2 = vadd.f32 %v2600_v59, %v2533_v3 }
 0xda1   :  { %v2667_v52 = vadd.f32 %v2661_v57, %v2466_v39 }
 0xda3   :  { %v2679_v50 = vadd.f32 %v2673_v2, %v2667_v52 }
 0xda5   :  { %v2703_v1 = vpop.permute.xlu0 %2702 }
 0xda6   :  { %v2714_v28 = vadd.f32 %v2703_v1, %v2678_v40 }
 0xda8   :  { %v2720_v32 = vmul.f32 0.5, %v2714_v28 }
 0xda9   :  { %v2708_v5 = vpop.permute.xlu1 %2707  ;;  %v2826_v11 = vpop.permute.xlu0 %2825 }
 0xdaa   :  { %4436 = vtanh.f32 %v2720_v32  ;;  %v2715_v33 = vadd.f32 %v2708_v5, %v2679_v50 }
 0xdac   :  { %v2721_v7 = vmul.f32 0.5, %v2715_v33 }
 0xdad   :  { %v2880_v57 = vpop.permute.xlu1 %2879  ;;  %v2885_v15 = vpop.permute.xlu0 %2884 }
 0xdae   :  { %4438 = vtanh.f32 %v2721_v7 }
 0xdb7   :  { %v4437_v36 = vpop.eup %4436 }
 0xdb8   :  { %v2732_v13 = vadd.f32 1.0, %v4437_v36 }
 0xdba   :  { %v2738_v27 = vmul.f32 0.5, %v2732_v13 }
 0xdbb   :  { %v4439_v63 = vpop.eup %4438 }
 0xdbc   :  { %v2733_v56 = vadd.f32 1.0, %v4439_v63  ;;  %v5988_v16 = vmul.f32 %v2738_v27, %v2714_v28  ;;  %v2890_v28 = vpop.permute.xlu1 %2889 }
 0xdbe   :  { %v2739_v23 = vmul.f32 0.5, %v2733_v56 }
 0xdc0   :  { %v5990_v17 = vmul.f32 %v2739_v23, %v2715_v33  ;;  %v2895_v33 = vpop.permute.xlu0 %2894  ;;  %v2900_v27 = vpop.permute.xlu1 %2899 }
 0xdc2   :  { %v2762_v31 = vpack.c.bf16 %v5990_v17, %v5988_v16 }
 0xdc4   :  { %4203 = vmatmul.mubr.bf16.gmra.mxu0 %v2762_v31 }
 0xdc5   :  { %4232 = vmatprep.mubr.msk.bf16.mxu0 %vm4543_vm2, %v6255_v47 }
 0xe3f   :  { %v2797_v12 = vpop.f32.mrf.mxu0 }
 0xe41   :  { %v4196_v38 = vpop.f32.mrf.mxu0 }
 0xe43   :  { %v2800_v48 = vpop.f32.mrf.mxu0 }
 0xe44   :  { %v2820_v25 = vpack.c.bf16 %v2800_v48, %v2797_v12  ;;  %v2905_v48 = vpop.permute.xlu0 %2904 }
 0xe45   :  { %v4197_v45 = vpop.f32.mrf.mxu0 }
 0xe5f   :  { %v2805_v10 = vpop.f32.mrf.mxu0 }
 0xe61   :  { %v4200_v19 = vpop.f32.mrf.mxu0 }
 0xe63   :  { %v2808_v55 = vpop.f32.mrf.mxu0 }
 0xe64   :  { %v2821_v0 = vpack.c.bf16 %v2808_v55, %v2805_v10 }
 0xe65   :  { %v4201_v20 = vpop.f32.mrf.mxu0 }
 0xe84   :  { %v2813_v58 = vpop.f32.mrf.mxu0 }
 0xe86   :  { %v4204_v18 = vpop.f32.mrf.mxu0 }
 0xe88   :  { %v2816_v41 = vpop.f32.mrf.mxu0 }
 0xe89   :  { %v2822_v30 = vpack.c.bf16 %v2816_v41, %v2813_v58 }
 0xe8a   :  { %v4205_v35 = vpop.f32.mrf.mxu0 }
 0xe8b   :  { %4207 = vmatpush3.bf16.msra.mxu1 %v2822_v30 }
 0xe8c   :  { %4208 = vmatprep.subr.bf16.mxu1 %v6255_v47 }
 0xe8f   :  { %4209 = vmatpush3.bf16.msra.mxu1 %v2821_v0 }
 0xe90   :  { %4210 = vmatprep.subr.bf16.mxu1 %v6255_v47 }
 0xe93   :  { %4211 = vmatpush3.bf16.msra.mxu1 %v2820_v25 }
 0xe94   :  { %4216 = vmatprep.subr.bf16.mxu1 %v6255_v47 }
 0xe96   :  { %4213 = vmatmul.mubr.msk.bf16.vlgmr.msra.gmra.mxu1 %vm1622_vm7, %v2746_v43 }
 0xe97   :  { %4218 = vmatprep.mubr.msk.bf16.mxu1 %vm4543_vm2, %v6255_v47 }
 0xf56   :  { %v2865_v49 = vpop.f32.mrf.mxu1 }
 0xf57   :  { %v2866_v14 = vadd.f32 %v2865_v49, %v2826_v11 }
 0xf58   :  { %v4214_v60 = vpop.f32.mrf.mxu1 }
 0xf59   :  { %v2871_v22 = vmul.f32 0.5, %v2866_v14 }
 0xf5a   :  { %v2868_v9 = vpop.f32.mrf.mxu1 }
 0xf5b   :  { %4440 = vtanh.f32 %v2871_v22 }
 0xf5c   :  { %v4215_v24 = vpop.f32.mrf.mxu1 }
 0xf68   :  { %v4441_v44 = vpop.eup %4440 }
 0xf69   :  { %v2873_v54 = vadd.f32 1.0, %v4441_v44 }
 0xf6b   :  { %v2874_v29 = vmul.f32 0.5, %v2873_v54 }
 0xf6d   :  { %v2875_v61 = vmul.f32 %v2874_v29, %v2866_v14 }
 0xf6f   :  { %v2876_v21 = vpack.c.bf16 %v2875_v61, %v2875_v61 }
 0xf71   :  { %v2932_v53 = vsel %vm582_vm5, %v2876_v21, 0 }
 0xf72   :  { %4217 = vmatpush3.bf16.msra.mxu1 %v2932_v53 }
 0xf73   :  { %4244 = vmatprep.subr.bf16.mxu1 %v6255_v47 }
 0xf75   :  { %4219 = vmatmul.mubr.msk.bf16.vlgmr.msra.gmra.mxu1 %vm578_vm6, %v4347_v62 }
 0xf76   :  { %4222 = vmatprep.mubr.msk.bf16.mxu1 %vm4543_vm2, %v6255_v47 }
 0xf7d   :  { %4223 = vmatmul.mubr.msk.bf16.gmra.mxu1 %vm578_vm6, %v4348_v6 }
 0xf7e   :  { %4226 = vmatprep.mubr.msk.bf16.mxu1 %vm4543_vm2, %v6255_v47 }
 0xf85   :  { %4227 = vmatmul.mubr.msk.bf16.gmra.mxu1 %vm578_vm6, %v4349_v37 }
 0xf86   :  { %4250 = vmatprep.mubr.msk.bf16.mxu1 %vm4543_vm2, %v6255_v47 }
0x1035   :  { %v2968_v51 = vpop.f32.mrf.mxu1 }
0x1036   :  { %v2969_v4 = vadd.f32 %v2968_v51, %v2880_v57 }
0x1037   :  { %v4220_v39 = vpop.f32.mrf.mxu1 }
0x1038   :  { %v2991_v59 = vmul.f32 0.5, %v2969_v4 }
0x1039   :  { %v2971_v3 = vpop.f32.mrf.mxu1 }
0x103a   :  { %4442 = vtanh.f32 %v2991_v59  ;;  %v2972_v40 = vadd.f32 %v2971_v3, %v2885_v15 }
0x103b   :  { %v4221_v52 = vpop.f32.mrf.mxu1 }
0x103c   :  { %v2992_v1 = vmul.f32 0.5, %v2972_v40 }
0x103d   :  { %v2976_v2 = vpop.f32.mrf.mxu1 }
0x103e   :  { %4444 = vtanh.f32 %v2992_v1  ;;  %v2977_v32 = vadd.f32 %v2976_v2, %v2890_v28 }
0x103f   :  { %v4224_v50 = vpop.f32.mrf.mxu1 }
0x1040   :  { %v2993_v5 = vmul.f32 0.5, %v2977_v32 }
0x1041   :  { %v2979_v7 = vpop.f32.mrf.mxu1 }
0x1042   :  { %4446 = vtanh.f32 %v2993_v5  ;;  %v2980_v36 = vadd.f32 %v2979_v7, %v2895_v33 }
0x1043   :  { %v4225_v13 = vpop.f32.mrf.mxu1 }
0x1044   :  { %v2994_v63 = vmul.f32 0.5, %v2980_v36 }
0x1045   :  { %v2984_v56 = vpop.f32.mrf.mxu1 }
0x1046   :  { %4448 = vtanh.f32 %v2994_v63  ;;  %v2985_v23 = vadd.f32 %v2984_v56, %v2900_v27  ;;  %v4351_v56 = vld [vmem:[%s6283_s0 + $0x8] sm:$0xff]  }
0x1047   :  { %v4443_v31 = vpop.eup %4442  ;;  %v4228_v12 = vpop.f32.mrf.mxu1 }
0x1048   :  { %v2995_v38 = vmul.f32 0.5, %v2985_v23  ;;  %v3003_v45 = vadd.f32 1.0, %v4443_v31  ;;  %v4352_v23 = vld [vmem:[%s6283_s0 + $0x10] sm:$0xff]   ;;  %v4353_v31 = vld [vmem:[%s6283_s0 + $0x18] sm:$0xff]   ;;  %v4354_v12 = vld [vmem:[%s6283_s0 + $0x20] sm:$0xff]  }
0x1049   :  { %v2987_v25 = vpop.f32.mrf.mxu1 }
0x104a   :  { %4450 = vtanh.f32 %v2995_v38  ;;  %v2988_v10 = vadd.f32 %v2987_v25, %v2905_v48  ;;  %v3009_v18 = vmul.f32 0.5, %v3003_v45  ;;  %v4355_v38 = vld [vmem:[%s6283_s0 + $0x28] sm:$0xff]   ;;  %v4356_v48 = vld [vmem:[%s6283_s0 + $0x30] sm:$0xff]   ;;  %v4357_v25 = vld [vmem:[%s6283_s0 + $0x38] sm:$0xff]  }
0x104b   :  { %v4445_v19 = vpop.eup %4444  ;;  %v4229_v55 = vpop.f32.mrf.mxu1  ;;  %v4358_v45 = vld [vmem:[%s6283_s0 + $0x40] sm:$0xff]  }
0x104c   :  { %v3004_v20 = vadd.f32 1.0, %v4445_v19  ;;  %v2996_v58 = vmul.f32 0.5, %v2988_v10  ;;  %v4359_v10 = vld [vmem:[%s6283_s0 + $0x48] sm:$0xff]   ;;  %v3279_v19 = vpop.permute.xlu0 %3278 }
0x104e   :  { %v3010_v41 = vmul.f32 0.5, %v3004_v20  ;;  %4452 = vtanh.f32 %v2996_v58 }
0x104f   :  { %v4447_v30 = vpop.eup %4446 }
0x1050   :  { %v3015_v35 = vpack.c.bf16 %v3010_v41, %v3009_v18  ;;  %v3005_v0 = vadd.f32 1.0, %v4447_v30  ;;  %v3269_v20 = vpop.permute.xlu0 %3268 }
0x1052   :  { %4233 = vmatmul.mubr.msk.bf16.vlgmr.msra.gmra.mxu0 %vm578_vm6, %v3015_v35  ;;  %v3011_v49 = vmul.f32 0.5, %v3005_v0 }
0x1053   :  { %v4449_v43 = vpop.eup %4448  ;;  %4236 = vmatprep.mubr.msk.bf16.mxu0 %vm4543_vm2, %v6255_v47 }
0x1054   :  { %v3006_v11 = vadd.f32 1.0, %v4449_v43  ;;  %v3259_v18 = vpop.permute.xlu0 %3258 }
0x1056   :  { %v3012_v14 = vmul.f32 0.5, %v3006_v11 }
0x1057   :  { %v4451_v60 = vpop.eup %4450 }
0x1058   :  { %v3016_v22 = vpack.c.bf16 %v3012_v14, %v3011_v49  ;;  %v3007_v9 = vadd.f32 1.0, %v4451_v60  ;;  %v3249_v30 = vpop.permute.xlu0 %3248 }
0x105a   :  { %4237 = vmatmul.mubr.msk.bf16.gmra.mxu0 %vm578_vm6, %v3016_v22  ;;  %v3013_v54 = vmul.f32 0.5, %v3007_v9 }
0x105b   :  { %v4453_v24 = vpop.eup %4452  ;;  %4240 = vmatprep.mubr.msk.bf16.mxu0 %vm4543_vm2, %v6255_v47 }
0x105c   :  { %v3008_v44 = vadd.f32 1.0, %v4453_v24  ;;  %v3239_v0 = vpop.permute.xlu0 %3238 }
0x105e   :  { %v3014_v29 = vmul.f32 0.5, %v3008_v44 }
0x1060   :  { %v3017_v61 = vpack.c.bf16 %v3014_v29, %v3013_v54  ;;  %v3229_v11 = vpop.permute.xlu0 %3228 }
0x1062   :  { %4241 = vmatmul.mubr.msk.bf16.gmra.mxu0 %vm578_vm6, %v3017_v61 }
0x1063   :  { %3544 = vmatprep.mubr.bf16.mxu0 %v6258_v8 }
0x1064   :  { %v3219_v14 = vpop.permute.xlu0 %3218 }
0x1068   :  { %v3209_v44 = vpop.permute.xlu0 %3208 }
0x1112   :  { %v3061_v21 = vpop.f32.mrf.mxu0 }
0x1113   :  { %v3084_v5 = vmul.f32 %v3061_v21, %v5931_v34  ;;  %v6284_v34 = vld [vmem:[#allocation33_spill] sm:$0xff] }
0x1114   :  { %v4234_v53 = vpop.f32.mrf.mxu0 }
0x1116   :  { %v3064_v62 = vpop.f32.mrf.mxu0 }
0x1117   :  { %v3085_v32 = vmul.f32 %v3064_v62, %v5925_v46 }
0x1118   :  { %v4235_v6 = vpop.f32.mrf.mxu0 }
0x111a   :  { %v3069_v37 = vpop.f32.mrf.mxu0 }
0x111b   :  { %v3086_v2 = vmul.f32 %v3069_v37, %v5972_v42  ;;  %v3098_v42 = vpop.permute.xlu1 %3097 }
0x111c   :  { %v4238_v57 = vpop.f32.mrf.mxu0 }
0x111e   :  { %v3072_v51 = vpop.f32.mrf.mxu0 }
0x111f   :  { %v3087_v1 = vmul.f32 %v3072_v51, %v5974_v26  ;;  %v4350_v26 = vld [vmem:[%s6283_s0] sm:$0xff]   ;;  %v3284_v55 = vpop.permute.xlu1 %3283 }
0x1120   :  { %v4239_v4 = vpop.f32.mrf.mxu0 }
0x1121   :  { %v3093_v50 = vpack.c.bf16 %v3087_v1, %v3086_v2 }
0x1122   :  { %v3077_v39 = vpop.f32.mrf.mxu0 }
0x1123   :  { %v3088_v3 = vmul.f32 %v3077_v39, %v5988_v16  ;;  %v3092_v16 = vpack.c.bf16 %v3085_v32, %v3084_v5  ;;  %v3274_v58 = vpop.permute.xlu1 %3273 }
0x1124   :  { %v4242_v59 = vpop.f32.mrf.mxu0 }
0x1126   :  { %v3080_v15 = vpop.f32.mrf.mxu0 }
0x1127   :  { %v3089_v40 = vmul.f32 %v3080_v15, %v5990_v17  ;;  %v3090_v17 = vld [vmem:[%s6282_s11] sm:$0xf]  ;;  %v3264_v41 = vpop.permute.xlu1 %3263 }
0x1128   :  { %v4243_v52 = vpop.f32.mrf.mxu0 }
0x1129   :  { %v3094_v28 = vpack.c.bf16 %v3089_v40, %v3088_v3 }
0x112b   :  { %4245 = vmatpush3.bf16.msra.mxu1 %v3094_v28  ;;  %v3254_v35 = vpop.permute.xlu1 %3253 }
0x112c   :  { %4246 = vmatprep.subr.bf16.mxu1 %v6255_v47 }
0x112f   :  { %4247 = vmatpush3.bf16.msra.mxu1 %v3093_v50  ;;  %v3244_v43 = vpop.permute.xlu1 %3243 }
0x1130   :  { %4248 = vmatprep.subr.bf16.mxu1 %v6255_v47 }
0x1133   :  { %4249 = vmatpush3.bf16.msra.mxu1 %v3092_v16  ;;  %v3234_v49 = vpop.permute.xlu1 %3233 }
0x1136   :  { %4251 = vmatmul.mubr.msk.bf16.vlgmr.msra.gmra.mxu1 %vm1622_vm7, %v3090_v17 }
0x1137   :  { %4256 = vmatprep.mubr.msk.bf16.mxu1 %vm520_vm4, %v4350_v26  ;;  %v3224_v60 = vpop.permute.xlu1 %3223 }
0x113b   :  { %v3214_v61 = vpop.permute.xlu1 %3213 }
0x11f6   :  { %v3137_v33 = vpop.f32.mrf.mxu1 }
0x11f7   :  { %v3138_v46 = vadd.f32 %v3137_v33, %v3098_v42 }
0x11f8   :  { %v4252_v7 = vpop.f32.mrf.mxu1 }
0x11f9   :  { %v3143_v36 = vadd.f32 %v3138_v46, %v6284_v34 }
0x11fa   :  { %v3140_v47 = vpop.f32.mrf.mxu1 }
0x11fb   :  { %v3205_v13 = vpack.c.bf16 %v3143_v36, %v3143_v36 }
0x11fc   :  { %v4253_v63 = vpop.f32.mrf.mxu1 }
0x11fd   :  { %4276 = vmatprep.subr.msk.bf16.mxu1 %vm174_vm0, %v3205_v13  ;;  %v3387_v27 = vsel %vm174_vm0, %v3205_v13, 0 }
0x11fe   :  { %4255 = vmatpush3.bf16.msra.mxu1 %v3387_v27 }
0x11ff   :  { %3640 = vmatprep.subr.bf16.mxu1 %v6258_v8 }
0x1201   :  { %4257 = vmatmul.mubr.msk.bf16.vlgmr.msra.gmra.mxu1 %vm520_vm4, %v4351_v56 }
0x1202   :  { %4260 = vmatprep.mubr.msk.bf16.mxu1 %vm520_vm4, %v4352_v23 }
0x1209   :  { %4261 = vmatmul.mubr.msk.bf16.gmra.mxu1 %vm520_vm4, %v4353_v31 }
0x120a   :  { %4264 = vmatprep.mubr.msk.bf16.mxu1 %vm520_vm4, %v4354_v12 }
0x1211   :  { %4265 = vmatmul.mubr.msk.bf16.gmra.mxu1 %vm520_vm4, %v4355_v38 }
0x1212   :  { %4268 = vmatprep.mubr.msk.bf16.mxu1 %vm520_vm4, %v4356_v48  ;;  %v3304_v48 = vpop.permute.xlu1 %3303 }
0x1219   :  { %4269 = vmatmul.mubr.msk.bf16.gmra.mxu1 %vm520_vm4, %v4357_v25 }
0x121a   :  { %4272 = vmatprep.mubr.msk.bf16.mxu1 %vm520_vm4, %v4358_v45  ;;  %v3299_v45 = vpop.permute.xlu0 %3298 }
0x1221   :  { %4273 = vmatmul.mubr.msk.bf16.gmra.mxu1 %vm520_vm4, %v4359_v10 }
0x12c1   :  { %v4258_v22 = vpop.f32.mrf.mxu1 }
0x12c2   :  { %v3432_v54 = vadd.f32 %v4258_v22, %v3219_v14 }
0x12c3   :  { %v3423_v9 = vpop.f32.mrf.mxu1 }
0x12c4   :  { %v3424_v53 = vadd.f32 %v3423_v9, %v3209_v44 }
0x12c5   :  { %v4259_v24 = vpop.f32.mrf.mxu1 }
0x12c6   :  { %v3435_v29 = vadd.f32 %v4259_v24, %v3224_v60 }
0x12c7   :  { %v3426_v21 = vpop.f32.mrf.mxu1 }
0x12c8   :  { %v3503_v62 = vpack.c.bf16 %v3435_v29, %v3432_v54  ;;  %v3427_v6 = vadd.f32 %v3426_v21, %v3214_v61  ;;  %v4364_v21 = vld [vmem:[%s4742_s21 + $0x18] sm:$0xff]  }
0x12c9   :  { %v4262_v37 = vpop.f32.mrf.mxu1 }
0x12ca   :  { %v3502_v57 = vpack.c.bf16 %v3427_v6, %v3424_v53  ;;  %v3448_v13 = vadd.f32 %v4262_v37, %v3239_v0  ;;  %v4360_v0 = vld [vmem:[%s4742_s21 + $0x38] sm:$0xff]   ;;  %v4365_v53 = vld [vmem:[%s4742_s21 + $0x10] sm:$0xff]   ;;  %v4367_v6 = vld [vmem:[%s4742_s21] sm:$0xff]  }
0x12cb   :  { %v3439_v51 = vpop.f32.mrf.mxu1  ;;  %3641 = vmatpush1.bf16.msra.mxu1 %v4360_v0  ;;  %v4368_v37 = vld [vmem:[%s4742_s21 + $0x48] sm:$0xff]  }
0x12cc   :  { %v3440_v56 = vadd.f32 %v3439_v51, %v3229_v11  ;;  %3642 = vmatprep.subr.bf16.mxu1 %v6258_v8  ;;  %v4362_v11 = vld [vmem:[%s4742_s21 + $0x28] sm:$0xff]  }
0x12cd   :  { %v4263_v4 = vpop.f32.mrf.mxu1 }
0x12ce   :  { %v3451_v47 = vadd.f32 %v4263_v4, %v3244_v43  ;;  %v4361_v43 = vld [vmem:[%s4742_s21 + $0x30] sm:$0xff]  }
0x12cf   :  { %v3442_v39 = vpop.f32.mrf.mxu1  ;;  %3643 = vmatpush1.bf16.msra.mxu1 %v4361_v43 }
0x12d0   :  { %v3505_v63 = vpack.c.bf16 %v3451_v47, %v3448_v13  ;;  %v3443_v27 = vadd.f32 %v3442_v39, %v3234_v49  ;;  %3644 = vmatprep.subr.bf16.mxu1 %v6258_v8  ;;  %v4363_v49 = vld [vmem:[%s4742_s21 + $0x20] sm:$0xff]  }
0x12d1   :  { %v4266_v59 = vpop.f32.mrf.mxu1 }
0x12d2   :  { %v3464_v33 = vadd.f32 %v4266_v59, %v3259_v18  ;;  %v3504_v23 = vpack.c.bf16 %v3443_v27, %v3440_v56  ;;  %v3289_v18 = vpop.permute.xlu0 %3288 }
0x12d3   :  { %v3455_v15 = vpop.f32.mrf.mxu1  ;;  %3645 = vmatpush1.bf16.msra.mxu1 %v4362_v11 }
0x12d4   :  { %v3456_v34 = vadd.f32 %v3455_v15, %v3249_v30  ;;  %3646 = vmatprep.subr.bf16.mxu1 %v6258_v8 }
0x12d5   :  { %v4267_v3 = vpop.f32.mrf.mxu1 }
0x12d6   :  { %v3467_v42 = vadd.f32 %v4267_v3, %v3264_v41 }
0x12d7   :  { %v3458_v40 = vpop.f32.mrf.mxu1  ;;  %3647 = vmatpush1.bf16.msra.mxu1 %v4363_v49 }
0x12d8   :  { %v3507_v46 = vpack.c.bf16 %v3467_v42, %v3464_v33  ;;  %v3459_v7 = vadd.f32 %v3458_v40, %v3254_v35  ;;  %v4480_v35 = vld [vmem:[%s6137_s24] sm:$0x1]  ;;  %3648 = vmatprep.subr.bf16.mxu1 %v6258_v8 }
0x12d9   :  { %v4270_v52 = vpop.f32.mrf.mxu1 }
0x12da   :  { %v3480_v2 = vadd.f32 %v4270_v52, %v3279_v19  ;;  %v3506_v36 = vpack.c.bf16 %v3459_v7, %v3456_v34 }
0x12db   :  { %v3471_v1 = vpop.f32.mrf.mxu1  ;;  %3649 = vmatpush1.bf16.msra.mxu1 %v4364_v21 }
0x12dc   :  { %v3472_v17 = vadd.f32 %v3471_v1, %v3269_v20  ;;  %v3294_v20 = vpop.permute.xlu1 %3293  ;;  %3650 = vmatprep.subr.bf16.mxu1 %v6258_v8 }
0x12dd   :  { %v4271_v28 = vpop.f32.mrf.mxu1 }
0x12de   :  { %v3483_v32 = vadd.f32 %v4271_v28, %v3284_v55  ;;  %v3920_v28 = vld [vmem:[%s4747_s19] ss:$0 sm:$0xff] }
0x12df   :  { %v3474_v5 = vpop.f32.mrf.mxu1  ;;  %3651 = vmatpush1.bf16.msra.mxu1 %v4365_v53 }
0x12e0   :  { %v3509_v50 = vpack.c.bf16 %v3483_v32, %v3480_v2  ;;  %v3475_v16 = vadd.f32 %v3474_v5, %v3274_v58  ;;  %3652 = vmatprep.subr.bf16.mxu1 %v6258_v8 }
0x12e1   :  { %v4274_v31 = vpop.f32.mrf.mxu1 }
0x12e2   :  { %3513 = vmatpush1.bf16.xpose.msra.mxu0 %v3509_v50  ;;  %v3508_v26 = vpack.c.bf16 %v3475_v16, %v3472_v17  ;;  %v3496_v10 = vadd.f32 %v4274_v31, %v3299_v45 }
0x12e3   :  { %3514 = vmatprep.subr.bf16.mxu0 %v6258_v8  ;;  %v3487_v12 = vpop.f32.mrf.mxu1 }
0x12e4   :  { %v3488_v41 = vadd.f32 %v3487_v12, %v3289_v18 }
0x12e5   :  { %v4275_v38 = vpop.f32.mrf.mxu1 }
0x12e6   :  { %v3499_v25 = vadd.f32 %v4275_v38, %v3304_v48 }
0x12e7   :  { %v3490_v55 = vpop.f32.mrf.mxu1 }
0x12e8   :  { %v3511_v19 = vpack.c.bf16 %v3499_v25, %v3496_v10  ;;  %v3491_v58 = vadd.f32 %v3490_v55, %v3294_v20 }
0x12ea   :  { %3515 = vmatpush1.bf16.xpose.msra.mxu0 %v3508_v26  ;;  %v3510_v30 = vpack.c.bf16 %v3491_v58, %v3488_v41 }
0x12eb   :  { %3516 = vmatprep.subr.bf16.mxu0 %v6258_v8 }
0x12f2   :  { %3517 = vmatpush1.bf16.xpose.msra.mxu0 %v3507_v46 }
0x12f3   :  { %3518 = vmatprep.subr.bf16.mxu0 %v6258_v8 }
0x12fa   :  { %3519 = vmatpush1.bf16.xpose.msra.mxu0 %v3506_v36 }
0x12fb   :  { %3520 = vmatprep.subr.bf16.mxu0 %v6258_v8 }
0x1302   :  { %3521 = vmatpush1.bf16.xpose.msra.mxu0 %v3505_v63 }
0x1303   :  { %3522 = vmatprep.subr.bf16.mxu0 %v6258_v8 }
0x130a   :  { %3523 = vmatpush1.bf16.xpose.msra.mxu0 %v3504_v23 }
0x130b   :  { %3524 = vmatprep.subr.bf16.mxu0 %v6258_v8 }
0x1312   :  { %3525 = vmatpush1.bf16.xpose.msra.mxu0 %v3503_v62  ;;  %v4366_v62 = vld [vmem:[%s4742_s21 + $0x8] sm:$0xff]  }
0x1313   :  { %3526 = vmatprep.subr.bf16.mxu0 %v6258_v8  ;;  %3653 = vmatpush1.bf16.msra.mxu1 %v4366_v62 }
0x1314   :  { %3654 = vmatprep.subr.bf16.mxu1 %v6258_v8 }
0x1317   :  { %3655 = vmatpush1.bf16.msra.mxu1 %v4367_v6 }
0x1318   :  { %3668 = vmatprep.subr.bf16.mxu1 %v6258_v8 }
0x131a   :  { %3527 = vmatpush1.bf16.xpose.msra.mxu0 %v3502_v57  ;;  %v4369_v57 = vld [vmem:[%s4742_s21 + $0x40] sm:$0xff]   ;;  %s3688_s21 = sshll.u32 %s4553_s5, 4  ;;  %s3689_s21 = int_to_ptr.vmem [resolvable:$true] %s3688_s21 }
0x131b   :  { %3540 = vmatprep.subr.bf16.mxu0 %v6258_v8  ;;  %3669 = vmatpush2.bf16.msra.mxu1 %v4368_v37  ;;  %s4481_s9 = scalar_lea.vmem %s3689_s21, 32  ;;  %p4486_p1 = scmp.lt.s32.totalorder %s3689_s21, %s3689_s21 }
0x131c   :  { %3670 = vmatprep.subr.bf16.mxu1 %v6258_v8  ;;  %p4482_p0 = scmp.ne.s32.totalorder %s3689_s21, %s4481_s9  ;;  %p4487_p2 = scmp.lt.s32.totalorder %s4481_s9, %s4481_s9 }
0x131e   :  { %p4488_p3 = por %p4487_p2, %p4486_p1 }
0x131f   :  { %3671 = vmatpush2.bf16.msra.mxu1 %v4369_v57 }
0x1320   :  { %p4489_p4 = pnand %p4488_p3, %p4482_p0 }
0x1322   :  { %3541 = vmatpush2.bf16.xpose.msra.mxu0 %v3511_v19 }
0x1323   :  { %3542 = vmatprep.subr.bf16.mxu0 %v6258_v8 }
0x132a   :  { %3543 = vmatpush2.bf16.xpose.msra.mxu0 %v3510_v30 }
0x1331   :  { %3545 = vmatmul.mubr.bf16.vlgmr.msra.gmra.mxu0 %v4480_v35 }
0x13f1   :  { %v3546_v14 = vpop.f32.mrf.mxu0 }
0x13f2   :  { %v3553_v60 = vmul.f32 %v3546_v14, %v3546_v14 }
0x13f3   :  { %v3548_v22 = vpop.f32.mrf.mxu0 }
0x13f4   :  { %v3554_v9 = vmul.f32 %v3548_v22, %v3548_v22  ;;  %v3556_v44 = vsel %vm3555_vm8, %v3553_v60, 0.0 }
0x13f5   :  { %v3550_v24 = vpop.f32.mrf.mxu0 }
0x13f6   :  { %v3558_v54 = vsel %vm3557_vm9, %v3554_v9, 0.0 }
0x13f7   :  { %v3559_v29 = vadd.f32 %v3558_v54, %v3556_v44  ;;  %v3551_v61 = vpop.f32.mrf.mxu0 }
0x13f9   :  { %3560 = vadd.xlane.f32.xlu0 %v3559_v29 }
0x1482   :  { %v3561_v51 = vpop.xlane.xlu0 %3560 }
0x1483   :  { %v3562_v4 = vmax.f32 %v3561_v51, 1e-24 }
0x1485   :  { %4454 = vrsqrt.f32 %v3562_v4 }
0x1492   :  { %v4455_v39 = vpop.eup %4454 }
0x1493   :  { %v3565_v59 = vmul.f32 %v4455_v39, %v3548_v22  ;;  %v3564_v15 = vmul.f32 %v4455_v39, %v3546_v14 }
0x1495   :  { %v3567_v3 = vmul.f32 20.0, %v3565_v59  ;;  %v3566_v40 = vmul.f32 20.0, %v3564_v15 }
0x1497   :  { %v3569_v52 = vpack.c.bf16 %v3567_v3, %v3567_v3  ;;  %v3568_v1 = vpack.c.bf16 %v3566_v40, %v3566_v40 }
0x1499   :  { %3931 = vmatprep.mubr.msk.bf16.mxu1 %vm3636_vm10, %v3569_v52 }
0x149a   :  { %3673 = vmatmul.mubr.bf16.vlgmr.msra.gmra.mxu1 %v3568_v1 }
0x155a   :  { %v3674_v2 = vpop.f32.mrf.mxu1 }
0x155b   :  { %v3675_v8 = vadd.f32 %v3920_v28, %v3674_v2 }
0x155c   :  { %v3676_v32 = vpop.f32.mrf.mxu1 }
0x155d   :  { %3681 = vst.msk [vmem:[#allocation2] sm:$0x3] %vm3680_vm11, %v3675_v8 }
0x155e   :  { %v3677_v50 = vpop.f32.mrf.mxu1 }
0x155f   :  { %4492 = shalt.err (!%p4489_p4)
}
0x1560   :  { %3691 = dma.vmem_to_hbm [thread:$0]  %s3689_s21, 32, %s4752_s12, [#allocation3]   ;;  %v3678_v5 = vpop.f32.mrf.mxu1 }
0x1561   :  { %4501 = dma.done.wait [#allocation3], 32  }
0x1562   :  { %4502 = vsyncadd [#allocation3], 4294967264 }
0x1563   :  { %3695 = vsyncpa [#allocation3], 1 }

</bundles_post_ra>
